<compile_context>
chip_gen: v7x
topology: tpu7x:2x2x1
jax: 0.10.0
libtpu: 0.0.40
codegen_flags: <defaults>
</compile_context>

<pallas_src>
import math
import functools

import jax
import jax.numpy as jnp
from jax.experimental import pallas as pl
from jax.experimental.pallas import tpu as pltpu

_LN_EPS = 1e-5
_NEG_INF = -1e30   # finite mask value (fully-masked row -> uniform softmax)


# ----------------------------------------------------------------------------
# In-kernel helpers (traced inside the Pallas kernels)
# ----------------------------------------------------------------------------

def _bf16(x):
    return x.astype(jnp.bfloat16)


def _layer_norm(x, g, b, eps):
    mu = jnp.mean(x, axis=-1, keepdims=True)
    var = jnp.mean(jnp.square(x - mu), axis=-1, keepdims=True)
    return (x - mu) * jax.lax.rsqrt(var + eps) * g + b


def _mha_core(q, k, v, bias, wo, bo, nhead, scale):
    """Per-head softmax attention + single fused output projection.

    q: [Sq, E] f32, k/v: [Sk, E] f32, bias: [Sq, Sk] f32 (additive),
    wo: [E, E] bf16, bo: [1, E] f32.  Returns [Sq, E] f32.
    """
    E = q.shape[-1]
    dh = E // nhead
    ctx = []
    for h in range(nhead):                     # static unroll; tiny per-head math only
        sl = slice(h * dh, (h + 1) * dh)
        qh = _bf16(q[:, sl] * scale)
        kh = _bf16(k[:, sl])
        vh = _bf16(v[:, sl])
        s = jax.lax.dot_general(qh, kh, (((1,), (1,)), ((), ())),
                                preferred_element_type=jnp.float32) + bias
        s = s - jnp.max(s, axis=-1, keepdims=True)
        p = jnp.exp(s)
        p = p / jnp.sum(p, axis=-1, keepdims=True)
        ctx.append(jnp.dot(_bf16(p), vh, preferred_element_type=jnp.float32))
    ctx = jnp.concatenate(ctx, axis=-1)                      # [Sq, E]
    return jnp.dot(_bf16(ctx), wo, preferred_element_type=jnp.float32) + bo


def _ffn(x, w1, b1, w2, b2):
    h = jnp.dot(_bf16(x), w1, preferred_element_type=jnp.float32) + b1
    h = jnp.maximum(h, 0.0)
    return jnp.dot(_bf16(h), w2, preferred_element_type=jnp.float32) + b2


# ----------------------------------------------------------------------------
# Fused stack kernels
# ----------------------------------------------------------------------------

def _encoder_stack_kernel(x0_ref, bias_ref,
                          wqkv_ref, bqkv_ref, wo_ref, bo_ref, ln1g_ref, ln1b_ref,
                          w1_ref, b1_ref, w2_ref, b2_ref, ln2g_ref, ln2b_ref,
                          ng_ref, nb_ref,
                          out_ref, x_scr,
                          *, nhead, scale, eps):
    """One (batch, layer) grid step of the encoder stack.

    The per-batch activation lives in `x_scr` (VMEM) across the layer axis.
    """
    l = pl.program_id(1)

    @pl.when(l == 0)
    def _():
        x_scr[...] = x0_ref[0]

    x = x_scr[...]                                           # [S, E] f32
    E = x.shape[-1]
    bias = bias_ref[0]                                       # [S, S] f32

    # self-attention: Q/K/V from a single [E, 3E] matmul
    qkv = jnp.dot(_bf16(x), wqkv_ref[0],
                  preferred_element_type=jnp.float32) + bqkv_ref[0]
    attn = _mha_core(qkv[:, :E], qkv[:, E:2 * E], qkv[:, 2 * E:], bias,
                     wo_ref[0], bo_ref[0], nhead, scale)
    x = _layer_norm(x + attn, ln1g_ref[0], ln1b_ref[0], eps)

    # feed-forward
    y = _ffn(x, w1_ref[0], b1_ref[0], w2_ref[0], b2_ref[0])
    x = _layer_norm(x + y, ln2g_ref[0], ln2b_ref[0], eps)
    x_scr[...] = x

    # final encoder LayerNorm fused into the last layer step
    @pl.when(l == pl.num_programs(1) - 1)
    def _():
        out_ref[0] = _layer_norm(x, ng_ref[...], nb_ref[...], eps)


def _decoder_stack_kernel(x0_ref, mem_ref, sbias_ref, cbias_ref,
                          sa_wqkv_ref, sa_bqkv_ref, sa_wo_ref, sa_bo_ref,
                          ln1g_ref, ln1b_ref,
                          ca_wq_ref, ca_bq_ref, ca_wkv_ref, ca_bkv_ref,
                          ca_wo_ref, ca_bo_ref, ln2g_ref, ln2b_ref,
                          w1_ref, b1_ref, w2_ref, b2_ref, ln3g_ref, ln3b_ref,
                          ng_ref, nb_ref, gw_ref, gb_ref,
                          logits_ref, x_scr,
                          *, nhead, scale, eps):
    """One (batch, layer) grid step of the decoder stack + generator."""
    l = pl.program_id(1)

    @pl.when(l == 0)
    def _():
        x_scr[...] = x0_ref[0]

    x = x_scr[...]                                           # [S_t, E] f32
    E = x.shape[-1]
    mem = mem_ref[0]                                         # [S_s, E] f32

    # decoder self-attention (fused QKV projection)
    qkv = jnp.dot(_bf16(x), sa_wqkv_ref[0],
                  preferred_element_type=jnp.float32) + sa_bqkv_ref[0]
    attn = _mha_core(qkv[:, :E], qkv[:, E:2 * E], qkv[:, 2 * E:], sbias_ref[0],
                     sa_wo_ref[0], sa_bo_ref[0], nhead, scale)
    x = _layer_norm(x + attn, ln1g_ref[0], ln1b_ref[0], eps)

    # cross-attention: q from decoder state, fused K/V from encoder memory
    q = jnp.dot(_bf16(x), ca_wq_ref[0],
                preferred_element_type=jnp.float32) + ca_bq_ref[0]
    kv = jnp.dot(_bf16(mem), ca_wkv_ref[0],
                 preferred_element_type=jnp.float32) + ca_bkv_ref[0]
    attn = _mha_core(q, kv[:, :E], kv[:, E:], cbias_ref[0],
                     ca_wo_ref[0], ca_bo_ref[0], nhead, scale)
    x = _layer_norm(x + attn, ln2g_ref[0], ln2b_ref[0], eps)

    # feed-forward
    y = _ffn(x, w1_ref[0], b1_ref[0], w2_ref[0], b2_ref[0])
    x = _layer_norm(x + y, ln3g_ref[0], ln3b_ref[0], eps)
    x_scr[...] = x

    # final decoder LayerNorm + generator (lane-dense 128-padded vocab) fused in
    @pl.when(l == pl.num_programs(1) - 1)
    def _():
        xo = _layer_norm(x, ng_ref[...], nb_ref[...], eps)
        logits_ref[0] = jnp.dot(_bf16(xo), gw_ref[...],
                                preferred_element_type=jnp.float32) + gb_ref[...]


# ----------------------------------------------------------------------------
# BlockSpec helpers & kernel wrappers
# ----------------------------------------------------------------------------

def _batch_spec(shape):
    zeros = (0,) * (len(shape) - 1)
    return pl.BlockSpec((1,) + tuple(shape[1:]), lambda n, l: (n,) + zeros)


def _layer_spec(shape):
    zeros = (0,) * (len(shape) - 1)
    return pl.BlockSpec((1,) + tuple(shape[1:]), lambda n, l: (l,) + zeros)


def _const_spec(shape):
    zeros = (0,) * len(shape)
    return pl.BlockSpec(tuple(shape), lambda n, l: zeros)


_COMPILER_PARAMS = pltpu.CompilerParams(
    dimension_semantics=("parallel", "arbitrary"),   # batch parallel (v7x megacore)
    vmem_limit_bytes=32 * 1024 * 1024,
)


def encode_stack(src_x, enc_bias, p, nhead):
    N, S, E = src_x.shape
    L = p["enc_wqkv"].shape[0]
    dh = E // nhead
    kern = functools.partial(_encoder_stack_kernel, nhead=nhead,
                             scale=1.0 / math.sqrt(dh), eps=_LN_EPS)
    layer_args = (p["enc_wqkv"], p["enc_bqkv"], p["enc_wo"], p["enc_bo"],
                  p["enc_ln1_g"], p["enc_ln1_b"],
                  p["enc_w1"], p["enc_b1"], p["enc_w2"], p["enc_b2"],
                  p["enc_ln2_g"], p["enc_ln2_b"])
    const_args = (p["enc_norm_g"], p["enc_norm_b"])
    args = (src_x, enc_bias) + layer_args + const_args
    in_specs = ([_batch_spec(src_x.shape), _batch_spec(enc_bias.shape)]
                + [_layer_spec(a.shape) for a in layer_args]
                + [_const_spec(a.shape) for a in const_args])
    return pl.pallas_call(
        kern,
        out_shape=jax.ShapeDtypeStruct((N, S, E), jnp.float32),
        grid=(N, L),
        in_specs=in_specs,
        out_specs=pl.BlockSpec((1, S, E), lambda n, l: (n, 0, 0)),
        scratch_shapes=[pltpu.VMEM((S, E), jnp.float32)],
        compiler_params=_COMPILER_PARAMS,
    )(*args)


def decode_stack(tgt_x, mem, self_bias, cross_bias, p, nhead):
    N, S_t, E = tgt_x.shape
    L = p["dec_sa_wqkv"].shape[0]
    vpad = p["gen_w"].shape[1]
    dh = E // nhead
    kern = functools.partial(_decoder_stack_kernel, nhead=nhead,
                             scale=1.0 / math.sqrt(dh), eps=_LN_EPS)
    layer_args = (p["dec_sa_wqkv"], p["dec_sa_bqkv"], p["dec_sa_wo"], p["dec_sa_bo"],
                  p["dec_ln1_g"], p["dec_ln1_b"],
                  p["dec_ca_wq"], p["dec_ca_bq"], p["dec_ca_wkv"], p["dec_ca_bkv"],
                  p["dec_ca_wo"], p["dec_ca_bo"],
                  p["dec_ln2_g"], p["dec_ln2_b"],
                  p["dec_w1"], p["dec_b1"], p["dec_w2"], p["dec_b2"],
                  p["dec_ln3_g"], p["dec_ln3_b"])
    const_args = (p["dec_norm_g"], p["dec_norm_b"], p["gen_w"], p["gen_b"])
    batch_args = (tgt_x, mem, self_bias, cross_bias)
    args = batch_args + layer_args + const_args
    in_specs = ([_batch_spec(a.shape) for a in batch_args]
                + [_layer_spec(a.shape) for a in layer_args]
                + [_const_spec(a.shape) for a in const_args])
    return pl.pallas_call(
        kern,
        out_shape=jax.ShapeDtypeStruct((N, S_t, vpad), jnp.float32),
        grid=(N, L),
        in_specs=in_specs,
        out_specs=pl.BlockSpec((1, S_t, vpad), lambda n, l: (n, 0, 0)),
        scratch_shapes=[pltpu.VMEM((S_t, E), jnp.float32)],
        compiler_params=_COMPILER_PARAMS,
    )(*args)


# ----------------------------------------------------------------------------
# JAX glue: masks, embeddings, forward pass
# ----------------------------------------------------------------------------

def make_attn_bias(attn_mask, key_padding_mask, n_batch, sq, sk):
    """Per-batch additive attention bias [N, Sq, Sk] (no block-diag waste)."""
    bias = jnp.zeros((n_batch, sq, sk), jnp.float32)
    if attn_mask is not None:
        bias = bias + attn_mask.astype(jnp.float32)[None]
    if key_padding_mask is not None:
        bias = bias + jnp.where(key_padding_mask, _NEG_INF,
                                0.0).astype(jnp.float32)[:, None, :]
    return bias


def seq2seq_transformer_forward(params, src, trg, src_mask, tgt_mask,
                                src_padding_mask, tgt_padding_mask,
                                memory_key_padding_mask, *, nhead, tgt_vocab):
    E = params["src_emb"].shape[1]
    S_src, N = src.shape
    S_tgt = trg.shape[0]

    # TODO(synk): embedding gather, positional-encoding add and mask/bias
    # construction remain XLA glue around the two fused stack kernels;
    # dropout is identity (eval mode).
    src_emb = params["src_emb"][src] * math.sqrt(E) + params["pos_emb"][:S_src]
    tgt_emb = params["tgt_emb"][trg] * math.sqrt(E) + params["pos_emb"][:S_tgt]
    src_x = src_emb.transpose(1, 0, 2)           # [N, S_src, E] batch-major
    tgt_x = tgt_emb.transpose(1, 0, 2)           # [N, S_tgt, E]

    enc_bias = make_attn_bias(src_mask, src_padding_mask, N, S_src, S_src)
    dec_self_bias = make_attn_bias(tgt_mask, tgt_padding_mask, N, S_tgt, S_tgt)
    dec_cross_bias = make_attn_bias(None, memory_key_padding_mask, N, S_tgt, S_src)

    mem = encode_stack(src_x, enc_bias, params, nhead)                 # [N,S_src,E]
    logits = decode_stack(tgt_x, mem, dec_self_bias, dec_cross_bias,
                          params, nhead)                               # [N,S_tgt,Vpad]
    return logits[..., :tgt_vocab].transpose(1, 0, 2)                  # [S_tgt,N,V]


# ----------------------------------------------------------------------------
# Deterministic parameter initialization (bf16 matmul weights, f32 rest)
# ----------------------------------------------------------------------------

def make_pos_embedding(maxlen, E):
    den = jnp.exp(-jnp.arange(0, E, 2, dtype=jnp.float32) * math.log(10000.0) / E)
    pos = jnp.arange(maxlen, dtype=jnp.float32)[:, None]
    pe = jnp.zeros((maxlen, E), jnp.float32)
    pe = pe.at[:, 0::2].set(jnp.sin(pos * den))
    pe = pe.at[:, 1::2].set(jnp.cos(pos * den))
    return pe[:, None, :]                        # [maxlen, 1, E]


def init_params(key, num_enc, num_dec, E, nhead, src_vocab, tgt_vocab, dff,
                maxlen=64):
    kit = iter(list(jax.random.split(key, 64)))

    def w(shape, scale=0.05):                    # bf16 matmul weights
        return (jax.random.normal(next(kit), shape, jnp.float32) * scale
                ).astype(jnp.bfloat16)

    def f32(shape, scale=0.1):
        return jax.random.normal(next(kit), shape, jnp.float32) * scale

    ones = lambda L: jnp.ones((L, 1, E), jnp.float32)
    zeros = lambda L, d: jnp.zeros((L, 1, d), jnp.float32)

    vpad = ((tgt_vocab + 127) // 128) * 128      # lane-dense generator output
    gen_w = (jnp.zeros((E, vpad), jnp.float32)
             .at[:, :tgt_vocab].set(f32((E, tgt_vocab), 0.05))
             .astype(jnp.bfloat16))

    Le, Ld = num_enc, num_dec
    return {
        "src_emb": f32((src_vocab, E)),
        "tgt_emb": f32((tgt_vocab, E)),
        "pos_emb": make_pos_embedding(maxlen, E),
        # encoder stack (weights stacked over layers)
        "enc_wqkv": w((Le, E, 3 * E)), "enc_bqkv": zeros(Le, 3 * E),
        "enc_wo": w((Le, E, E)), "enc_bo": zeros(Le, E),
        "enc_ln1_g": ones(Le), "enc_ln1_b": zeros(Le, E),
        "enc_w1": w((Le, E, dff)), "enc_b1": zeros(Le, dff),
        "enc_w2": w((Le, dff, E)), "enc_b2": zeros(Le, E),
        "enc_ln2_g": ones(Le), "enc_ln2_b": zeros(Le, E),
        "enc_norm_g": jnp.ones((1, E), jnp.float32),
        "enc_norm_b": jnp.zeros((1, E), jnp.float32),
        # decoder stack
        "dec_sa_wqkv": w((Ld, E, 3 * E)), "dec_sa_bqkv": zeros(Ld, 3 * E),
        "dec_sa_wo": w((Ld, E, E)), "dec_sa_bo": zeros(Ld, E),
        "dec_ln1_g": ones(Ld), "dec_ln1_b": zeros(Ld, E),
        "dec_ca_wq": w((Ld, E, E)), "dec_ca_bq": zeros(Ld, E),
        "dec_ca_wkv": w((Ld, E, 2 * E)), "dec_ca_bkv": zeros(Ld, 2 * E),
        "dec_ca_wo": w((Ld, E, E)), "dec_ca_bo": zeros(Ld, E),
        "dec_ln2_g": ones(Ld), "dec_ln2_b": zeros(Ld, E),
        "dec_w1": w((Ld, E, dff)), "dec_b1": zeros(Ld, dff),
        "dec_w2": w((Ld, dff, E)), "dec_b2": zeros(Ld, E),
        "dec_ln3_g": ones(Ld), "dec_ln3_b": zeros(Ld, E),
        "dec_norm_g": jnp.ones((1, E), jnp.float32),
        "dec_norm_b": jnp.zeros((1, E), jnp.float32),
        # generator
        "gen_w": gen_w,
        "gen_b": jnp.zeros((1, vpad), jnp.float32),
    }


# ----------------------------------------------------------------------------
# Main
# ----------------------------------------------------------------------------

if __name__ == "__main__":
    NUM_ENC, NUM_DEC = 2, 2
    EMB, NHEAD, DFF = 32, 4, 64
    SRC_VOCAB, TGT_VOCAB = 50, 60
    S_SRC, S_TGT, BATCH = 8, 8, 2

    key = jax.random.PRNGKey(0)
    k_src, k_trg, k_param = jax.random.split(key, 3)

    src = jax.random.randint(k_src, (S_SRC, BATCH), 0, SRC_VOCAB, dtype=jnp.int32)
    trg = jax.random.randint(k_trg, (S_TGT, BATCH), 0, TGT_VOCAB, dtype=jnp.int32)

    # Masks (torch convention): additive float attn masks; bool padding masks
    # with True == "ignore this position".
    src_mask = jnp.zeros((S_SRC, S_SRC), jnp.float32)
    tgt_mask = jnp.where(jnp.triu(jnp.ones((S_TGT, S_TGT), bool), k=1),
                         _NEG_INF, 0.0).astype(jnp.float32)
    src_padding_mask = jnp.zeros((BATCH, S_SRC), bool).at[1, S_SRC - 1].set(True)
    tgt_padding_mask = jnp.zeros((BATCH, S_TGT), bool).at[1, S_TGT - 1].set(True)
    memory_key_padding_mask = src_padding_mask

    params = init_params(k_param, NUM_ENC, NUM_DEC, EMB, NHEAD,
                         SRC_VOCAB, TGT_VOCAB, DFF)

    fwd = jax.jit(functools.partial(seq2seq_transformer_forward,
                                    nhead=NHEAD, tgt_vocab=TGT_VOCAB))
    logits = fwd(params, src, trg, src_mask, tgt_mask,
                 src_padding_mask, tgt_padding_mask, memory_key_padding_mask)
    jax.block_until_ready(logits)

    assert logits.shape == (S_TGT, BATCH, TGT_VOCAB), logits.shape
    assert bool(jnp.all(jnp.isfinite(logits)))
    print("KERNEL_OK")
</pallas_src>

<mosaic_0001>
module attributes {stable_mosaic.version = 11 : i64} {
  func.func @_encoder_stack_kernel(%arg0: i32, %arg1: i32, %arg2: memref<1x8x32xf32, #tpu.memory_space<vmem>>, %arg3: memref<1x8x8xf32, #tpu.memory_space<vmem>>, %arg4: memref<1x32x96xbf16, #tpu.memory_space<vmem>>, %arg5: memref<1x1x96xf32, #tpu.memory_space<vmem>>, %arg6: memref<1x32x32xbf16, #tpu.memory_space<vmem>>, %arg7: memref<1x1x32xf32, #tpu.memory_space<vmem>>, %arg8: memref<1x1x32xf32, #tpu.memory_space<vmem>>, %arg9: memref<1x1x32xf32, #tpu.memory_space<vmem>>, %arg10: memref<1x32x64xbf16, #tpu.memory_space<vmem>>, %arg11: memref<1x1x64xf32, #tpu.memory_space<vmem>>, %arg12: memref<1x64x32xbf16, #tpu.memory_space<vmem>>, %arg13: memref<1x1x32xf32, #tpu.memory_space<vmem>>, %arg14: memref<1x1x32xf32, #tpu.memory_space<vmem>>, %arg15: memref<1x1x32xf32, #tpu.memory_space<vmem>>, %arg16: memref<1x32xf32, #tpu.memory_space<vmem>>, %arg17: memref<1x32xf32, #tpu.memory_space<vmem>>, %arg18: memref<1x8x32xf32, #tpu.memory_space<vmem>>, %arg19: memref<8x32xf32, #tpu.memory_space<vmem>>) attributes {dimension_semantics = [#tpu.dimension_semantics<parallel>, #tpu.dimension_semantics<arbitrary>], iteration_bounds = array<i64: 2, 2>, scalar_prefetch = 0 : i64, scratch_operands = 1 : i64, tpu.core_type = #tpu.core_type<tc>, window_params = [{transform_indices = @transform_0, window_bounds = array<i64: 1, 8, 32>}, {transform_indices = @transform_1, window_bounds = array<i64: 1, 8, 8>}, {transform_indices = @transform_2, window_bounds = array<i64: 1, 32, 96>}, {transform_indices = @transform_3, window_bounds = array<i64: 1, 1, 96>}, {transform_indices = @transform_4, window_bounds = array<i64: 1, 32, 32>}, {transform_indices = @transform_5, window_bounds = array<i64: 1, 1, 32>}, {transform_indices = @transform_6, window_bounds = array<i64: 1, 1, 32>}, {transform_indices = @transform_7, window_bounds = array<i64: 1, 1, 32>}, {transform_indices = @transform_8, window_bounds = array<i64: 1, 32, 64>}, {transform_indices = @transform_9, window_bounds = array<i64: 1, 1, 64>}, {transform_indices = @transform_10, window_bounds = array<i64: 1, 64, 32>}, {transform_indices = @transform_11, window_bounds = array<i64: 1, 1, 32>}, {transform_indices = @transform_12, window_bounds = array<i64: 1, 1, 32>}, {transform_indices = @transform_13, window_bounds = array<i64: 1, 1, 32>}, {pipeline_mode = #tpu.pipeline_mode<synchronous>, transform_indices = @transform_14, window_bounds = array<i64: 1, 32>}, {pipeline_mode = #tpu.pipeline_mode<synchronous>, transform_indices = @transform_15, window_bounds = array<i64: 1, 32>}, {transform_indices = @transform_16, window_bounds = array<i64: 1, 8, 32>}]} {
    %c0_i32 = arith.constant 0 : i32
    %0 = arith.cmpi eq, %arg1, %c0_i32 : i32
    %1 = arith.extui %0 : i1 to i32
    %c0_i32_0 = arith.constant 0 : i32
    %2 = arith.cmpi ne, %1, %c0_i32_0 : i32
    scf.if %2 {
      %c0_78 = arith.constant 0 : index
      %c0_79 = arith.constant 0 : index
      %c0_80 = arith.constant 0 : index
      %186 = vector.load %arg2[%c0_78, %c0_79, %c0_80] : memref<1x8x32xf32, #tpu.memory_space<vmem>>, vector<1x8x32xf32>
      %187 = vector.shape_cast %186 : vector<1x8x32xf32> to vector<8x32xf32>
      %c0_81 = arith.constant 0 : index
      %c0_82 = arith.constant 0 : index
      %188 = vector.load %arg19[%c0_81, %c0_82] : memref<8x32xf32, #tpu.memory_space<vmem>>, vector<8x32xf32>
      tpu.vector_store %arg19[%c0_81, %c0_82], %187 {strides = array<i32>} : memref<8x32xf32, #tpu.memory_space<vmem>>, vector<8x32xf32>,
    } else {
    }
    %c0 = arith.constant 0 : index
    %c0_1 = arith.constant 0 : index
    %3 = vector.load %arg19[%c0, %c0_1] : memref<8x32xf32, #tpu.memory_space<vmem>>, vector<8x32xf32>
    %c0_2 = arith.constant 0 : index
    %c0_3 = arith.constant 0 : index
    %c0_4 = arith.constant 0 : index
    %4 = vector.load %arg3[%c0_2, %c0_3, %c0_4] : memref<1x8x8xf32, #tpu.memory_space<vmem>>, vector<1x8x8xf32>
    %5 = vector.shape_cast %4 : vector<1x8x8xf32> to vector<8x8xf32>
    %6 = arith.truncf %3 : vector<8x32xf32> to vector<8x32xbf16>
    %c0_5 = arith.constant 0 : index
    %c0_6 = arith.constant 0 : index
    %c0_7 = arith.constant 0 : index
    %7 = vector.load %arg4[%c0_5, %c0_6, %c0_7] : memref<1x32x96xbf16, #tpu.memory_space<vmem>>, vector<1x32x96xbf16>
    %8 = vector.shape_cast %7 : vector<1x32x96xbf16> to vector<32x96xbf16>
    %cst = arith.constant dense<0.000000e+00> : vector<8x96xf32>
    %9 = tpu.matmul %6, %8, %cst {dimension_numbers = #tpu.dot_dimension_numbers<[1], [0], [0], [1], [0, 0, 1, 1], [], []>} : vector<8x32xbf16>, vector<32x96xbf16>, vector<8x96xf32> -> vector<8x96xf32>
    %c0_8 = arith.constant 0 : index
    %c0_9 = arith.constant 0 : index
    %c0_10 = arith.constant 0 : index
    %10 = vector.load %arg5[%c0_8, %c0_9, %c0_10] : memref<1x1x96xf32, #tpu.memory_space<vmem>>, vector<1x1x96xf32>
    %11 = vector.shape_cast %10 : vector<1x1x96xf32> to vector<1x96xf32>
    %12 = vector.broadcast %11 : vector<1x96xf32> to vector<8x96xf32>
    %13 = arith.addf %9, %12 : vector<8x96xf32>
    %14 = vector.extract_strided_slice %13 {offsets = [0, 0], sizes = [8, 32], strides = [1, 1]} : vector<8x96xf32> to vector<8x32xf32>
    %15 = vector.extract_strided_slice %13 {offsets = [0, 32], sizes = [8, 32], strides = [1, 1]} : vector<8x96xf32> to vector<8x32xf32>
    %16 = vector.extract_strided_slice %13 {offsets = [0, 64], sizes = [8, 32], strides = [1, 1]} : vector<8x96xf32> to vector<8x32xf32>
    %c0_11 = arith.constant 0 : index
    %c0_12 = arith.constant 0 : index
    %c0_13 = arith.constant 0 : index
    %17 = vector.load %arg6[%c0_11, %c0_12, %c0_13] : memref<1x32x32xbf16, #tpu.memory_space<vmem>>, vector<1x32x32xbf16>
    %18 = vector.shape_cast %17 : vector<1x32x32xbf16> to vector<32x32xbf16>
    %c0_14 = arith.constant 0 : index
    %c0_15 = arith.constant 0 : index
    %c0_16 = arith.constant 0 : index
    %19 = vector.load %arg7[%c0_14, %c0_15, %c0_16] : memref<1x1x32xf32, #tpu.memory_space<vmem>>, vector<1x1x32xf32>
    %20 = vector.shape_cast %19 : vector<1x1x32xf32> to vector<1x32xf32>
    %21 = vector.extract_strided_slice %14 {offsets = [0, 0], sizes = [8, 8], strides = [1, 1]} : vector<8x32xf32> to vector<8x8xf32>
    %cst_17 = arith.constant 0.353553385 : f32
    %22 = vector.broadcast %cst_17 : f32 to vector<8x8xf32>
    %23 = arith.mulf %21, %22 : vector<8x8xf32>
    %24 = arith.truncf %23 : vector<8x8xf32> to vector<8x8xbf16>
    %25 = vector.extract_strided_slice %15 {offsets = [0, 0], sizes = [8, 8], strides = [1, 1]} : vector<8x32xf32> to vector<8x8xf32>
    %26 = arith.truncf %25 : vector<8x8xf32> to vector<8x8xbf16>
    %27 = vector.extract_strided_slice %16 {offsets = [0, 0], sizes = [8, 8], strides = [1, 1]} : vector<8x32xf32> to vector<8x8xf32>
    %28 = arith.truncf %27 : vector<8x8xf32> to vector<8x8xbf16>
    %cst_18 = arith.constant dense<0.000000e+00> : vector<8x8xf32>
    %29 = tpu.matmul %24, %26, %cst_18 {dimension_numbers = #tpu.dot_dimension_numbers<[1], [1], [0], [0], [0, 0, 1, 0], [], []>} : vector<8x8xbf16>, vector<8x8xbf16>, vector<8x8xf32> -> vector<8x8xf32>
    %30 = arith.addf %29, %5 : vector<8x8xf32>
    %cst_19 = arith.constant dense<0xFF800000> : vector<8xf32>
    %31 = vector.multi_reduction <maximumf>, %30, %cst_19 [1] : vector<8x8xf32> to vector<8xf32>
    %32 = vector.shape_cast %31 : vector<8xf32> to vector<8x1xf32>
    %33 = vector.broadcast %32 : vector<8x1xf32> to vector<8x8xf32>
    %34 = arith.subf %30, %33 : vector<8x8xf32>
    %35 = math.exp %34 : vector<8x8xf32>
    %cst_20 = arith.constant dense<0.000000e+00> : vector<8xf32>
    %36 = vector.multi_reduction <add>, %35, %cst_20 [1] : vector<8x8xf32> to vector<8xf32>
    %37 = vector.shape_cast %36 : vector<8xf32> to vector<8x1xf32>
    %38 = vector.broadcast %37 : vector<8x1xf32> to vector<8x8xf32>
    %39 = arith.divf %35, %38 : vector<8x8xf32>
    %40 = arith.truncf %39 : vector<8x8xf32> to vector<8x8xbf16>
    %cst_21 = arith.constant dense<0.000000e+00> : vector<8x8xf32>
    %41 = tpu.matmul %40, %28, %cst_21 {dimension_numbers = #tpu.dot_dimension_numbers<[1], [0], [0], [1], [0, 0, 1, 1], [], []>} : vector<8x8xbf16>, vector<8x8xbf16>, vector<8x8xf32> -> vector<8x8xf32>
    %42 = vector.extract_strided_slice %14 {offsets = [0, 8], sizes = [8, 8], strides = [1, 1]} : vector<8x32xf32> to vector<8x8xf32>
    %cst_22 = arith.constant 0.353553385 : f32
    %43 = vector.broadcast %cst_22 : f32 to vector<8x8xf32>
    %44 = arith.mulf %42, %43 : vector<8x8xf32>
    %45 = arith.truncf %44 : vector<8x8xf32> to vector<8x8xbf16>
    %46 = vector.extract_strided_slice %15 {offsets = [0, 8], sizes = [8, 8], strides = [1, 1]} : vector<8x32xf32> to vector<8x8xf32>
    %47 = arith.truncf %46 : vector<8x8xf32> to vector<8x8xbf16>
    %48 = vector.extract_strided_slice %16 {offsets = [0, 8], sizes = [8, 8], strides = [1, 1]} : vector<8x32xf32> to vector<8x8xf32>
    %49 = arith.truncf %48 : vector<8x8xf32> to vector<8x8xbf16>
    %cst_23 = arith.constant dense<0.000000e+00> : vector<8x8xf32>
    %50 = tpu.matmul %45, %47, %cst_23 {dimension_numbers = #tpu.dot_dimension_numbers<[1], [1], [0], [0], [0, 0, 1, 0], [], []>} : vector<8x8xbf16>, vector<8x8xbf16>, vector<8x8xf32> -> vector<8x8xf32>
    %51 = arith.addf %50, %5 : vector<8x8xf32>
    %cst_24 = arith.constant dense<0xFF800000> : vector<8xf32>
    %52 = vector.multi_reduction <maximumf>, %51, %cst_24 [1] : vector<8x8xf32> to vector<8xf32>
    %53 = vector.shape_cast %52 : vector<8xf32> to vector<8x1xf32>
    %54 = vector.broadcast %53 : vector<8x1xf32> to vector<8x8xf32>
    %55 = arith.subf %51, %54 : vector<8x8xf32>
    %56 = math.exp %55 : vector<8x8xf32>
    %cst_25 = arith.constant dense<0.000000e+00> : vector<8xf32>
    %57 = vector.multi_reduction <add>, %56, %cst_25 [1] : vector<8x8xf32> to vector<8xf32>
    %58 = vector.shape_cast %57 : vector<8xf32> to vector<8x1xf32>
    %59 = vector.broadcast %58 : vector<8x1xf32> to vector<8x8xf32>
    %60 = arith.divf %56, %59 : vector<8x8xf32>
    %61 = arith.truncf %60 : vector<8x8xf32> to vector<8x8xbf16>
    %cst_26 = arith.constant dense<0.000000e+00> : vector<8x8xf32>
    %62 = tpu.matmul %61, %49, %cst_26 {dimension_numbers = #tpu.dot_dimension_numbers<[1], [0], [0], [1], [0, 0, 1, 1], [], []>} : vector<8x8xbf16>, vector<8x8xbf16>, vector<8x8xf32> -> vector<8x8xf32>
    %63 = vector.extract_strided_slice %14 {offsets = [0, 16], sizes = [8, 8], strides = [1, 1]} : vector<8x32xf32> to vector<8x8xf32>
    %cst_27 = arith.constant 0.353553385 : f32
    %64 = vector.broadcast %cst_27 : f32 to vector<8x8xf32>
    %65 = arith.mulf %63, %64 : vector<8x8xf32>
    %66 = arith.truncf %65 : vector<8x8xf32> to vector<8x8xbf16>
    %67 = vector.extract_strided_slice %15 {offsets = [0, 16], sizes = [8, 8], strides = [1, 1]} : vector<8x32xf32> to vector<8x8xf32>
    %68 = arith.truncf %67 : vector<8x8xf32> to vector<8x8xbf16>
    %69 = vector.extract_strided_slice %16 {offsets = [0, 16], sizes = [8, 8], strides = [1, 1]} : vector<8x32xf32> to vector<8x8xf32>
    %70 = arith.truncf %69 : vector<8x8xf32> to vector<8x8xbf16>
    %cst_28 = arith.constant dense<0.000000e+00> : vector<8x8xf32>
    %71 = tpu.matmul %66, %68, %cst_28 {dimension_numbers = #tpu.dot_dimension_numbers<[1], [1], [0], [0], [0, 0, 1, 0], [], []>} : vector<8x8xbf16>, vector<8x8xbf16>, vector<8x8xf32> -> vector<8x8xf32>
    %72 = arith.addf %71, %5 : vector<8x8xf32>
    %cst_29 = arith.constant dense<0xFF800000> : vector<8xf32>
    %73 = vector.multi_reduction <maximumf>, %72, %cst_29 [1] : vector<8x8xf32> to vector<8xf32>
    %74 = vector.shape_cast %73 : vector<8xf32> to vector<8x1xf32>
    %75 = vector.broadcast %74 : vector<8x1xf32> to vector<8x8xf32>
    %76 = arith.subf %72, %75 : vector<8x8xf32>
    %77 = math.exp %76 : vector<8x8xf32>
    %cst_30 = arith.constant dense<0.000000e+00> : vector<8xf32>
    %78 = vector.multi_reduction <add>, %77, %cst_30 [1] : vector<8x8xf32> to vector<8xf32>
    %79 = vector.shape_cast %78 : vector<8xf32> to vector<8x1xf32>
    %80 = vector.broadcast %79 : vector<8x1xf32> to vector<8x8xf32>
    %81 = arith.divf %77, %80 : vector<8x8xf32>
    %82 = arith.truncf %81 : vector<8x8xf32> to vector<8x8xbf16>
    %cst_31 = arith.constant dense<0.000000e+00> : vector<8x8xf32>
    %83 = tpu.matmul %82, %70, %cst_31 {dimension_numbers = #tpu.dot_dimension_numbers<[1], [0], [0], [1], [0, 0, 1, 1], [], []>} : vector<8x8xbf16>, vector<8x8xbf16>, vector<8x8xf32> -> vector<8x8xf32>
    %84 = vector.extract_strided_slice %14 {offsets = [0, 24], sizes = [8, 8], strides = [1, 1]} : vector<8x32xf32> to vector<8x8xf32>
    %cst_32 = arith.constant 0.353553385 : f32
    %85 = vector.broadcast %cst_32 : f32 to vector<8x8xf32>
    %86 = arith.mulf %84, %85 : vector<8x8xf32>
    %87 = arith.truncf %86 : vector<8x8xf32> to vector<8x8xbf16>
    %88 = vector.extract_strided_slice %15 {offsets = [0, 24], sizes = [8, 8], strides = [1, 1]} : vector<8x32xf32> to vector<8x8xf32>
    %89 = arith.truncf %88 : vector<8x8xf32> to vector<8x8xbf16>
    %90 = vector.extract_strided_slice %16 {offsets = [0, 24], sizes = [8, 8], strides = [1, 1]} : vector<8x32xf32> to vector<8x8xf32>
    %91 = arith.truncf %90 : vector<8x8xf32> to vector<8x8xbf16>
    %cst_33 = arith.constant dense<0.000000e+00> : vector<8x8xf32>
    %92 = tpu.matmul %87, %89, %cst_33 {dimension_numbers = #tpu.dot_dimension_numbers<[1], [1], [0], [0], [0, 0, 1, 0], [], []>} : vector<8x8xbf16>, vector<8x8xbf16>, vector<8x8xf32> -> vector<8x8xf32>
    %93 = arith.addf %92, %5 : vector<8x8xf32>
    %cst_34 = arith.constant dense<0xFF800000> : vector<8xf32>
    %94 = vector.multi_reduction <maximumf>, %93, %cst_34 [1] : vector<8x8xf32> to vector<8xf32>
    %95 = vector.shape_cast %94 : vector<8xf32> to vector<8x1xf32>
    %96 = vector.broadcast %95 : vector<8x1xf32> to vector<8x8xf32>
    %97 = arith.subf %93, %96 : vector<8x8xf32>
    %98 = math.exp %97 : vector<8x8xf32>
    %cst_35 = arith.constant dense<0.000000e+00> : vector<8xf32>
    %99 = vector.multi_reduction <add>, %98, %cst_35 [1] : vector<8x8xf32> to vector<8xf32>
    %100 = vector.shape_cast %99 : vector<8xf32> to vector<8x1xf32>
    %101 = vector.broadcast %100 : vector<8x1xf32> to vector<8x8xf32>
    %102 = arith.divf %98, %101 : vector<8x8xf32>
    %103 = arith.truncf %102 : vector<8x8xf32> to vector<8x8xbf16>
    %cst_36 = arith.constant dense<0.000000e+00> : vector<8x8xf32>
    %104 = tpu.matmul %103, %91, %cst_36 {dimension_numbers = #tpu.dot_dimension_numbers<[1], [0], [0], [1], [0, 0, 1, 1], [], []>} : vector<8x8xbf16>, vector<8x8xbf16>, vector<8x8xf32> -> vector<8x8xf32>
    %105 = tpu.concatenate %41, %62, %83, %104 in 1 : vector<8x8xf32>, vector<8x8xf32>, vector<8x8xf32>, vector<8x8xf32> -> vector<8x32xf32>
    %106 = arith.truncf %105 : vector<8x32xf32> to vector<8x32xbf16>
    %cst_37 = arith.constant dense<0.000000e+00> : vector<8x32xf32>
    %107 = tpu.matmul %106, %18, %cst_37 {dimension_numbers = #tpu.dot_dimension_numbers<[1], [0], [0], [1], [0, 0, 1, 1], [], []>} : vector<8x32xbf16>, vector<32x32xbf16>, vector<8x32xf32> -> vector<8x32xf32>
    %108 = vector.broadcast %20 : vector<1x32xf32> to vector<8x32xf32>
    %109 = arith.addf %107, %108 : vector<8x32xf32>
    %110 = arith.addf %3, %109 : vector<8x32xf32>
    %c0_38 = arith.constant 0 : index
    %c0_39 = arith.constant 0 : index
    %c0_40 = arith.constant 0 : index
    %111 = vector.load %arg8[%c0_38, %c0_39, %c0_40] : memref<1x1x32xf32, #tpu.memory_space<vmem>>, vector<1x1x32xf32>
    %112 = vector.shape_cast %111 : vector<1x1x32xf32> to vector<1x32xf32>
    %c0_41 = arith.constant 0 : index
    %c0_42 = arith.constant 0 : index
    %c0_43 = arith.constant 0 : index
    %113 = vector.load %arg9[%c0_41, %c0_42, %c0_43] : memref<1x1x32xf32, #tpu.memory_space<vmem>>, vector<1x1x32xf32>
    %114 = vector.shape_cast %113 : vector<1x1x32xf32> to vector<1x32xf32>
    %cst_44 = arith.constant dense<0.000000e+00> : vector<8xf32>
    %115 = vector.multi_reduction <add>, %110, %cst_44 [1] : vector<8x32xf32> to vector<8xf32>
    %116 = vector.shape_cast %115 : vector<8xf32> to vector<8x1xf32>
    %cst_45 = arith.constant 3.200000e+01 : f32
    %117 = vector.broadcast %cst_45 : f32 to vector<8x1xf32>
    %118 = arith.divf %116, %117 : vector<8x1xf32>
    %119 = vector.broadcast %118 : vector<8x1xf32> to vector<8x32xf32>
    %120 = arith.subf %110, %119 : vector<8x32xf32>
    %121 = arith.mulf %120, %120 : vector<8x32xf32>
    %cst_46 = arith.constant dense<0.000000e+00> : vector<8xf32>
    %122 = vector.multi_reduction <add>, %121, %cst_46 [1] : vector<8x32xf32> to vector<8xf32>
    %123 = vector.shape_cast %122 : vector<8xf32> to vector<8x1xf32>
    %cst_47 = arith.constant 3.200000e+01 : f32
    %124 = vector.broadcast %cst_47 : f32 to vector<8x1xf32>
    %125 = arith.divf %123, %124 : vector<8x1xf32>
    %126 = vector.broadcast %118 : vector<8x1xf32> to vector<8x32xf32>
    %127 = arith.subf %110, %126 : vector<8x32xf32>
    %cst_48 = arith.constant 9.99999974E-6 : f32
    %128 = vector.broadcast %cst_48 : f32 to vector<8x1xf32>
    %129 = arith.addf %125, %128 : vector<8x1xf32>
    %130 = math.rsqrt %129 : vector<8x1xf32>
    %131 = vector.broadcast %130 : vector<8x1xf32> to vector<8x32xf32>
    %132 = arith.mulf %127, %131 : vector<8x32xf32>
    %133 = vector.broadcast %112 : vector<1x32xf32> to vector<8x32xf32>
    %134 = arith.mulf %132, %133 : vector<8x32xf32>
    %135 = vector.broadcast %114 : vector<1x32xf32> to vector<8x32xf32>
    %136 = arith.addf %134, %135 : vector<8x32xf32>
    %c0_49 = arith.constant 0 : index
    %c0_50 = arith.constant 0 : index
    %c0_51 = arith.constant 0 : index
    %137 = vector.load %arg10[%c0_49, %c0_50, %c0_51] : memref<1x32x64xbf16, #tpu.memory_space<vmem>>, vector<1x32x64xbf16>
    %138 = vector.shape_cast %137 : vector<1x32x64xbf16> to vector<32x64xbf16>
    %c0_52 = arith.constant 0 : index
    %c0_53 = arith.constant 0 : index
    %c0_54 = arith.constant 0 : index
    %139 = vector.load %arg11[%c0_52, %c0_53, %c0_54] : memref<1x1x64xf32, #tpu.memory_space<vmem>>, vector<1x1x64xf32>
    %140 = vector.shape_cast %139 : vector<1x1x64xf32> to vector<1x64xf32>
    %c0_55 = arith.constant 0 : index
    %c0_56 = arith.constant 0 : index
    %c0_57 = arith.constant 0 : index
    %141 = vector.load %arg12[%c0_55, %c0_56, %c0_57] : memref<1x64x32xbf16, #tpu.memory_space<vmem>>, vector<1x64x32xbf16>
    %142 = vector.shape_cast %141 : vector<1x64x32xbf16> to vector<64x32xbf16>
    %c0_58 = arith.constant 0 : index
    %c0_59 = arith.constant 0 : index
    %c0_60 = arith.constant 0 : index
    %143 = vector.load %arg13[%c0_58, %c0_59, %c0_60] : memref<1x1x32xf32, #tpu.memory_space<vmem>>, vector<1x1x32xf32>
    %144 = vector.shape_cast %143 : vector<1x1x32xf32> to vector<1x32xf32>
    %145 = arith.truncf %136 : vector<8x32xf32> to vector<8x32xbf16>
    %cst_61 = arith.constant dense<0.000000e+00> : vector<8x64xf32>
    %146 = tpu.matmul %145, %138, %cst_61 {dimension_numbers = #tpu.dot_dimension_numbers<[1], [0], [0], [1], [0, 0, 1, 1], [], []>} : vector<8x32xbf16>, vector<32x64xbf16>, vector<8x64xf32> -> vector<8x64xf32>
    %147 = vector.broadcast %140 : vector<1x64xf32> to vector<8x64xf32>
    %148 = arith.addf %146, %147 : vector<8x64xf32>
    %cst_62 = arith.constant 0.000000e+00 : f32
    %149 = vector.broadcast %cst_62 : f32 to vector<8x64xf32>
    %150 = arith.maximumf %148, %149 : vector<8x64xf32>
    %151 = arith.truncf %150 : vector<8x64xf32> to vector<8x64xbf16>
    %cst_63 = arith.constant dense<0.000000e+00> : vector<8x32xf32>
    %152 = tpu.matmul %151, %142, %cst_63 {dimension_numbers = #tpu.dot_dimension_numbers<[1], [0], [0], [1], [0, 0, 1, 1], [], []>} : vector<8x64xbf16>, vector<64x32xbf16>, vector<8x32xf32> -> vector<8x32xf32>
    %153 = vector.broadcast %144 : vector<1x32xf32> to vector<8x32xf32>
    %154 = arith.addf %152, %153 : vector<8x32xf32>
    %155 = arith.addf %136, %154 : vector<8x32xf32>
    %c0_64 = arith.constant 0 : index
    %c0_65 = arith.constant 0 : index
    %c0_66 = arith.constant 0 : index
    %156 = vector.load %arg14[%c0_64, %c0_65, %c0_66] : memref<1x1x32xf32, #tpu.memory_space<vmem>>, vector<1x1x32xf32>
    %157 = vector.shape_cast %156 : vector<1x1x32xf32> to vector<1x32xf32>
    %c0_67 = arith.constant 0 : index
    %c0_68 = arith.constant 0 : index
    %c0_69 = arith.constant 0 : index
    %158 = vector.load %arg15[%c0_67, %c0_68, %c0_69] : memref<1x1x32xf32, #tpu.memory_space<vmem>>, vector<1x1x32xf32>
    %159 = vector.shape_cast %158 : vector<1x1x32xf32> to vector<1x32xf32>
    %cst_70 = arith.constant dense<0.000000e+00> : vector<8xf32>
    %160 = vector.multi_reduction <add>, %155, %cst_70 [1] : vector<8x32xf32> to vector<8xf32>
    %161 = vector.shape_cast %160 : vector<8xf32> to vector<8x1xf32>
    %cst_71 = arith.constant 3.200000e+01 : f32
    %162 = vector.broadcast %cst_71 : f32 to vector<8x1xf32>
    %163 = arith.divf %161, %162 : vector<8x1xf32>
    %164 = vector.broadcast %163 : vector<8x1xf32> to vector<8x32xf32>
    %165 = arith.subf %155, %164 : vector<8x32xf32>
    %166 = arith.mulf %165, %165 : vector<8x32xf32>
    %cst_72 = arith.constant dense<0.000000e+00> : vector<8xf32>
    %167 = vector.multi_reduction <add>, %166, %cst_72 [1] : vector<8x32xf32> to vector<8xf32>
    %168 = vector.shape_cast %167 : vector<8xf32> to vector<8x1xf32>
    %cst_73 = arith.constant 3.200000e+01 : f32
    %169 = vector.broadcast %cst_73 : f32 to vector<8x1xf32>
    %170 = arith.divf %168, %169 : vector<8x1xf32>
    %171 = vector.broadcast %163 : vector<8x1xf32> to vector<8x32xf32>
    %172 = arith.subf %155, %171 : vector<8x32xf32>
    %cst_74 = arith.constant 9.99999974E-6 : f32
    %173 = vector.broadcast %cst_74 : f32 to vector<8x1xf32>
    %174 = arith.addf %170, %173 : vector<8x1xf32>
    %175 = math.rsqrt %174 : vector<8x1xf32>
    %176 = vector.broadcast %175 : vector<8x1xf32> to vector<8x32xf32>
    %177 = arith.mulf %172, %176 : vector<8x32xf32>
    %178 = vector.broadcast %157 : vector<1x32xf32> to vector<8x32xf32>
    %179 = arith.mulf %177, %178 : vector<8x32xf32>
    %180 = vector.broadcast %159 : vector<1x32xf32> to vector<8x32xf32>
    %181 = arith.addf %179, %180 : vector<8x32xf32>
    %c0_75 = arith.constant 0 : index
    %c0_76 = arith.constant 0 : index
    %182 = vector.load %arg19[%c0_75, %c0_76] : memref<8x32xf32, #tpu.memory_space<vmem>>, vector<8x32xf32>
    tpu.vector_store %arg19[%c0_75, %c0_76], %181 {strides = array<i32>} : memref<8x32xf32, #tpu.memory_space<vmem>>, vector<8x32xf32>,
    %c1_i32 = arith.constant 1 : i32
    %183 = arith.cmpi eq, %arg1, %c1_i32 : i32
    %184 = arith.extui %183 : i1 to i32
    %c0_i32_77 = arith.constant 0 : i32
    %185 = arith.cmpi ne, %184, %c0_i32_77 : i32
    scf.if %185 {
      %c0_78 = arith.constant 0 : index
      %c0_79 = arith.constant 0 : index
      %186 = vector.load %arg16[%c0_78, %c0_79] : memref<1x32xf32, #tpu.memory_space<vmem>>, vector<1x32xf32>
      %c0_80 = arith.constant 0 : index
      %c0_81 = arith.constant 0 : index
      %187 = vector.load %arg17[%c0_80, %c0_81] : memref<1x32xf32, #tpu.memory_space<vmem>>, vector<1x32xf32>
      %cst_82 = arith.constant dense<0.000000e+00> : vector<8xf32>
      %188 = vector.multi_reduction <add>, %181, %cst_82 [1] : vector<8x32xf32> to vector<8xf32>
      %189 = vector.shape_cast %188 : vector<8xf32> to vector<8x1xf32>
      %cst_83 = arith.constant 3.200000e+01 : f32
      %190 = vector.broadcast %cst_83 : f32 to vector<8x1xf32>
      %191 = arith.divf %189, %190 : vector<8x1xf32>
      %192 = vector.broadcast %191 : vector<8x1xf32> to vector<8x32xf32>
      %193 = arith.subf %181, %192 : vector<8x32xf32>
      %194 = arith.mulf %193, %193 : vector<8x32xf32>
      %cst_84 = arith.constant dense<0.000000e+00> : vector<8xf32>
      %195 = vector.multi_reduction <add>, %194, %cst_84 [1] : vector<8x32xf32> to vector<8xf32>
      %196 = vector.shape_cast %195 : vector<8xf32> to vector<8x1xf32>
      %cst_85 = arith.constant 3.200000e+01 : f32
      %197 = vector.broadcast %cst_85 : f32 to vector<8x1xf32>
      %198 = arith.divf %196, %197 : vector<8x1xf32>
      %199 = vector.broadcast %191 : vector<8x1xf32> to vector<8x32xf32>
      %200 = arith.subf %181, %199 : vector<8x32xf32>
      %cst_86 = arith.constant 9.99999974E-6 : f32
      %201 = vector.broadcast %cst_86 : f32 to vector<8x1xf32>
      %202 = arith.addf %198, %201 : vector<8x1xf32>
      %203 = math.rsqrt %202 : vector<8x1xf32>
      %204 = vector.broadcast %203 : vector<8x1xf32> to vector<8x32xf32>
      %205 = arith.mulf %200, %204 : vector<8x32xf32>
      %206 = vector.broadcast %186 : vector<1x32xf32> to vector<8x32xf32>
      %207 = arith.mulf %205, %206 : vector<8x32xf32>
      %208 = vector.broadcast %187 : vector<1x32xf32> to vector<8x32xf32>
      %209 = arith.addf %207, %208 : vector<8x32xf32>
      %c0_87 = arith.constant 0 : index
      %c0_88 = arith.constant 0 : index
      %c0_89 = arith.constant 0 : index
      %210 = vector.load %arg18[%c0_87, %c0_88, %c0_89] : memref<1x8x32xf32, #tpu.memory_space<vmem>>, vector<1x8x32xf32>
      %211 = vector.shape_cast %210 : vector<1x8x32xf32> to vector<8x32xf32>
      %212 = vector.shape_cast %209 : vector<8x32xf32> to vector<1x8x32xf32>
      tpu.vector_store %arg18[%c0_87, %c0_88, %c0_89], %212 {strides = array<i32>} : memref<1x8x32xf32, #tpu.memory_space<vmem>>, vector<1x8x32xf32>,
    } else {
    }
    return
  }
  func.func @transform_0(%arg0: i32, %arg1: i32) -> (i32, i32, i32) {
    %c0_i32 = arith.constant 0 : i32
    %c0_i32_0 = arith.constant 0 : i32
    %c0_i32_1 = arith.constant 0 : i32
    return %arg0, %c0_i32, %c0_i32_0 : i32, i32, i32
  }
  func.func @transform_1(%arg0: i32, %arg1: i32) -> (i32, i32, i32) {
    %c0_i32 = arith.constant 0 : i32
    %c0_i32_0 = arith.constant 0 : i32
    %c0_i32_1 = arith.constant 0 : i32
    return %arg0, %c0_i32, %c0_i32_0 : i32, i32, i32
  }
  func.func @transform_2(%arg0: i32, %arg1: i32) -> (i32, i32, i32) {
    %c0_i32 = arith.constant 0 : i32
    %c0_i32_0 = arith.constant 0 : i32
    %c0_i32_1 = arith.constant 0 : i32
    return %arg1, %c0_i32, %c0_i32_0 : i32, i32, i32
  }
  func.func @transform_3(%arg0: i32, %arg1: i32) -> (i32, i32, i32) {
    %c0_i32 = arith.constant 0 : i32
    %c0_i32_0 = arith.constant 0 : i32
    %c0_i32_1 = arith.constant 0 : i32
    return %arg1, %c0_i32, %c0_i32_0 : i32, i32, i32
  }
  func.func @transform_4(%arg0: i32, %arg1: i32) -> (i32, i32, i32) {
    %c0_i32 = arith.constant 0 : i32
    %c0_i32_0 = arith.constant 0 : i32
    %c0_i32_1 = arith.constant 0 : i32
    return %arg1, %c0_i32, %c0_i32_0 : i32, i32, i32
  }
  func.func @transform_5(%arg0: i32, %arg1: i32) -> (i32, i32, i32) {
    %c0_i32 = arith.constant 0 : i32
    %c0_i32_0 = arith.constant 0 : i32
    %c0_i32_1 = arith.constant 0 : i32
    return %arg1, %c0_i32, %c0_i32_0 : i32, i32, i32
  }
  func.func @transform_6(%arg0: i32, %arg1: i32) -> (i32, i32, i32) {
    %c0_i32 = arith.constant 0 : i32
    %c0_i32_0 = arith.constant 0 : i32
    %c0_i32_1 = arith.constant 0 : i32
    return %arg1, %c0_i32, %c0_i32_0 : i32, i32, i32
  }
  func.func @transform_7(%arg0: i32, %arg1: i32) -> (i32, i32, i32) {
    %c0_i32 = arith.constant 0 : i32
    %c0_i32_0 = arith.constant 0 : i32
    %c0_i32_1 = arith.constant 0 : i32
    return %arg1, %c0_i32, %c0_i32_0 : i32, i32, i32
  }
  func.func @transform_8(%arg0: i32, %arg1: i32) -> (i32, i32, i32) {
    %c0_i32 = arith.constant 0 : i32
    %c0_i32_0 = arith.constant 0 : i32
    %c0_i32_1 = arith.constant 0 : i32
    return %arg1, %c0_i32, %c0_i32_0 : i32, i32, i32
  }
  func.func @transform_9(%arg0: i32, %arg1: i32) -> (i32, i32, i32) {
    %c0_i32 = arith.constant 0 : i32
    %c0_i32_0 = arith.constant 0 : i32
    %c0_i32_1 = arith.constant 0 : i32
    return %arg1, %c0_i32, %c0_i32_0 : i32, i32, i32
  }
  func.func @transform_10(%arg0: i32, %arg1: i32) -> (i32, i32, i32) {
    %c0_i32 = arith.constant 0 : i32
    %c0_i32_0 = arith.constant 0 : i32
    %c0_i32_1 = arith.constant 0 : i32
    return %arg1, %c0_i32, %c0_i32_0 : i32, i32, i32
  }
  func.func @transform_11(%arg0: i32, %arg1: i32) -> (i32, i32, i32) {
    %c0_i32 = arith.constant 0 : i32
    %c0_i32_0 = arith.constant 0 : i32
    %c0_i32_1 = arith.constant 0 : i32
    return %arg1, %c0_i32, %c0_i32_0 : i32, i32, i32
  }
  func.func @transform_12(%arg0: i32, %arg1: i32) -> (i32, i32, i32) {
    %c0_i32 = arith.constant 0 : i32
    %c0_i32_0 = arith.constant 0 : i32
    %c0_i32_1 = arith.constant 0 : i32
    return %arg1, %c0_i32, %c0_i32_0 : i32, i32, i32
  }
  func.func @transform_13(%arg0: i32, %arg1: i32) -> (i32, i32, i32) {
    %c0_i32 = arith.constant 0 : i32
    %c0_i32_0 = arith.constant 0 : i32
    %c0_i32_1 = arith.constant 0 : i32
    return %arg1, %c0_i32, %c0_i32_0 : i32, i32, i32
  }
  func.func @transform_14(%arg0: i32, %arg1: i32) -> (i32, i32) {
    %c0_i32 = arith.constant 0 : i32
    %c0_i32_0 = arith.constant 0 : i32
    %c0_i32_1 = arith.constant 0 : i32
    return %c0_i32, %c0_i32_0 : i32, i32
  }
  func.func @transform_15(%arg0: i32, %arg1: i32) -> (i32, i32) {
    %c0_i32 = arith.constant 0 : i32
    %c0_i32_0 = arith.constant 0 : i32
    %c0_i32_1 = arith.constant 0 : i32
    return %c0_i32, %c0_i32_0 : i32, i32
  }
  func.func @transform_16(%arg0: i32, %arg1: i32) -> (i32, i32, i32) {
    %c0_i32 = arith.constant 0 : i32
    %c0_i32_0 = arith.constant 0 : i32
    %c0_i32_1 = arith.constant 0 : i32
    return %arg0, %c0_i32, %c0_i32_0 : i32, i32, i32
  }
}

module attributes {stable_mosaic.version = 11 : i64} {
  func.func @_decoder_stack_kernel(%arg0: i32, %arg1: i32, %arg2: memref<1x8x32xf32, #tpu.memory_space<vmem>>, %arg3: memref<1x8x32xf32, #tpu.memory_space<vmem>>, %arg4: memref<1x8x8xf32, #tpu.memory_space<vmem>>, %arg5: memref<1x8x8xf32, #tpu.memory_space<vmem>>, %arg6: memref<1x32x96xbf16, #tpu.memory_space<vmem>>, %arg7: memref<1x1x96xf32, #tpu.memory_space<vmem>>, %arg8: memref<1x32x32xbf16, #tpu.memory_space<vmem>>, %arg9: memref<1x1x32xf32, #tpu.memory_space<vmem>>, %arg10: memref<1x1x32xf32, #tpu.memory_space<vmem>>, %arg11: memref<1x1x32xf32, #tpu.memory_space<vmem>>, %arg12: memref<1x32x32xbf16, #tpu.memory_space<vmem>>, %arg13: memref<1x1x32xf32, #tpu.memory_space<vmem>>, %arg14: memref<1x32x64xbf16, #tpu.memory_space<vmem>>, %arg15: memref<1x1x64xf32, #tpu.memory_space<vmem>>, %arg16: memref<1x32x32xbf16, #tpu.memory_space<vmem>>, %arg17: memref<1x1x32xf32, #tpu.memory_space<vmem>>, %arg18: memref<1x1x32xf32, #tpu.memory_space<vmem>>, %arg19: memref<1x1x32xf32, #tpu.memory_space<vmem>>, %arg20: memref<1x32x64xbf16, #tpu.memory_space<vmem>>, %arg21: memref<1x1x64xf32, #tpu.memory_space<vmem>>, %arg22: memref<1x64x32xbf16, #tpu.memory_space<vmem>>, %arg23: memref<1x1x32xf32, #tpu.memory_space<vmem>>, %arg24: memref<1x1x32xf32, #tpu.memory_space<vmem>>, %arg25: memref<1x1x32xf32, #tpu.memory_space<vmem>>, %arg26: memref<1x32xf32, #tpu.memory_space<vmem>>, %arg27: memref<1x32xf32, #tpu.memory_space<vmem>>, %arg28: memref<32x128xbf16, #tpu.memory_space<vmem>>, %arg29: memref<1x128xf32, #tpu.memory_space<vmem>>, %arg30: memref<1x8x128xf32, #tpu.memory_space<vmem>>, %arg31: memref<8x32xf32, #tpu.memory_space<vmem>>) attributes {dimension_semantics = [#tpu.dimension_semantics<parallel>, #tpu.dimension_semantics<arbitrary>], iteration_bounds = array<i64: 2, 2>, scalar_prefetch = 0 : i64, scratch_operands = 1 : i64, tpu.core_type = #tpu.core_type<tc>, window_params = [{transform_indices = @transform_0, window_bounds = array<i64: 1, 8, 32>}, {transform_indices = @transform_1, window_bounds = array<i64: 1, 8, 32>}, {transform_indices = @transform_2, window_bounds = array<i64: 1, 8, 8>}, {transform_indices = @transform_3, window_bounds = array<i64: 1, 8, 8>}, {transform_indices = @transform_4, window_bounds = array<i64: 1, 32, 96>}, {transform_indices = @transform_5, window_bounds = array<i64: 1, 1, 96>}, {transform_indices = @transform_6, window_bounds = array<i64: 1, 32, 32>}, {transform_indices = @transform_7, window_bounds = array<i64: 1, 1, 32>}, {transform_indices = @transform_8, window_bounds = array<i64: 1, 1, 32>}, {transform_indices = @transform_9, window_bounds = array<i64: 1, 1, 32>}, {transform_indices = @transform_10, window_bounds = array<i64: 1, 32, 32>}, {transform_indices = @transform_11, window_bounds = array<i64: 1, 1, 32>}, {transform_indices = @transform_12, window_bounds = array<i64: 1, 32, 64>}, {transform_indices = @transform_13, window_bounds = array<i64: 1, 1, 64>}, {transform_indices = @transform_14, window_bounds = array<i64: 1, 32, 32>}, {transform_indices = @transform_15, window_bounds = array<i64: 1, 1, 32>}, {transform_indices = @transform_16, window_bounds = array<i64: 1, 1, 32>}, {transform_indices = @transform_17, window_bounds = array<i64: 1, 1, 32>}, {transform_indices = @transform_18, window_bounds = array<i64: 1, 32, 64>}, {transform_indices = @transform_19, window_bounds = array<i64: 1, 1, 64>}, {transform_indices = @transform_20, window_bounds = array<i64: 1, 64, 32>}, {transform_indices = @transform_21, window_bounds = array<i64: 1, 1, 32>}, {transform_indices = @transform_22, window_bounds = array<i64: 1, 1, 32>}, {transform_indices = @transform_23, window_bounds = array<i64: 1, 1, 32>}, {pipeline_mode = #tpu.pipeline_mode<synchronous>, transform_indices = @transform_24, window_bounds = array<i64: 1, 32>}, {pipeline_mode = #tpu.pipeline_mode<synchronous>, transform_indices = @transform_25, window_bounds = array<i64: 1, 32>}, {pipeline_mode = #tpu.pipeline_mode<synchronous>, transform_indices = @transform_26, window_bounds = array<i64: 32, 128>}, {pipeline_mode = #tpu.pipeline_mode<synchronous>, transform_indices = @transform_27, window_bounds = array<i64: 1, 128>}, {transform_indices = @transform_28, window_bounds = array<i64: 1, 8, 128>}]} {
    %c0_i32 = arith.constant 0 : i32
    %0 = arith.cmpi eq, %arg1, %c0_i32 : i32
    %1 = arith.extui %0 : i1 to i32
    %c0_i32_0 = arith.constant 0 : i32
    %2 = arith.cmpi ne, %1, %c0_i32_0 : i32
    scf.if %2 {
      %c0_136 = arith.constant 0 : index
      %c0_137 = arith.constant 0 : index
      %c0_138 = arith.constant 0 : index
      %328 = vector.load %arg2[%c0_136, %c0_137, %c0_138] : memref<1x8x32xf32, #tpu.memory_space<vmem>>, vector<1x8x32xf32>
      %329 = vector.shape_cast %328 : vector<1x8x32xf32> to vector<8x32xf32>
      %c0_139 = arith.constant 0 : index
      %c0_140 = arith.constant 0 : index
      %330 = vector.load %arg31[%c0_139, %c0_140] : memref<8x32xf32, #tpu.memory_space<vmem>>, vector<8x32xf32>
      tpu.vector_store %arg31[%c0_139, %c0_140], %329 {strides = array<i32>} : memref<8x32xf32, #tpu.memory_space<vmem>>, vector<8x32xf32>,
    } else {
    }
    %c0 = arith.constant 0 : index
    %c0_1 = arith.constant 0 : index
    %3 = vector.load %arg31[%c0, %c0_1] : memref<8x32xf32, #tpu.memory_space<vmem>>, vector<8x32xf32>
    %c0_2 = arith.constant 0 : index
    %c0_3 = arith.constant 0 : index
    %c0_4 = arith.constant 0 : index
    %4 = vector.load %arg3[%c0_2, %c0_3, %c0_4] : memref<1x8x32xf32, #tpu.memory_space<vmem>>, vector<1x8x32xf32>
    %5 = vector.shape_cast %4 : vector<1x8x32xf32> to vector<8x32xf32>
    %6 = arith.truncf %3 : vector<8x32xf32> to vector<8x32xbf16>
    %c0_5 = arith.constant 0 : index
    %c0_6 = arith.constant 0 : index
    %c0_7 = arith.constant 0 : index
    %7 = vector.load %arg6[%c0_5, %c0_6, %c0_7] : memref<1x32x96xbf16, #tpu.memory_space<vmem>>, vector<1x32x96xbf16>
    %8 = vector.shape_cast %7 : vector<1x32x96xbf16> to vector<32x96xbf16>
    %cst = arith.constant dense<0.000000e+00> : vector<8x96xf32>
    %9 = tpu.matmul %6, %8, %cst {dimension_numbers = #tpu.dot_dimension_numbers<[1], [0], [0], [1], [0, 0, 1, 1], [], []>} : vector<8x32xbf16>, vector<32x96xbf16>, vector<8x96xf32> -> vector<8x96xf32>
    %c0_8 = arith.constant 0 : index
    %c0_9 = arith.constant 0 : index
    %c0_10 = arith.constant 0 : index
    %10 = vector.load %arg7[%c0_8, %c0_9, %c0_10] : memref<1x1x96xf32, #tpu.memory_space<vmem>>, vector<1x1x96xf32>
    %11 = vector.shape_cast %10 : vector<1x1x96xf32> to vector<1x96xf32>
    %12 = vector.broadcast %11 : vector<1x96xf32> to vector<8x96xf32>
    %13 = arith.addf %9, %12 : vector<8x96xf32>
    %14 = vector.extract_strided_slice %13 {offsets = [0, 0], sizes = [8, 32], strides = [1, 1]} : vector<8x96xf32> to vector<8x32xf32>
    %15 = vector.extract_strided_slice %13 {offsets = [0, 32], sizes = [8, 32], strides = [1, 1]} : vector<8x96xf32> to vector<8x32xf32>
    %16 = vector.extract_strided_slice %13 {offsets = [0, 64], sizes = [8, 32], strides = [1, 1]} : vector<8x96xf32> to vector<8x32xf32>
    %c0_11 = arith.constant 0 : index
    %c0_12 = arith.constant 0 : index
    %c0_13 = arith.constant 0 : index
    %17 = vector.load %arg4[%c0_11, %c0_12, %c0_13] : memref<1x8x8xf32, #tpu.memory_space<vmem>>, vector<1x8x8xf32>
    %18 = vector.shape_cast %17 : vector<1x8x8xf32> to vector<8x8xf32>
    %c0_14 = arith.constant 0 : index
    %c0_15 = arith.constant 0 : index
    %c0_16 = arith.constant 0 : index
    %19 = vector.load %arg8[%c0_14, %c0_15, %c0_16] : memref<1x32x32xbf16, #tpu.memory_space<vmem>>, vector<1x32x32xbf16>
    %20 = vector.shape_cast %19 : vector<1x32x32xbf16> to vector<32x32xbf16>
    %c0_17 = arith.constant 0 : index
    %c0_18 = arith.constant 0 : index
    %c0_19 = arith.constant 0 : index
    %21 = vector.load %arg9[%c0_17, %c0_18, %c0_19] : memref<1x1x32xf32, #tpu.memory_space<vmem>>, vector<1x1x32xf32>
    %22 = vector.shape_cast %21 : vector<1x1x32xf32> to vector<1x32xf32>
    %23 = vector.extract_strided_slice %14 {offsets = [0, 0], sizes = [8, 8], strides = [1, 1]} : vector<8x32xf32> to vector<8x8xf32>
    %cst_20 = arith.constant 0.353553385 : f32
    %24 = vector.broadcast %cst_20 : f32 to vector<8x8xf32>
    %25 = arith.mulf %23, %24 : vector<8x8xf32>
    %26 = arith.truncf %25 : vector<8x8xf32> to vector<8x8xbf16>
    %27 = vector.extract_strided_slice %15 {offsets = [0, 0], sizes = [8, 8], strides = [1, 1]} : vector<8x32xf32> to vector<8x8xf32>
    %28 = arith.truncf %27 : vector<8x8xf32> to vector<8x8xbf16>
    %29 = vector.extract_strided_slice %16 {offsets = [0, 0], sizes = [8, 8], strides = [1, 1]} : vector<8x32xf32> to vector<8x8xf32>
    %30 = arith.truncf %29 : vector<8x8xf32> to vector<8x8xbf16>
    %cst_21 = arith.constant dense<0.000000e+00> : vector<8x8xf32>
    %31 = tpu.matmul %26, %28, %cst_21 {dimension_numbers = #tpu.dot_dimension_numbers<[1], [1], [0], [0], [0, 0, 1, 0], [], []>} : vector<8x8xbf16>, vector<8x8xbf16>, vector<8x8xf32> -> vector<8x8xf32>
    %32 = arith.addf %31, %18 : vector<8x8xf32>
    %cst_22 = arith.constant dense<0xFF800000> : vector<8xf32>
    %33 = vector.multi_reduction <maximumf>, %32, %cst_22 [1] : vector<8x8xf32> to vector<8xf32>
    %34 = vector.shape_cast %33 : vector<8xf32> to vector<8x1xf32>
    %35 = vector.broadcast %34 : vector<8x1xf32> to vector<8x8xf32>
    %36 = arith.subf %32, %35 : vector<8x8xf32>
    %37 = math.exp %36 : vector<8x8xf32>
    %cst_23 = arith.constant dense<0.000000e+00> : vector<8xf32>
    %38 = vector.multi_reduction <add>, %37, %cst_23 [1] : vector<8x8xf32> to vector<8xf32>
    %39 = vector.shape_cast %38 : vector<8xf32> to vector<8x1xf32>
    %40 = vector.broadcast %39 : vector<8x1xf32> to vector<8x8xf32>
    %41 = arith.divf %37, %40 : vector<8x8xf32>
    %42 = arith.truncf %41 : vector<8x8xf32> to vector<8x8xbf16>
    %cst_24 = arith.constant dense<0.000000e+00> : vector<8x8xf32>
    %43 = tpu.matmul %42, %30, %cst_24 {dimension_numbers = #tpu.dot_dimension_numbers<[1], [0], [0], [1], [0, 0, 1, 1], [], []>} : vector<8x8xbf16>, vector<8x8xbf16>, vector<8x8xf32> -> vector<8x8xf32>
    %44 = vector.extract_strided_slice %14 {offsets = [0, 8], sizes = [8, 8], strides = [1, 1]} : vector<8x32xf32> to vector<8x8xf32>
    %cst_25 = arith.constant 0.353553385 : f32
    %45 = vector.broadcast %cst_25 : f32 to vector<8x8xf32>
    %46 = arith.mulf %44, %45 : vector<8x8xf32>
    %47 = arith.truncf %46 : vector<8x8xf32> to vector<8x8xbf16>
    %48 = vector.extract_strided_slice %15 {offsets = [0, 8], sizes = [8, 8], strides = [1, 1]} : vector<8x32xf32> to vector<8x8xf32>
    %49 = arith.truncf %48 : vector<8x8xf32> to vector<8x8xbf16>
    %50 = vector.extract_strided_slice %16 {offsets = [0, 8], sizes = [8, 8], strides = [1, 1]} : vector<8x32xf32> to vector<8x8xf32>
    %51 = arith.truncf %50 : vector<8x8xf32> to vector<8x8xbf16>
    %cst_26 = arith.constant dense<0.000000e+00> : vector<8x8xf32>
    %52 = tpu.matmul %47, %49, %cst_26 {dimension_numbers = #tpu.dot_dimension_numbers<[1], [1], [0], [0], [0, 0, 1, 0], [], []>} : vector<8x8xbf16>, vector<8x8xbf16>, vector<8x8xf32> -> vector<8x8xf32>
    %53 = arith.addf %52, %18 : vector<8x8xf32>
    %cst_27 = arith.constant dense<0xFF800000> : vector<8xf32>
    %54 = vector.multi_reduction <maximumf>, %53, %cst_27 [1] : vector<8x8xf32> to vector<8xf32>
    %55 = vector.shape_cast %54 : vector<8xf32> to vector<8x1xf32>
    %56 = vector.broadcast %55 : vector<8x1xf32> to vector<8x8xf32>
    %57 = arith.subf %53, %56 : vector<8x8xf32>
    %58 = math.exp %57 : vector<8x8xf32>
    %cst_28 = arith.constant dense<0.000000e+00> : vector<8xf32>
    %59 = vector.multi_reduction <add>, %58, %cst_28 [1] : vector<8x8xf32> to vector<8xf32>
    %60 = vector.shape_cast %59 : vector<8xf32> to vector<8x1xf32>
    %61 = vector.broadcast %60 : vector<8x1xf32> to vector<8x8xf32>
    %62 = arith.divf %58, %61 : vector<8x8xf32>
    %63 = arith.truncf %62 : vector<8x8xf32> to vector<8x8xbf16>
    %cst_29 = arith.constant dense<0.000000e+00> : vector<8x8xf32>
    %64 = tpu.matmul %63, %51, %cst_29 {dimension_numbers = #tpu.dot_dimension_numbers<[1], [0], [0], [1], [0, 0, 1, 1], [], []>} : vector<8x8xbf16>, vector<8x8xbf16>, vector<8x8xf32> -> vector<8x8xf32>
    %65 = vector.extract_strided_slice %14 {offsets = [0, 16], sizes = [8, 8], strides = [1, 1]} : vector<8x32xf32> to vector<8x8xf32>
    %cst_30 = arith.constant 0.353553385 : f32
    %66 = vector.broadcast %cst_30 : f32 to vector<8x8xf32>
    %67 = arith.mulf %65, %66 : vector<8x8xf32>
    %68 = arith.truncf %67 : vector<8x8xf32> to vector<8x8xbf16>
    %69 = vector.extract_strided_slice %15 {offsets = [0, 16], sizes = [8, 8], strides = [1, 1]} : vector<8x32xf32> to vector<8x8xf32>
    %70 = arith.truncf %69 : vector<8x8xf32> to vector<8x8xbf16>
    %71 = vector.extract_strided_slice %16 {offsets = [0, 16], sizes = [8, 8], strides = [1, 1]} : vector<8x32xf32> to vector<8x8xf32>
    %72 = arith.truncf %71 : vector<8x8xf32> to vector<8x8xbf16>
    %cst_31 = arith.constant dense<0.000000e+00> : vector<8x8xf32>
    %73 = tpu.matmul %68, %70, %cst_31 {dimension_numbers = #tpu.dot_dimension_numbers<[1], [1], [0], [0], [0, 0, 1, 0], [], []>} : vector<8x8xbf16>, vector<8x8xbf16>, vector<8x8xf32> -> vector<8x8xf32>
    %74 = arith.addf %73, %18 : vector<8x8xf32>
    %cst_32 = arith.constant dense<0xFF800000> : vector<8xf32>
    %75 = vector.multi_reduction <maximumf>, %74, %cst_32 [1] : vector<8x8xf32> to vector<8xf32>
    %76 = vector.shape_cast %75 : vector<8xf32> to vector<8x1xf32>
    %77 = vector.broadcast %76 : vector<8x1xf32> to vector<8x8xf32>
    %78 = arith.subf %74, %77 : vector<8x8xf32>
    %79 = math.exp %78 : vector<8x8xf32>
    %cst_33 = arith.constant dense<0.000000e+00> : vector<8xf32>
    %80 = vector.multi_reduction <add>, %79, %cst_33 [1] : vector<8x8xf32> to vector<8xf32>
    %81 = vector.shape_cast %80 : vector<8xf32> to vector<8x1xf32>
    %82 = vector.broadcast %81 : vector<8x1xf32> to vector<8x8xf32>
    %83 = arith.divf %79, %82 : vector<8x8xf32>
    %84 = arith.truncf %83 : vector<8x8xf32> to vector<8x8xbf16>
    %cst_34 = arith.constant dense<0.000000e+00> : vector<8x8xf32>
    %85 = tpu.matmul %84, %72, %cst_34 {dimension_numbers = #tpu.dot_dimension_numbers<[1], [0], [0], [1], [0, 0, 1, 1], [], []>} : vector<8x8xbf16>, vector<8x8xbf16>, vector<8x8xf32> -> vector<8x8xf32>
    %86 = vector.extract_strided_slice %14 {offsets = [0, 24], sizes = [8, 8], strides = [1, 1]} : vector<8x32xf32> to vector<8x8xf32>
    %cst_35 = arith.constant 0.353553385 : f32
    %87 = vector.broadcast %cst_35 : f32 to vector<8x8xf32>
    %88 = arith.mulf %86, %87 : vector<8x8xf32>
    %89 = arith.truncf %88 : vector<8x8xf32> to vector<8x8xbf16>
    %90 = vector.extract_strided_slice %15 {offsets = [0, 24], sizes = [8, 8], strides = [1, 1]} : vector<8x32xf32> to vector<8x8xf32>
    %91 = arith.truncf %90 : vector<8x8xf32> to vector<8x8xbf16>
    %92 = vector.extract_strided_slice %16 {offsets = [0, 24], sizes = [8, 8], strides = [1, 1]} : vector<8x32xf32> to vector<8x8xf32>
    %93 = arith.truncf %92 : vector<8x8xf32> to vector<8x8xbf16>
    %cst_36 = arith.constant dense<0.000000e+00> : vector<8x8xf32>
    %94 = tpu.matmul %89, %91, %cst_36 {dimension_numbers = #tpu.dot_dimension_numbers<[1], [1], [0], [0], [0, 0, 1, 0], [], []>} : vector<8x8xbf16>, vector<8x8xbf16>, vector<8x8xf32> -> vector<8x8xf32>
    %95 = arith.addf %94, %18 : vector<8x8xf32>
    %cst_37 = arith.constant dense<0xFF800000> : vector<8xf32>
    %96 = vector.multi_reduction <maximumf>, %95, %cst_37 [1] : vector<8x8xf32> to vector<8xf32>
    %97 = vector.shape_cast %96 : vector<8xf32> to vector<8x1xf32>
    %98 = vector.broadcast %97 : vector<8x1xf32> to vector<8x8xf32>
    %99 = arith.subf %95, %98 : vector<8x8xf32>
    %100 = math.exp %99 : vector<8x8xf32>
    %cst_38 = arith.constant dense<0.000000e+00> : vector<8xf32>
    %101 = vector.multi_reduction <add>, %100, %cst_38 [1] : vector<8x8xf32> to vector<8xf32>
    %102 = vector.shape_cast %101 : vector<8xf32> to vector<8x1xf32>
    %103 = vector.broadcast %102 : vector<8x1xf32> to vector<8x8xf32>
    %104 = arith.divf %100, %103 : vector<8x8xf32>
    %105 = arith.truncf %104 : vector<8x8xf32> to vector<8x8xbf16>
    %cst_39 = arith.constant dense<0.000000e+00> : vector<8x8xf32>
    %106 = tpu.matmul %105, %93, %cst_39 {dimension_numbers = #tpu.dot_dimension_numbers<[1], [0], [0], [1], [0, 0, 1, 1], [], []>} : vector<8x8xbf16>, vector<8x8xbf16>, vector<8x8xf32> -> vector<8x8xf32>
    %107 = tpu.concatenate %43, %64, %85, %106 in 1 : vector<8x8xf32>, vector<8x8xf32>, vector<8x8xf32>, vector<8x8xf32> -> vector<8x32xf32>
    %108 = arith.truncf %107 : vector<8x32xf32> to vector<8x32xbf16>
    %cst_40 = arith.constant dense<0.000000e+00> : vector<8x32xf32>
    %109 = tpu.matmul %108, %20, %cst_40 {dimension_numbers = #tpu.dot_dimension_numbers<[1], [0], [0], [1], [0, 0, 1, 1], [], []>} : vector<8x32xbf16>, vector<32x32xbf16>, vector<8x32xf32> -> vector<8x32xf32>
    %110 = vector.broadcast %22 : vector<1x32xf32> to vector<8x32xf32>
    %111 = arith.addf %109, %110 : vector<8x32xf32>
    %112 = arith.addf %3, %111 : vector<8x32xf32>
    %c0_41 = arith.constant 0 : index
    %c0_42 = arith.constant 0 : index
    %c0_43 = arith.constant 0 : index
    %113 = vector.load %arg10[%c0_41, %c0_42, %c0_43] : memref<1x1x32xf32, #tpu.memory_space<vmem>>, vector<1x1x32xf32>
    %114 = vector.shape_cast %113 : vector<1x1x32xf32> to vector<1x32xf32>
    %c0_44 = arith.constant 0 : index
    %c0_45 = arith.constant 0 : index
    %c0_46 = arith.constant 0 : index
    %115 = vector.load %arg11[%c0_44, %c0_45, %c0_46] : memref<1x1x32xf32, #tpu.memory_space<vmem>>, vector<1x1x32xf32>
    %116 = vector.shape_cast %115 : vector<1x1x32xf32> to vector<1x32xf32>
    %cst_47 = arith.constant dense<0.000000e+00> : vector<8xf32>
    %117 = vector.multi_reduction <add>, %112, %cst_47 [1] : vector<8x32xf32> to vector<8xf32>
    %118 = vector.shape_cast %117 : vector<8xf32> to vector<8x1xf32>
    %cst_48 = arith.constant 3.200000e+01 : f32
    %119 = vector.broadcast %cst_48 : f32 to vector<8x1xf32>
    %120 = arith.divf %118, %119 : vector<8x1xf32>
    %121 = vector.broadcast %120 : vector<8x1xf32> to vector<8x32xf32>
    %122 = arith.subf %112, %121 : vector<8x32xf32>
    %123 = arith.mulf %122, %122 : vector<8x32xf32>
    %cst_49 = arith.constant dense<0.000000e+00> : vector<8xf32>
    %124 = vector.multi_reduction <add>, %123, %cst_49 [1] : vector<8x32xf32> to vector<8xf32>
    %125 = vector.shape_cast %124 : vector<8xf32> to vector<8x1xf32>
    %cst_50 = arith.constant 3.200000e+01 : f32
    %126 = vector.broadcast %cst_50 : f32 to vector<8x1xf32>
    %127 = arith.divf %125, %126 : vector<8x1xf32>
    %128 = vector.broadcast %120 : vector<8x1xf32> to vector<8x32xf32>
    %129 = arith.subf %112, %128 : vector<8x32xf32>
    %cst_51 = arith.constant 9.99999974E-6 : f32
    %130 = vector.broadcast %cst_51 : f32 to vector<8x1xf32>
    %131 = arith.addf %127, %130 : vector<8x1xf32>
    %132 = math.rsqrt %131 : vector<8x1xf32>
    %133 = vector.broadcast %132 : vector<8x1xf32> to vector<8x32xf32>
    %134 = arith.mulf %129, %133 : vector<8x32xf32>
    %135 = vector.broadcast %114 : vector<1x32xf32> to vector<8x32xf32>
    %136 = arith.mulf %134, %135 : vector<8x32xf32>
    %137 = vector.broadcast %116 : vector<1x32xf32> to vector<8x32xf32>
    %138 = arith.addf %136, %137 : vector<8x32xf32>
    %139 = arith.truncf %138 : vector<8x32xf32> to vector<8x32xbf16>
    %c0_52 = arith.constant 0 : index
    %c0_53 = arith.constant 0 : index
    %c0_54 = arith.constant 0 : index
    %140 = vector.load %arg12[%c0_52, %c0_53, %c0_54] : memref<1x32x32xbf16, #tpu.memory_space<vmem>>, vector<1x32x32xbf16>
    %141 = vector.shape_cast %140 : vector<1x32x32xbf16> to vector<32x32xbf16>
    %cst_55 = arith.constant dense<0.000000e+00> : vector<8x32xf32>
    %142 = tpu.matmul %139, %141, %cst_55 {dimension_numbers = #tpu.dot_dimension_numbers<[1], [0], [0], [1], [0, 0, 1, 1], [], []>} : vector<8x32xbf16>, vector<32x32xbf16>, vector<8x32xf32> -> vector<8x32xf32>
    %c0_56 = arith.constant 0 : index
    %c0_57 = arith.constant 0 : index
    %c0_58 = arith.constant 0 : index
    %143 = vector.load %arg13[%c0_56, %c0_57, %c0_58] : memref<1x1x32xf32, #tpu.memory_space<vmem>>, vector<1x1x32xf32>
    %144 = vector.shape_cast %143 : vector<1x1x32xf32> to vector<1x32xf32>
    %145 = vector.broadcast %144 : vector<1x32xf32> to vector<8x32xf32>
    %146 = arith.addf %142, %145 : vector<8x32xf32>
    %147 = arith.truncf %5 : vector<8x32xf32> to vector<8x32xbf16>
    %c0_59 = arith.constant 0 : index
    %c0_60 = arith.constant 0 : index
    %c0_61 = arith.constant 0 : index
    %148 = vector.load %arg14[%c0_59, %c0_60, %c0_61] : memref<1x32x64xbf16, #tpu.memory_space<vmem>>, vector<1x32x64xbf16>
    %149 = vector.shape_cast %148 : vector<1x32x64xbf16> to vector<32x64xbf16>
    %cst_62 = arith.constant dense<0.000000e+00> : vector<8x64xf32>
    %150 = tpu.matmul %147, %149, %cst_62 {dimension_numbers = #tpu.dot_dimension_numbers<[1], [0], [0], [1], [0, 0, 1, 1], [], []>} : vector<8x32xbf16>, vector<32x64xbf16>, vector<8x64xf32> -> vector<8x64xf32>
    %c0_63 = arith.constant 0 : index
    %c0_64 = arith.constant 0 : index
    %c0_65 = arith.constant 0 : index
    %151 = vector.load %arg15[%c0_63, %c0_64, %c0_65] : memref<1x1x64xf32, #tpu.memory_space<vmem>>, vector<1x1x64xf32>
    %152 = vector.shape_cast %151 : vector<1x1x64xf32> to vector<1x64xf32>
    %153 = vector.broadcast %152 : vector<1x64xf32> to vector<8x64xf32>
    %154 = arith.addf %150, %153 : vector<8x64xf32>
    %155 = vector.extract_strided_slice %154 {offsets = [0, 0], sizes = [8, 32], strides = [1, 1]} : vector<8x64xf32> to vector<8x32xf32>
    %156 = vector.extract_strided_slice %154 {offsets = [0, 32], sizes = [8, 32], strides = [1, 1]} : vector<8x64xf32> to vector<8x32xf32>
    %c0_66 = arith.constant 0 : index
    %c0_67 = arith.constant 0 : index
    %c0_68 = arith.constant 0 : index
    %157 = vector.load %arg5[%c0_66, %c0_67, %c0_68] : memref<1x8x8xf32, #tpu.memory_space<vmem>>, vector<1x8x8xf32>
    %158 = vector.shape_cast %157 : vector<1x8x8xf32> to vector<8x8xf32>
    %c0_69 = arith.constant 0 : index
    %c0_70 = arith.constant 0 : index
    %c0_71 = arith.constant 0 : index
    %159 = vector.load %arg16[%c0_69, %c0_70, %c0_71] : memref<1x32x32xbf16, #tpu.memory_space<vmem>>, vector<1x32x32xbf16>
    %160 = vector.shape_cast %159 : vector<1x32x32xbf16> to vector<32x32xbf16>
    %c0_72 = arith.constant 0 : index
    %c0_73 = arith.constant 0 : index
    %c0_74 = arith.constant 0 : index
    %161 = vector.load %arg17[%c0_72, %c0_73, %c0_74] : memref<1x1x32xf32, #tpu.memory_space<vmem>>, vector<1x1x32xf32>
    %162 = vector.shape_cast %161 : vector<1x1x32xf32> to vector<1x32xf32>
    %163 = vector.extract_strided_slice %146 {offsets = [0, 0], sizes = [8, 8], strides = [1, 1]} : vector<8x32xf32> to vector<8x8xf32>
    %cst_75 = arith.constant 0.353553385 : f32
    %164 = vector.broadcast %cst_75 : f32 to vector<8x8xf32>
    %165 = arith.mulf %163, %164 : vector<8x8xf32>
    %166 = arith.truncf %165 : vector<8x8xf32> to vector<8x8xbf16>
    %167 = vector.extract_strided_slice %155 {offsets = [0, 0], sizes = [8, 8], strides = [1, 1]} : vector<8x32xf32> to vector<8x8xf32>
    %168 = arith.truncf %167 : vector<8x8xf32> to vector<8x8xbf16>
    %169 = vector.extract_strided_slice %156 {offsets = [0, 0], sizes = [8, 8], strides = [1, 1]} : vector<8x32xf32> to vector<8x8xf32>
    %170 = arith.truncf %169 : vector<8x8xf32> to vector<8x8xbf16>
    %cst_76 = arith.constant dense<0.000000e+00> : vector<8x8xf32>
    %171 = tpu.matmul %166, %168, %cst_76 {dimension_numbers = #tpu.dot_dimension_numbers<[1], [1], [0], [0], [0, 0, 1, 0], [], []>} : vector<8x8xbf16>, vector<8x8xbf16>, vector<8x8xf32> -> vector<8x8xf32>
    %172 = arith.addf %171, %158 : vector<8x8xf32>
    %cst_77 = arith.constant dense<0xFF800000> : vector<8xf32>
    %173 = vector.multi_reduction <maximumf>, %172, %cst_77 [1] : vector<8x8xf32> to vector<8xf32>
    %174 = vector.shape_cast %173 : vector<8xf32> to vector<8x1xf32>
    %175 = vector.broadcast %174 : vector<8x1xf32> to vector<8x8xf32>
    %176 = arith.subf %172, %175 : vector<8x8xf32>
    %177 = math.exp %176 : vector<8x8xf32>
    %cst_78 = arith.constant dense<0.000000e+00> : vector<8xf32>
    %178 = vector.multi_reduction <add>, %177, %cst_78 [1] : vector<8x8xf32> to vector<8xf32>
    %179 = vector.shape_cast %178 : vector<8xf32> to vector<8x1xf32>
    %180 = vector.broadcast %179 : vector<8x1xf32> to vector<8x8xf32>
    %181 = arith.divf %177, %180 : vector<8x8xf32>
    %182 = arith.truncf %181 : vector<8x8xf32> to vector<8x8xbf16>
    %cst_79 = arith.constant dense<0.000000e+00> : vector<8x8xf32>
    %183 = tpu.matmul %182, %170, %cst_79 {dimension_numbers = #tpu.dot_dimension_numbers<[1], [0], [0], [1], [0, 0, 1, 1], [], []>} : vector<8x8xbf16>, vector<8x8xbf16>, vector<8x8xf32> -> vector<8x8xf32>
    %184 = vector.extract_strided_slice %146 {offsets = [0, 8], sizes = [8, 8], strides = [1, 1]} : vector<8x32xf32> to vector<8x8xf32>
    %cst_80 = arith.constant 0.353553385 : f32
    %185 = vector.broadcast %cst_80 : f32 to vector<8x8xf32>
    %186 = arith.mulf %184, %185 : vector<8x8xf32>
    %187 = arith.truncf %186 : vector<8x8xf32> to vector<8x8xbf16>
    %188 = vector.extract_strided_slice %155 {offsets = [0, 8], sizes = [8, 8], strides = [1, 1]} : vector<8x32xf32> to vector<8x8xf32>
    %189 = arith.truncf %188 : vector<8x8xf32> to vector<8x8xbf16>
    %190 = vector.extract_strided_slice %156 {offsets = [0, 8], sizes = [8, 8], strides = [1, 1]} : vector<8x32xf32> to vector<8x8xf32>
    %191 = arith.truncf %190 : vector<8x8xf32> to vector<8x8xbf16>
    %cst_81 = arith.constant dense<0.000000e+00> : vector<8x8xf32>
    %192 = tpu.matmul %187, %189, %cst_81 {dimension_numbers = #tpu.dot_dimension_numbers<[1], [1], [0], [0], [0, 0, 1, 0], [], []>} : vector<8x8xbf16>, vector<8x8xbf16>, vector<8x8xf32> -> vector<8x8xf32>
    %193 = arith.addf %192, %158 : vector<8x8xf32>
    %cst_82 = arith.constant dense<0xFF800000> : vector<8xf32>
    %194 = vector.multi_reduction <maximumf>, %193, %cst_82 [1] : vector<8x8xf32> to vector<8xf32>
    %195 = vector.shape_cast %194 : vector<8xf32> to vector<8x1xf32>
    %196 = vector.broadcast %195 : vector<8x1xf32> to vector<8x8xf32>
    %197 = arith.subf %193, %196 : vector<8x8xf32>
    %198 = math.exp %197 : vector<8x8xf32>
    %cst_83 = arith.constant dense<0.000000e+00> : vector<8xf32>
    %199 = vector.multi_reduction <add>, %198, %cst_83 [1] : vector<8x8xf32> to vector<8xf32>
    %200 = vector.shape_cast %199 : vector<8xf32> to vector<8x1xf32>
    %201 = vector.broadcast %200 : vector<8x1xf32> to vector<8x8xf32>
    %202 = arith.divf %198, %201 : vector<8x8xf32>
    %203 = arith.truncf %202 : vector<8x8xf32> to vector<8x8xbf16>
    %cst_84 = arith.constant dense<0.000000e+00> : vector<8x8xf32>
    %204 = tpu.matmul %203, %191, %cst_84 {dimension_numbers = #tpu.dot_dimension_numbers<[1], [0], [0], [1], [0, 0, 1, 1], [], []>} : vector<8x8xbf16>, vector<8x8xbf16>, vector<8x8xf32> -> vector<8x8xf32>
    %205 = vector.extract_strided_slice %146 {offsets = [0, 16], sizes = [8, 8], strides = [1, 1]} : vector<8x32xf32> to vector<8x8xf32>
    %cst_85 = arith.constant 0.353553385 : f32
    %206 = vector.broadcast %cst_85 : f32 to vector<8x8xf32>
    %207 = arith.mulf %205, %206 : vector<8x8xf32>
    %208 = arith.truncf %207 : vector<8x8xf32> to vector<8x8xbf16>
    %209 = vector.extract_strided_slice %155 {offsets = [0, 16], sizes = [8, 8], strides = [1, 1]} : vector<8x32xf32> to vector<8x8xf32>
    %210 = arith.truncf %209 : vector<8x8xf32> to vector<8x8xbf16>
    %211 = vector.extract_strided_slice %156 {offsets = [0, 16], sizes = [8, 8], strides = [1, 1]} : vector<8x32xf32> to vector<8x8xf32>
    %212 = arith.truncf %211 : vector<8x8xf32> to vector<8x8xbf16>
    %cst_86 = arith.constant dense<0.000000e+00> : vector<8x8xf32>
    %213 = tpu.matmul %208, %210, %cst_86 {dimension_numbers = #tpu.dot_dimension_numbers<[1], [1], [0], [0], [0, 0, 1, 0], [], []>} : vector<8x8xbf16>, vector<8x8xbf16>, vector<8x8xf32> -> vector<8x8xf32>
    %214 = arith.addf %213, %158 : vector<8x8xf32>
    %cst_87 = arith.constant dense<0xFF800000> : vector<8xf32>
    %215 = vector.multi_reduction <maximumf>, %214, %cst_87 [1] : vector<8x8xf32> to vector<8xf32>
    %216 = vector.shape_cast %215 : vector<8xf32> to vector<8x1xf32>
    %217 = vector.broadcast %216 : vector<8x1xf32> to vector<8x8xf32>
    %218 = arith.subf %214, %217 : vector<8x8xf32>
    %219 = math.exp %218 : vector<8x8xf32>
    %cst_88 = arith.constant dense<0.000000e+00> : vector<8xf32>
    %220 = vector.multi_reduction <add>, %219, %cst_88 [1] : vector<8x8xf32> to vector<8xf32>
    %221 = vector.shape_cast %220 : vector<8xf32> to vector<8x1xf32>
    %222 = vector.broadcast %221 : vector<8x1xf32> to vector<8x8xf32>
    %223 = arith.divf %219, %222 : vector<8x8xf32>
    %224 = arith.truncf %223 : vector<8x8xf32> to vector<8x8xbf16>
    %cst_89 = arith.constant dense<0.000000e+00> : vector<8x8xf32>
    %225 = tpu.matmul %224, %212, %cst_89 {dimension_numbers = #tpu.dot_dimension_numbers<[1], [0], [0], [1], [0, 0, 1, 1], [], []>} : vector<8x8xbf16>, vector<8x8xbf16>, vector<8x8xf32> -> vector<8x8xf32>
    %226 = vector.extract_strided_slice %146 {offsets = [0, 24], sizes = [8, 8], strides = [1, 1]} : vector<8x32xf32> to vector<8x8xf32>
    %cst_90 = arith.constant 0.353553385 : f32
    %227 = vector.broadcast %cst_90 : f32 to vector<8x8xf32>
    %228 = arith.mulf %226, %227 : vector<8x8xf32>
    %229 = arith.truncf %228 : vector<8x8xf32> to vector<8x8xbf16>
    %230 = vector.extract_strided_slice %155 {offsets = [0, 24], sizes = [8, 8], strides = [1, 1]} : vector<8x32xf32> to vector<8x8xf32>
    %231 = arith.truncf %230 : vector<8x8xf32> to vector<8x8xbf16>
    %232 = vector.extract_strided_slice %156 {offsets = [0, 24], sizes = [8, 8], strides = [1, 1]} : vector<8x32xf32> to vector<8x8xf32>
    %233 = arith.truncf %232 : vector<8x8xf32> to vector<8x8xbf16>
    %cst_91 = arith.constant dense<0.000000e+00> : vector<8x8xf32>
    %234 = tpu.matmul %229, %231, %cst_91 {dimension_numbers = #tpu.dot_dimension_numbers<[1], [1], [0], [0], [0, 0, 1, 0], [], []>} : vector<8x8xbf16>, vector<8x8xbf16>, vector<8x8xf32> -> vector<8x8xf32>
    %235 = arith.addf %234, %158 : vector<8x8xf32>
    %cst_92 = arith.constant dense<0xFF800000> : vector<8xf32>
    %236 = vector.multi_reduction <maximumf>, %235, %cst_92 [1] : vector<8x8xf32> to vector<8xf32>
    %237 = vector.shape_cast %236 : vector<8xf32> to vector<8x1xf32>
    %238 = vector.broadcast %237 : vector<8x1xf32> to vector<8x8xf32>
    %239 = arith.subf %235, %238 : vector<8x8xf32>
    %240 = math.exp %239 : vector<8x8xf32>
    %cst_93 = arith.constant dense<0.000000e+00> : vector<8xf32>
    %241 = vector.multi_reduction <add>, %240, %cst_93 [1] : vector<8x8xf32> to vector<8xf32>
    %242 = vector.shape_cast %241 : vector<8xf32> to vector<8x1xf32>
    %243 = vector.broadcast %242 : vector<8x1xf32> to vector<8x8xf32>
    %244 = arith.divf %240, %243 : vector<8x8xf32>
    %245 = arith.truncf %244 : vector<8x8xf32> to vector<8x8xbf16>
    %cst_94 = arith.constant dense<0.000000e+00> : vector<8x8xf32>
    %246 = tpu.matmul %245, %233, %cst_94 {dimension_numbers = #tpu.dot_dimension_numbers<[1], [0], [0], [1], [0, 0, 1, 1], [], []>} : vector<8x8xbf16>, vector<8x8xbf16>, vector<8x8xf32> -> vector<8x8xf32>
    %247 = tpu.concatenate %183, %204, %225, %246 in 1 : vector<8x8xf32>, vector<8x8xf32>, vector<8x8xf32>, vector<8x8xf32> -> vector<8x32xf32>
    %248 = arith.truncf %247 : vector<8x32xf32> to vector<8x32xbf16>
    %cst_95 = arith.constant dense<0.000000e+00> : vector<8x32xf32>
    %249 = tpu.matmul %248, %160, %cst_95 {dimension_numbers = #tpu.dot_dimension_numbers<[1], [0], [0], [1], [0, 0, 1, 1], [], []>} : vector<8x32xbf16>, vector<32x32xbf16>, vector<8x32xf32> -> vector<8x32xf32>
    %250 = vector.broadcast %162 : vector<1x32xf32> to vector<8x32xf32>
    %251 = arith.addf %249, %250 : vector<8x32xf32>
    %252 = arith.addf %138, %251 : vector<8x32xf32>
    %c0_96 = arith.constant 0 : index
    %c0_97 = arith.constant 0 : index
    %c0_98 = arith.constant 0 : index
    %253 = vector.load %arg18[%c0_96, %c0_97, %c0_98] : memref<1x1x32xf32, #tpu.memory_space<vmem>>, vector<1x1x32xf32>
    %254 = vector.shape_cast %253 : vector<1x1x32xf32> to vector<1x32xf32>
    %c0_99 = arith.constant 0 : index
    %c0_100 = arith.constant 0 : index
    %c0_101 = arith.constant 0 : index
    %255 = vector.load %arg19[%c0_99, %c0_100, %c0_101] : memref<1x1x32xf32, #tpu.memory_space<vmem>>, vector<1x1x32xf32>
    %256 = vector.shape_cast %255 : vector<1x1x32xf32> to vector<1x32xf32>
    %cst_102 = arith.constant dense<0.000000e+00> : vector<8xf32>
    %257 = vector.multi_reduction <add>, %252, %cst_102 [1] : vector<8x32xf32> to vector<8xf32>
    %258 = vector.shape_cast %257 : vector<8xf32> to vector<8x1xf32>
    %cst_103 = arith.constant 3.200000e+01 : f32
    %259 = vector.broadcast %cst_103 : f32 to vector<8x1xf32>
    %260 = arith.divf %258, %259 : vector<8x1xf32>
    %261 = vector.broadcast %260 : vector<8x1xf32> to vector<8x32xf32>
    %262 = arith.subf %252, %261 : vector<8x32xf32>
    %263 = arith.mulf %262, %262 : vector<8x32xf32>
    %cst_104 = arith.constant dense<0.000000e+00> : vector<8xf32>
    %264 = vector.multi_reduction <add>, %263, %cst_104 [1] : vector<8x32xf32> to vector<8xf32>
    %265 = vector.shape_cast %264 : vector<8xf32> to vector<8x1xf32>
    %cst_105 = arith.constant 3.200000e+01 : f32
    %266 = vector.broadcast %cst_105 : f32 to vector<8x1xf32>
    %267 = arith.divf %265, %266 : vector<8x1xf32>
    %268 = vector.broadcast %260 : vector<8x1xf32> to vector<8x32xf32>
    %269 = arith.subf %252, %268 : vector<8x32xf32>
    %cst_106 = arith.constant 9.99999974E-6 : f32
    %270 = vector.broadcast %cst_106 : f32 to vector<8x1xf32>
    %271 = arith.addf %267, %270 : vector<8x1xf32>
    %272 = math.rsqrt %271 : vector<8x1xf32>
    %273 = vector.broadcast %272 : vector<8x1xf32> to vector<8x32xf32>
    %274 = arith.mulf %269, %273 : vector<8x32xf32>
    %275 = vector.broadcast %254 : vector<1x32xf32> to vector<8x32xf32>
    %276 = arith.mulf %274, %275 : vector<8x32xf32>
    %277 = vector.broadcast %256 : vector<1x32xf32> to vector<8x32xf32>
    %278 = arith.addf %276, %277 : vector<8x32xf32>
    %c0_107 = arith.constant 0 : index
    %c0_108 = arith.constant 0 : index
    %c0_109 = arith.constant 0 : index
    %279 = vector.load %arg20[%c0_107, %c0_108, %c0_109] : memref<1x32x64xbf16, #tpu.memory_space<vmem>>, vector<1x32x64xbf16>
    %280 = vector.shape_cast %279 : vector<1x32x64xbf16> to vector<32x64xbf16>
    %c0_110 = arith.constant 0 : index
    %c0_111 = arith.constant 0 : index
    %c0_112 = arith.constant 0 : index
    %281 = vector.load %arg21[%c0_110, %c0_111, %c0_112] : memref<1x1x64xf32, #tpu.memory_space<vmem>>, vector<1x1x64xf32>
    %282 = vector.shape_cast %281 : vector<1x1x64xf32> to vector<1x64xf32>
    %c0_113 = arith.constant 0 : index
    %c0_114 = arith.constant 0 : index
    %c0_115 = arith.constant 0 : index
    %283 = vector.load %arg22[%c0_113, %c0_114, %c0_115] : memref<1x64x32xbf16, #tpu.memory_space<vmem>>, vector<1x64x32xbf16>
    %284 = vector.shape_cast %283 : vector<1x64x32xbf16> to vector<64x32xbf16>
    %c0_116 = arith.constant 0 : index
    %c0_117 = arith.constant 0 : index
    %c0_118 = arith.constant 0 : index
    %285 = vector.load %arg23[%c0_116, %c0_117, %c0_118] : memref<1x1x32xf32, #tpu.memory_space<vmem>>, vector<1x1x32xf32>
    %286 = vector.shape_cast %285 : vector<1x1x32xf32> to vector<1x32xf32>
    %287 = arith.truncf %278 : vector<8x32xf32> to vector<8x32xbf16>
    %cst_119 = arith.constant dense<0.000000e+00> : vector<8x64xf32>
    %288 = tpu.matmul %287, %280, %cst_119 {dimension_numbers = #tpu.dot_dimension_numbers<[1], [0], [0], [1], [0, 0, 1, 1], [], []>} : vector<8x32xbf16>, vector<32x64xbf16>, vector<8x64xf32> -> vector<8x64xf32>
    %289 = vector.broadcast %282 : vector<1x64xf32> to vector<8x64xf32>
    %290 = arith.addf %288, %289 : vector<8x64xf32>
    %cst_120 = arith.constant 0.000000e+00 : f32
    %291 = vector.broadcast %cst_120 : f32 to vector<8x64xf32>
    %292 = arith.maximumf %290, %291 : vector<8x64xf32>
    %293 = arith.truncf %292 : vector<8x64xf32> to vector<8x64xbf16>
    %cst_121 = arith.constant dense<0.000000e+00> : vector<8x32xf32>
    %294 = tpu.matmul %293, %284, %cst_121 {dimension_numbers = #tpu.dot_dimension_numbers<[1], [0], [0], [1], [0, 0, 1, 1], [], []>} : vector<8x64xbf16>, vector<64x32xbf16>, vector<8x32xf32> -> vector<8x32xf32>
    %295 = vector.broadcast %286 : vector<1x32xf32> to vector<8x32xf32>
    %296 = arith.addf %294, %295 : vector<8x32xf32>
    %297 = arith.addf %278, %296 : vector<8x32xf32>
    %c0_122 = arith.constant 0 : index
    %c0_123 = arith.constant 0 : index
    %c0_124 = arith.constant 0 : index
    %298 = vector.load %arg24[%c0_122, %c0_123, %c0_124] : memref<1x1x32xf32, #tpu.memory_space<vmem>>, vector<1x1x32xf32>
    %299 = vector.shape_cast %298 : vector<1x1x32xf32> to vector<1x32xf32>
    %c0_125 = arith.constant 0 : index
    %c0_126 = arith.constant 0 : index
    %c0_127 = arith.constant 0 : index
    %300 = vector.load %arg25[%c0_125, %c0_126, %c0_127] : memref<1x1x32xf32, #tpu.memory_space<vmem>>, vector<1x1x32xf32>
    %301 = vector.shape_cast %300 : vector<1x1x32xf32> to vector<1x32xf32>
    %cst_128 = arith.constant dense<0.000000e+00> : vector<8xf32>
    %302 = vector.multi_reduction <add>, %297, %cst_128 [1] : vector<8x32xf32> to vector<8xf32>
    %303 = vector.shape_cast %302 : vector<8xf32> to vector<8x1xf32>
    %cst_129 = arith.constant 3.200000e+01 : f32
    %304 = vector.broadcast %cst_129 : f32 to vector<8x1xf32>
    %305 = arith.divf %303, %304 : vector<8x1xf32>
    %306 = vector.broadcast %305 : vector<8x1xf32> to vector<8x32xf32>
    %307 = arith.subf %297, %306 : vector<8x32xf32>
    %308 = arith.mulf %307, %307 : vector<8x32xf32>
    %cst_130 = arith.constant dense<0.000000e+00> : vector<8xf32>
    %309 = vector.multi_reduction <add>, %308, %cst_130 [1] : vector<8x32xf32> to vector<8xf32>
    %310 = vector.shape_cast %309 : vector<8xf32> to vector<8x1xf32>
    %cst_131 = arith.constant 3.200000e+01 : f32
    %311 = vector.broadcast %cst_131 : f32 to vector<8x1xf32>
    %312 = arith.divf %310, %311 : vector<8x1xf32>
    %313 = vector.broadcast %305 : vector<8x1xf32> to vector<8x32xf32>
    %314 = arith.subf %297, %313 : vector<8x32xf32>
    %cst_132 = arith.constant 9.99999974E-6 : f32
    %315 = vector.broadcast %cst_132 : f32 to vector<8x1xf32>
    %316 = arith.addf %312, %315 : vector<8x1xf32>
    %317 = math.rsqrt %316 : vector<8x1xf32>
    %318 = vector.broadcast %317 : vector<8x1xf32> to vector<8x32xf32>
    %319 = arith.mulf %314, %318 : vector<8x32xf32>
    %320 = vector.broadcast %299 : vector<1x32xf32> to vector<8x32xf32>
    %321 = arith.mulf %319, %320 : vector<8x32xf32>
    %322 = vector.broadcast %301 : vector<1x32xf32> to vector<8x32xf32>
    %323 = arith.addf %321, %322 : vector<8x32xf32>
    %c0_133 = arith.constant 0 : index
    %c0_134 = arith.constant 0 : index
    %324 = vector.load %arg31[%c0_133, %c0_134] : memref<8x32xf32, #tpu.memory_space<vmem>>, vector<8x32xf32>
    tpu.vector_store %arg31[%c0_133, %c0_134], %323 {strides = array<i32>} : memref<8x32xf32, #tpu.memory_space<vmem>>, vector<8x32xf32>,
    %c1_i32 = arith.constant 1 : i32
    %325 = arith.cmpi eq, %arg1, %c1_i32 : i32
    %326 = arith.extui %325 : i1 to i32
    %c0_i32_135 = arith.constant 0 : i32
    %327 = arith.cmpi ne, %326, %c0_i32_135 : i32
    scf.if %327 {
      %c0_136 = arith.constant 0 : index
      %c0_137 = arith.constant 0 : index
      %328 = vector.load %arg26[%c0_136, %c0_137] : memref<1x32xf32, #tpu.memory_space<vmem>>, vector<1x32xf32>
      %c0_138 = arith.constant 0 : index
      %c0_139 = arith.constant 0 : index
      %329 = vector.load %arg27[%c0_138, %c0_139] : memref<1x32xf32, #tpu.memory_space<vmem>>, vector<1x32xf32>
      %cst_140 = arith.constant dense<0.000000e+00> : vector<8xf32>
      %330 = vector.multi_reduction <add>, %323, %cst_140 [1] : vector<8x32xf32> to vector<8xf32>
      %331 = vector.shape_cast %330 : vector<8xf32> to vector<8x1xf32>
      %cst_141 = arith.constant 3.200000e+01 : f32
      %332 = vector.broadcast %cst_141 : f32 to vector<8x1xf32>
      %333 = arith.divf %331, %332 : vector<8x1xf32>
      %334 = vector.broadcast %333 : vector<8x1xf32> to vector<8x32xf32>
      %335 = arith.subf %323, %334 : vector<8x32xf32>
      %336 = arith.mulf %335, %335 : vector<8x32xf32>
      %cst_142 = arith.constant dense<0.000000e+00> : vector<8xf32>
      %337 = vector.multi_reduction <add>, %336, %cst_142 [1] : vector<8x32xf32> to vector<8xf32>
      %338 = vector.shape_cast %337 : vector<8xf32> to vector<8x1xf32>
      %cst_143 = arith.constant 3.200000e+01 : f32
      %339 = vector.broadcast %cst_143 : f32 to vector<8x1xf32>
      %340 = arith.divf %338, %339 : vector<8x1xf32>
      %341 = vector.broadcast %333 : vector<8x1xf32> to vector<8x32xf32>
      %342 = arith.subf %323, %341 : vector<8x32xf32>
      %cst_144 = arith.constant 9.99999974E-6 : f32
      %343 = vector.broadcast %cst_144 : f32 to vector<8x1xf32>
      %344 = arith.addf %340, %343 : vector<8x1xf32>
      %345 = math.rsqrt %344 : vector<8x1xf32>
      %346 = vector.broadcast %345 : vector<8x1xf32> to vector<8x32xf32>
      %347 = arith.mulf %342, %346 : vector<8x32xf32>
      %348 = vector.broadcast %328 : vector<1x32xf32> to vector<8x32xf32>
      %349 = arith.mulf %347, %348 : vector<8x32xf32>
      %350 = vector.broadcast %329 : vector<1x32xf32> to vector<8x32xf32>
      %351 = arith.addf %349, %350 : vector<8x32xf32>
      %352 = arith.truncf %351 : vector<8x32xf32> to vector<8x32xbf16>
      %c0_145 = arith.constant 0 : index
      %c0_146 = arith.constant 0 : index
      %353 = vector.load %arg28[%c0_145, %c0_146] : memref<32x128xbf16, #tpu.memory_space<vmem>>, vector<32x128xbf16>
      %cst_147 = arith.constant dense<0.000000e+00> : vector<8x128xf32>
      %354 = tpu.matmul %352, %353, %cst_147 {dimension_numbers = #tpu.dot_dimension_numbers<[1], [0], [0], [1], [0, 0, 1, 1], [], []>} : vector<8x32xbf16>, vector<32x128xbf16>, vector<8x128xf32> -> vector<8x128xf32>
      %c0_148 = arith.constant 0 : index
      %c0_149 = arith.constant 0 : index
      %355 = vector.load %arg29[%c0_148, %c0_149] : memref<1x128xf32, #tpu.memory_space<vmem>>, vector<1x128xf32>
      %356 = vector.broadcast %355 : vector<1x128xf32> to vector<8x128xf32>
      %357 = arith.addf %354, %356 : vector<8x128xf32>
      %c0_150 = arith.constant 0 : index
      %c0_151 = arith.constant 0 : index
      %c0_152 = arith.constant 0 : index
      %358 = vector.load %arg30[%c0_150, %c0_151, %c0_152] : memref<1x8x128xf32, #tpu.memory_space<vmem>>, vector<1x8x128xf32>
      %359 = vector.shape_cast %358 : vector<1x8x128xf32> to vector<8x128xf32>
      %360 = vector.shape_cast %357 : vector<8x128xf32> to vector<1x8x128xf32>
      tpu.vector_store %arg30[%c0_150, %c0_151, %c0_152], %360 {strides = array<i32>} : memref<1x8x128xf32, #tpu.memory_space<vmem>>, vector<1x8x128xf32>,
    } else {
    }
    return
  }
  func.func @transform_0(%arg0: i32, %arg1: i32) -> (i32, i32, i32) {
    %c0_i32 = arith.constant 0 : i32
    %c0_i32_0 = arith.constant 0 : i32
    %c0_i32_1 = arith.constant 0 : i32
    return %arg0, %c0_i32, %c0_i32_0 : i32, i32, i32
  }
  func.func @transform_1(%arg0: i32, %arg1: i32) -> (i32, i32, i32) {
    %c0_i32 = arith.constant 0 : i32
    %c0_i32_0 = arith.constant 0 : i32
    %c0_i32_1 = arith.constant 0 : i32
    return %arg0, %c0_i32, %c0_i32_0 : i32, i32, i32
  }
  func.func @transform_2(%arg0: i32, %arg1: i32) -> (i32, i32, i32) {
    %c0_i32 = arith.constant 0 : i32
    %c0_i32_0 = arith.constant 0 : i32
    %c0_i32_1 = arith.constant 0 : i32
    return %arg0, %c0_i32, %c0_i32_0 : i32, i32, i32
  }
  func.func @transform_3(%arg0: i32, %arg1: i32) -> (i32, i32, i32) {
    %c0_i32 = arith.constant 0 : i32
    %c0_i32_0 = arith.constant 0 : i32
    %c0_i32_1 = arith.constant 0 : i32
    return %arg0, %c0_i32, %c0_i32_0 : i32, i32, i32
  }
  func.func @transform_4(%arg0: i32, %arg1: i32) -> (i32, i32, i32) {
    %c0_i32 = arith.constant 0 : i32
    %c0_i32_0 = arith.constant 0 : i32
    %c0_i32_1 = arith.constant 0 : i32
    return %arg1, %c0_i32, %c0_i32_0 : i32, i32, i32
  }
  func.func @transform_5(%arg0: i32, %arg1: i32) -> (i32, i32, i32) {
    %c0_i32 = arith.constant 0 : i32
    %c0_i32_0 = arith.constant 0 : i32
    %c0_i32_1 = arith.constant 0 : i32
    return %arg1, %c0_i32, %c0_i32_0 : i32, i32, i32
  }
  func.func @transform_6(%arg0: i32, %arg1: i32) -> (i32, i32, i32) {
    %c0_i32 = arith.constant 0 : i32
    %c0_i32_0 = arith.constant 0 : i32
    %c0_i32_1 = arith.constant 0 : i32
    return %arg1, %c0_i32, %c0_i32_0 : i32, i32, i32
  }
  func.func @transform_7(%arg0: i32, %arg1: i32) -> (i32, i32, i32) {
    %c0_i32 = arith.constant 0 : i32
    %c0_i32_0 = arith.constant 0 : i32
    %c0_i32_1 = arith.constant 0 : i32
    return %arg1, %c0_i32, %c0_i32_0 : i32, i32, i32
  }
  func.func @transform_8(%arg0: i32, %arg1: i32) -> (i32, i32, i32) {
    %c0_i32 = arith.constant 0 : i32
    %c0_i32_0 = arith.constant 0 : i32
    %c0_i32_1 = arith.constant 0 : i32
    return %arg1, %c0_i32, %c0_i32_0 : i32, i32, i32
  }
  func.func @transform_9(%arg0: i32, %arg1: i32) -> (i32, i32, i32) {
    %c0_i32 = arith.constant 0 : i32
    %c0_i32_0 = arith.constant 0 : i32
    %c0_i32_1 = arith.constant 0 : i32
    return %arg1, %c0_i32, %c0_i32_0 : i32, i32, i32
  }
  func.func @transform_10(%arg0: i32, %arg1: i32) -> (i32, i32, i32) {
    %c0_i32 = arith.constant 0 : i32
    %c0_i32_0 = arith.constant 0 : i32
    %c0_i32_1 = arith.constant 0 : i32
    return %arg1, %c0_i32, %c0_i32_0 : i32, i32, i32
  }
  func.func @transform_11(%arg0: i32, %arg1: i32) -> (i32, i32, i32) {
    %c0_i32 = arith.constant 0 : i32
    %c0_i32_0 = arith.constant 0 : i32
    %c0_i32_1 = arith.constant 0 : i32
    return %arg1, %c0_i32, %c0_i32_0 : i32, i32, i32
  }
  func.func @transform_12(%arg0: i32, %arg1: i32) -> (i32, i32, i32) {
    %c0_i32 = arith.constant 0 : i32
    %c0_i32_0 = arith.constant 0 : i32
    %c0_i32_1 = arith.constant 0 : i32
    return %arg1, %c0_i32, %c0_i32_0 : i32, i32, i32
  }
  func.func @transform_13(%arg0: i32, %arg1: i32) -> (i32, i32, i32) {
    %c0_i32 = arith.constant 0 : i32
    %c0_i32_0 = arith.constant 0 : i32
    %c0_i32_1 = arith.constant 0 : i32
    return %arg1, %c0_i32, %c0_i32_0 : i32, i32, i32
  }
  func.func @transform_14(%arg0: i32, %arg1: i32) -> (i32, i32, i32) {
    %c0_i32 = arith.constant 0 : i32
    %c0_i32_0 = arith.constant 0 : i32
    %c0_i32_1 = arith.constant 0 : i32
    return %arg1, %c0_i32, %c0_i32_0 : i32, i32, i32
  }
  func.func @transform_15(%arg0: i32, %arg1: i32) -> (i32, i32, i32) {
    %c0_i32 = arith.constant 0 : i32
    %c0_i32_0 = arith.constant 0 : i32
    %c0_i32_1 = arith.constant 0 : i32
    return %arg1, %c0_i32, %c0_i32_0 : i32, i32, i32
  }
  func.func @transform_16(%arg0: i32, %arg1: i32) -> (i32, i32, i32) {
    %c0_i32 = arith.constant 0 : i32
    %c0_i32_0 = arith.constant 0 : i32
    %c0_i32_1 = arith.constant 0 : i32
    return %arg1, %c0_i32, %c0_i32_0 : i32, i32, i32
  }
  func.func @transform_17(%arg0: i32, %arg1: i32) -> (i32, i32, i32) {
    %c0_i32 = arith.constant 0 : i32
    %c0_i32_0 = arith.constant 0 : i32
    %c0_i32_1 = arith.constant 0 : i32
    return %arg1, %c0_i32, %c0_i32_0 : i32, i32, i32
  }
  func.func @transform_18(%arg0: i32, %arg1: i32) -> (i32, i32, i32) {
    %c0_i32 = arith.constant 0 : i32
    %c0_i32_0 = arith.constant 0 : i32
    %c0_i32_1 = arith.constant 0 : i32
    return %arg1, %c0_i32, %c0_i32_0 : i32, i32, i32
  }
  func.func @transform_19(%arg0: i32, %arg1: i32) -> (i32, i32, i32) {
    %c0_i32 = arith.constant 0 : i32
    %c0_i32_0 = arith.constant 0 : i32
    %c0_i32_1 = arith.constant 0 : i32
    return %arg1, %c0_i32, %c0_i32_0 : i32, i32, i32
  }
  func.func @transform_20(%arg0: i32, %arg1: i32) -> (i32, i32, i32) {
    %c0_i32 = arith.constant 0 : i32
    %c0_i32_0 = arith.constant 0 : i32
    %c0_i32_1 = arith.constant 0 : i32
    return %arg1, %c0_i32, %c0_i32_0 : i32, i32, i32
  }
  func.func @transform_21(%arg0: i32, %arg1: i32) -> (i32, i32, i32) {
    %c0_i32 = arith.constant 0 : i32
    %c0_i32_0 = arith.constant 0 : i32
    %c0_i32_1 = arith.constant 0 : i32
    return %arg1, %c0_i32, %c0_i32_0 : i32, i32, i32
  }
  func.func @transform_22(%arg0: i32, %arg1: i32) -> (i32, i32, i32) {
    %c0_i32 = arith.constant 0 : i32
    %c0_i32_0 = arith.constant 0 : i32
    %c0_i32_1 = arith.constant 0 : i32
    return %arg1, %c0_i32, %c0_i32_0 : i32, i32, i32
  }
  func.func @transform_23(%arg0: i32, %arg1: i32) -> (i32, i32, i32) {
    %c0_i32 = arith.constant 0 : i32
    %c0_i32_0 = arith.constant 0 : i32
    %c0_i32_1 = arith.constant 0 : i32
    return %arg1, %c0_i32, %c0_i32_0 : i32, i32, i32
  }
  func.func @transform_24(%arg0: i32, %arg1: i32) -> (i32, i32) {
    %c0_i32 = arith.constant 0 : i32
    %c0_i32_0 = arith.constant 0 : i32
    %c0_i32_1 = arith.constant 0 : i32
    return %c0_i32, %c0_i32_0 : i32, i32
  }
  func.func @transform_25(%arg0: i32, %arg1: i32) -> (i32, i32) {
    %c0_i32 = arith.constant 0 : i32
    %c0_i32_0 = arith.constant 0 : i32
    %c0_i32_1 = arith.constant 0 : i32
    return %c0_i32, %c0_i32_0 : i32, i32
  }
  func.func @transform_26(%arg0: i32, %arg1: i32) -> (i32, i32) {
    %c0_i32 = arith.constant 0 : i32
    %c0_i32_0 = arith.constant 0 : i32
    %c0_i32_1 = arith.constant 0 : i32
    return %c0_i32, %c0_i32_0 : i32, i32
  }
  func.func @transform_27(%arg0: i32, %arg1: i32) -> (i32, i32) {
    %c0_i32 = arith.constant 0 : i32
    %c0_i32_0 = arith.constant 0 : i32
    %c0_i32_1 = arith.constant 0 : i32
    return %c0_i32, %c0_i32_0 : i32, i32
  }
  func.func @transform_28(%arg0: i32, %arg1: i32) -> (i32, i32, i32) {
    %c0_i32 = arith.constant 0 : i32
    %c0_i32_0 = arith.constant 0 : i32
    %c0_i32_1 = arith.constant 0 : i32
    return %arg0, %c0_i32, %c0_i32_0 : i32, i32, i32
  }
}

</mosaic_0001>

<bundles_post_ra>
// kernel: seq2seq_transformer_forward.2
= control target key start
LH: loop header
LB: loop body
LE: loop exit
PB: predicated region body
PF: predicated region fallthrough
CT: control target
= control target key end

     0   :  { %s2188_s21 = smov 0   ;;  %s2190_s22 = smov 0   ;;  %s2464_s0 = inlined_call_operand.vmem [shape: f32[2,8,32], index: 0, kind: input, shape index: {}]   ;;  %s2465_s1 = inlined_call_operand.vmem [shape: f32[2,8,8], index: 1, kind: input, shape index: {}]   ;;  %s2466_s2 = inlined_call_operand.vmem [shape: bf16[2,32,96], index: 2, kind: input, shape index: {}]   ;;  %s2467_s3 = inlined_call_operand.vmem [shape: f32[2,1,96], index: 3, kind: input, shape index: {}]   ;;  %s2468_s4 = inlined_call_operand.vmem [shape: bf16[2,32,32], index: 4, kind: input, shape index: {}]   ;;  %s2469_s5 = inlined_call_operand.vmem [shape: f32[2,1,32], index: 5, kind: input, shape index: {}]   ;;  %s2470_s6 = inlined_call_operand.vmem [shape: f32[2,1,32], index: 6, kind: input, shape index: {}]   ;;  %s2471_s7 = inlined_call_operand.vmem [shape: f32[2,1,32], index: 7, kind: input, shape index: {}]   ;;  %s2472_s8 = inlined_call_operand.vmem [shape: bf16[2,32,64], index: 8, kind: input, shape index: {}]   ;;  %s2473_s9 = inlined_call_operand.vmem [shape: f32[2,1,64], index: 9, kind: input, shape index: {}]   ;;  %s2474_s10 = inlined_call_operand.vmem [shape: bf16[2,64,32], index: 10, kind: input, shape index: {}]   ;;  %s2475_s11 = inlined_call_operand.vmem [shape: f32[2,1,32], index: 11, kind: input, shape index: {}]   ;;  %s2476_s12 = inlined_call_operand.vmem [shape: f32[2,1,32], index: 12, kind: input, shape index: {}]   ;;  %s2477_s13 = inlined_call_operand.vmem [shape: f32[2,1,32], index: 13, kind: input, shape index: {}]   ;;  %s2478_s14 = inlined_call_operand.vmem [shape: f32[1,32], index: 14, kind: input, shape index: {}]   ;;  %s2479_s15 = inlined_call_operand.vmem [shape: f32[1,32], index: 15, kind: input, shape index: {}]   ;;  %s2480_s16 = inlined_call_operand.vmem [shape: f32[2,8,32], index: 16, kind: output, shape index: {}]  }
   0x1   :  { %2485 = sst [smem:[#allocation9_spill]] %s2464_s0  ;;  %s2192_s23 = smov 0  }
   0x2   :  { %2486 = sst [smem:[#allocation10_spill]] %s2465_s1  ;;  %s2194_s24 = smov 0  }
   0x3   :  { %2487 = sst [smem:[#allocation11_spill]] %s2466_s2  ;;  %s2196_s25 = smov 0  }
   0x4   :  { %2488 = sst [smem:[#allocation12_spill]] %s2468_s4 }
   0x5   :  { %2489 = sst [smem:[#allocation13_spill]] %s2471_s7 }
   0x6   :  { %2490 = sst [smem:[#allocation14_spill]] %s2472_s8 }
   0x7   :  { %2491 = sst [smem:[#allocation15_spill]] %s2473_s9 }
   0x8   :  { %2492 = sst [smem:[#allocation16_spill]] %s2477_s13 }
   0x9   :  { %2493 = sst [smem:[#allocation17_spill]] %s2478_s14 }
   0xa   :  { %2494 = sst [smem:[#allocation18_spill]] %s2479_s15 }
   0xb   :  { %2495 = sst [smem:[#allocation19_spill]] %s2480_s16 }
   0xc LB: > { %2496 = sst [smem:[#allocation3_spill]] %s2069_s21  ;;  %s35_s26 = sadd.s32 1, %s2077_s23  ;;  %s2085_s25 = sphi %s2196_s25, %s26_s25   ;;  %s2081_s24 = sphi %s2194_s24, %s2530_s24   ;;  %s2077_s23 = sphi %s2192_s23, %s2529_s23   ;;  %s2073_s22 = sphi %s2190_s22, %s2528_s22   ;;  %s2069_s21 = sphi %s2188_s21, %s2527_s21  }
   0xd   : > { %2497 = sst [smem:[#allocation4_spill]] %s2077_s23  ;;  %s38_s27 = sadd.s32 1, %s2081_s24 }
   0xe   : > { %2498 = sst [smem:[#allocation5_spill]] %s2081_s24  ;;  %p36_p0 = scmp.ge.s32.totalorder %s35_s26, 2 }
   0xf   : > { %2499 = sst [smem:[#allocation6_spill]] %s2085_s25  ;;  %p1793_p1 = scmp.ge.s32.totalorder %s2085_s25, 1 }
  0x10   : > { %p586_p2 = scmp.lt.s32.totalorder %s2085_s25, 5  ;;  %s2532_s26 = smov (%p36_p0, %s35_s26), 0 }
  0x11   : > { %2500 = sst [smem:[#allocation7_spill]] %s2532_s26  ;;  %s2534_s27 = smov (!%p36_p0, %s38_s27), %s2081_s24 }
  0x12   : > { %p587_p3 = pnand %p1793_p1, %p586_p2  ;;  %p40_p4 = scmp.ge.s32.totalorder %s2534_s27, 2 }
  0x13   : > { %p682_p5 = scmp.lt.s32.totalorder (!%p587_p3), %s2073_s22, 1  ;;  %p690_p6 = scmp.lt.s32.totalorder (!%p587_p3), %s2069_s21, 1 }
  0x14   : > { %s2536_s27 = smov (%p40_p4, %s2534_s27), 0  ;;  %590 = sbr.rel (%p587_p3) target bundleno = 2906 (0xb5a), region = 84 }
  0x15   : > { %2501 = sst [smem:[#allocation8_spill]] %s2536_s27  ;;  %s2502_s17 = sld [smem:[#allocation9_spill]] (!%p587_p3) }
  0x16   : > { %s2504_s2 = sld [smem:[#allocation11_spill]] (!%p587_p3)  ;;  %s2505_s4 = sld [smem:[#allocation12_spill]] (!%p587_p3) }
  0x17   : > { %s2507_s8 = sld [smem:[#allocation14_spill]] (!%p587_p3)  ;;  %s2509_s1 = sld [smem:[#allocation16_spill]] (!%p587_p3) }
  0x18   : > { %s2511_s7 = sld [smem:[#allocation3_spill]] (!%p587_p3) }
  0x1b   : > { %s2538_s22 = smov (!%p682_p5, %s2073_s22), 1 }
  0x1c   : > { %s2222_s28 = scalar_select %p690_p6, %s2069_s21, 1 }
  0x1d   : > { %s2224_s29 = sshll.u32 %s2538_s22, 3 }
  0x1e   : > { %s685_s18 = scalar_lea.vmem %s2502_s17, %s2224_s29  ;;  %s1841_s26 = sshll.u32 %s2222_s28, 4 }
  0x1f   : > { %s694_s14 = scalar_lea.vmem %s2504_s2, %s1841_s26  ;;  %s2245_s30 = scalar_lea.vmem %s2505_s4, %s1841_s26 }
  0x20   : > { %s2262_s22 = scalar_lea.vmem %s2507_s8, %s1841_s26  ;;  %s1844_s4 = sshll.u32 %s2222_s28, 5 }
  0x21   : > { %s2272_s19 = scalar_lea.vmem %s2474_s10, %s1844_s4  ;;  %s727_s13 = scalar_lea.vmem %s2475_s11, %s2222_s28 }
  0x22   : > { %s730_s25 = scalar_lea.vmem %s2476_s12, %s2222_s28  ;;  %s733_s8 = scalar_lea.vmem %s2509_s1, %s2222_s28 }
  0x23   : > { %s2510_s2 = sld [smem:[#allocation19_spill]]  ;;  %p1805_p7 = scmp.ne.s32.totalorder %s2511_s7, 0 }
  0x24   : > { %v743_v0 = vld [vmem:[%s685_s18] sm:$0xff] (!%p1805_p7)  ;;  %vm744_vm0 = vcmask (!%p1805_p7), 261120  }
  0x25   : > { %742 = sbr.rel (%p1805_p7) target bundleno = 44 (0x2c), region = 88  ;;  %745 = vst.msk [vmem:[#allocation2] sm:$0xff] (!%p1805_p7), %vm744_vm0, %v743_v0 }
  0x29   : > { %s737_s9 = scalar_lea.vmem %s2510_s2, %s2224_s29 }
  0x2c PF: > { %v2015_v1 = vld [vmem:[%s694_s14] sm:$0xff]   ;;  %v2087_v2 = vmov 0.0   ;;  %v2016_v3 = vld [vmem:[%s694_s14 + $0x8] sm:$0xff]   ;;  %vm2088_vm1 = vmmov 0   ;;  %vm772_vm2 = vcmask 261120   ;;  %s2512_s4 = scalar_lea.vmem %s2467_s3, %s2222_s28  ;;  %s2089_s7 = smov 96  }
  0x2d   : > { %1875 = vmatprep.subr.bf16.mxu0 %v2087_v2  ;;  %1883 = vmatprep.subr.bf16.mxu1 %v2087_v2  ;;  %v2295_v4 = vld [vmem:[#allocation2] sm:$0xff]  ;;  %s2090_s14 = smov 120   ;;  %s2091_s18 = smov 88   ;;  %vm827_vm3 = vcmask 64512   ;;  %vm891_vm4 = vcmask 1043456   ;;  %vm1279_vm5 = vcmask 130048  }
  0x2e   : > { %1876 = vmatpush3.bf16.msra.mxu0 %v2015_v1  ;;  %1879 = vmatprep.mubr.msk.bf16.mxu0 %vm2088_vm1, %v2087_v2  ;;  %v748_v5 = vpack.c.bf16 %v2295_v4, %v2295_v4  ;;  %v1806_v6 = vld [vmem:[%s2512_s4] ss:$0 sm:$0xff]  ;;  %s2092_s24 = smov 80   ;;  %s2093_s0 = smov 112   ;;  %vm1281_vm6 = vcmask 195584   ;;  %vm1484_vm7 = vcmask 523264  }
  0x2f   : > { %1877 = vmatprep.subr.bf16.mxu0 %v2087_v2  ;;  %1885 = vmatprep.mubr.msk.bf16.mxu1 %vm2088_vm1, %v2087_v2  ;;  %s2094_s17 = smov 72   ;;  %s2095_s27 = smov 104  }
  0x30   : > { %s2513_s26 = sld [smem:[#allocation10_spill]]  ;;  %s2096_s16 = smov 56  }
  0x31   : > { %s2097_s21 = smov 64   ;;  %s2098_s1 = smov 40  }
  0x32   : > { %1878 = vmatpush3.bf16.msra.mxu0 %v2016_v3  ;;  %s2099_s2 = smov 48   ;;  %s2100_s4 = smov 8  }
  0x33   : > { %1889 = vmatprep.subr.bf16.mxu0 %v2087_v2  ;;  %s2517_s23 = sld [smem:[#allocation13_spill]] }
  0x35   : > { %1880 = vmatmul.mubr.msk.bf16.vlgmr.msra.gmra.mrb[0].mxu0 %vm772_vm2, %v748_v5 }
  0x36   : > { %1891 = vmatprep.mubr.msk.bf16.mxu0 %vm2088_vm1, %v2087_v2  ;;  %s2514_s15 = scalar_lea.vmem %s2513_s26, %s2224_s29 }
  0x37   : > { %v747_v26 = vld [vmem:[%s2514_s15] sm:$0xff] }
  0x39   : > { %s2518_s26 = scalar_lea.vmem %s2517_s23, %s2222_s28 }
 0x108   : > { %v810_v7 = vpop.f32.mrb[0].mxu0 }
 0x109   : > { %v811_v8 = vadd.f32 %v1806_v6, %v810_v7  ;;  %v1881_v9 = vpop.f32.mrb[1].mxu0 }
 0x10a   : > { %v813_v10 = vpop.f32.mrb[2].mxu0 }
 0x10b   : > { %v821_v11 = vmul.f32 0.35355338, %v811_v8  ;;  %v2311_v12 = vpack.c.bf16 %v811_v8, %v811_v8  ;;  %v1882_v13 = vpop.f32.mrb[3].mxu0 }
 0x10d   : > { %v822_v14 = vpack.c.bf16 %v821_v11, %v821_v11  ;;  %825 = vrot.lane.b32.xlu0 %v2311_v12, %s2089_s7  ;;  %s2101_s7 = smov 16  }
 0x10f   : > { %936 = vrot.lane.b32.xlu1 %v822_v14, %s2090_s14  ;;  %s2102_s14 = smov 24  }
 0x111   : > { %938 = vrot.lane.b32.xlu0 %v2311_v12, %s2091_s18  ;;  %s2522_s18 = sld [smem:[#allocation3_spill]] }
 0x113   : > { %1048 = vrot.lane.b32.xlu1 %v2311_v12, %s2092_s24  ;;  %s2515_s24 = scalar_lea.vmem %s2469_s5, %s2222_s28 }
 0x115   : > { %1046 = vrot.lane.b32.xlu0 %v822_v14, %s2093_s0 }
 0x117   : > { %1158 = vrot.lane.b32.xlu1 %v2311_v12, %s2094_s17  ;;  %p1836_p8 = scmp.ne.s32.totalorder %s2522_s18, 1 }
 0x118   : > { %s2524_s17 = sld [smem:[#allocation18_spill]] (!%p1836_p8) }
 0x119   : > { %1156 = vrot.lane.b32.xlu0 %v822_v14, %s2095_s27 }
 0x17f   : > { %v826_v15 = vpop.permute.xlu0 %825 }
 0x180   : > { %v832_v16 = vsel %vm827_vm3, %v826_v15, 0 }
 0x181   : > { %1884 = vmatpush3.bf16.xpose.msra.mxu1 %v832_v16  ;;  %v937_v18 = vpop.permute.xlu1 %936 }
 0x182   : > { %1895 = vmatprep.subr.bf16.mxu1 %v2087_v2 }
 0x183   : > { %v939_v17 = vpop.permute.xlu0 %938 }
 0x184   : > { %v944_v19 = vsel %vm827_vm3, %v939_v17, 0 }
 0x185   : > { %v1049_v20 = vpop.permute.xlu1 %1048 }
 0x186   : > { %v1054_v21 = vsel %vm827_vm3, %v1049_v20, 0 }
 0x187   : > { %v1047_v23 = vpop.permute.xlu0 %1046 }
 0x188   : > { %1886 = vmatmul.mubr.msk.bf16.vlgmr.msra.gmra.mrb[0].mxu1 %vm827_vm3, %v822_v14 }
 0x189   : > { %1896 = vmatpush3.bf16.xpose.msra.mxu1 %v944_v19  ;;  %1897 = vmatprep.mubr.msk.bf16.mxu1 %vm2088_vm1, %v2087_v2  ;;  %v1159_v22 = vpop.permute.xlu1 %1158 }
 0x18a   : > { %1907 = vmatprep.subr.bf16.mxu1 %v2087_v2  ;;  %v1164_v24 = vsel %vm827_vm3, %v1159_v22, 0 }
 0x18b   : > { %v1157_v25 = vpop.permute.xlu0 %1156 }
 0x190   : > { %1898 = vmatmul.mubr.msk.bf16.vlgmr.msra.gmra.mrb[4].mxu1 %vm827_vm3, %v937_v18 }
 0x191   : > { %1908 = vmatpush3.bf16.xpose.msra.mxu1 %v1054_v21  ;;  %1909 = vmatprep.mubr.msk.bf16.mxu1 %vm2088_vm1, %v2087_v2 }
 0x192   : > { %1919 = vmatprep.subr.bf16.mxu1 %v2087_v2 }
 0x198   : > { %1910 = vmatmul.mubr.msk.bf16.vlgmr.msra.gmra.mrb[8].mxu1 %vm827_vm3, %v1047_v23 }
 0x199   : > { %1920 = vmatpush3.bf16.xpose.msra.mxu1 %v1164_v24  ;;  %1921 = vmatprep.mubr.msk.bf16.mxu1 %vm2088_vm1, %v2087_v2 }
 0x19a   : > { %1931 = vmatprep.subr.bf16.mxu1 %v2087_v2 }
 0x1a0   : > { %1922 = vmatmul.mubr.msk.bf16.vlgmr.msra.gmra.mrb[12].mxu1 %vm827_vm3, %v1157_v25 }
 0x1a1   : > { %1935 = vmatprep.mubr.msk.bf16.mxu1 %vm2088_vm1, %v2087_v2 }
 0x25b   : > { %v868_v27 = vpop.f32.mrb[0].mxu1 }
 0x25c   : > { %v869_v28 = vadd.f32 %v868_v27, %v747_v26  ;;  %v1887_v29 = vpop.f32.mrb[1].mxu1 }
 0x25d   : > { %v871_v30 = vpop.f32.mrb[2].mxu1 }
 0x25e   : > { %v1888_v31 = vpop.f32.mrb[3].mxu1  ;;  %v874_v32 = vsel %vm827_vm3, %v869_v28, -inf }
 0x25f   : > { %875 = vmax.xlane.f32.xlu1 %v874_v32 }
 0x263   : > { %v980_v33 = vpop.f32.mrb[4].mxu1 }
 0x264   : > { %v981_v34 = vadd.f32 %v980_v33, %v747_v26  ;;  %v1899_v35 = vpop.f32.mrb[5].mxu1 }
 0x265   : > { %v983_v36 = vpop.f32.mrb[6].mxu1 }
 0x266   : > { %v1900_v37 = vpop.f32.mrb[7].mxu1  ;;  %v986_v38 = vsel %vm827_vm3, %v981_v34, -inf }
 0x267   : > { %987 = vmax.xlane.f32.xlu0 %v986_v38 }
 0x26b   : > { %v1090_v39 = vpop.f32.mrb[8].mxu1 }
 0x26c   : > { %v1091_v40 = vadd.f32 %v1090_v39, %v747_v26  ;;  %v1911_v41 = vpop.f32.mrb[9].mxu1 }
 0x26d   : > { %v1093_v42 = vpop.f32.mrb[10].mxu1  ;;  %v2017_v41 = vld [vmem:[%s2245_s30] sm:$0xff]  }
 0x26e   : > { %v1912_v43 = vpop.f32.mrb[11].mxu1  ;;  %v1096_v44 = vsel %vm827_vm3, %v1091_v40, -inf  ;;  %1932 = vmatpush3.bf16.msra.mxu1 %v2017_v41  ;;  %v2018_v42 = vld [vmem:[%s2245_s30 + $0x8] sm:$0xff]  }
 0x26f   : > { %1097 = vmax.xlane.f32.xlu0 %v1096_v44  ;;  %1933 = vmatprep.subr.bf16.mxu1 %v2087_v2 }
 0x272   : > { %1934 = vmatpush3.bf16.msra.mxu1 %v2018_v42 }
 0x273   : > { %v1200_v45 = vpop.f32.mrb[12].mxu1  ;;  %1947 = vmatprep.subr.bf16.mxu1 %v2087_v2 }
 0x274   : > { %v1201_v46 = vadd.f32 %v1200_v45, %v747_v26  ;;  %v1923_v47 = vpop.f32.mrb[13].mxu1 }
 0x275   : > { %v1203_v48 = vpop.f32.mrb[14].mxu1 }
 0x276   : > { %v1924_v49 = vpop.f32.mrb[15].mxu1  ;;  %v1206_v50 = vsel %vm827_vm3, %v1201_v46, -inf }
 0x277   : > { %1207 = vmax.xlane.f32.xlu1 %v1206_v50 }
 0x2ec   : > { %v876_v51 = vpop.xlane.xlu1 %875 }
 0x2ed   : > { %v877_v52 = vsub.f32 %v869_v28, %v876_v51 }
 0x2ef   : > { %v878_v53 = vmul.f32 1.442695, %v877_v52 }
 0x2f1   : > { %2025 = vpow2.f32 %v878_v53 }
 0x2f4   : > { %v988_v54 = vpop.xlane.xlu0 %987 }
 0x2f5   : > { %v989_v55 = vsub.f32 %v981_v34, %v988_v54 }
 0x2f7   : > { %v990_v56 = vmul.f32 1.442695, %v989_v55 }
 0x2f9   : > { %2027 = vpow2.f32 %v990_v56 }
 0x2fb   : > { %v2026_v57 = vpop.eup %2025 }
 0x2fc   : > { %v1098_v58 = vpop.xlane.xlu0 %1097  ;;  %v880_v59 = vsel %vm827_vm3, %v2026_v57, 0.0 }
 0x2fd   : > { %v1099_v60 = vsub.f32 %v1091_v40, %v1098_v58  ;;  %881 = vadd.xlane.f32.xlu0 %v880_v59  ;;  %v1818_v58 = vld [vmem:[%s2515_s24] ss:$0 sm:$0xff] }
 0x2ff   : > { %v1100_v61 = vmul.f32 1.442695, %v1099_v60 }
 0x301   : > { %2029 = vpow2.f32 %v1100_v61 }
 0x303   : > { %v2028_v62 = vpop.eup %2027 }
 0x304   : > { %v992_v63 = vsel %vm827_vm3, %v2028_v62, 0.0  ;;  %v1208_v3 = vpop.xlane.xlu1 %1207 }
 0x305   : > { %993 = vadd.xlane.f32.xlu1 %v992_v63  ;;  %v1209_v5 = vsub.f32 %v1201_v46, %v1208_v3 }
 0x307   : > { %v1210_v6 = vmul.f32 1.442695, %v1209_v5 }
 0x309   : > { %2031 = vpow2.f32 %v1210_v6 }
 0x30b   : > { %v2030_v0 = vpop.eup %2029 }
 0x30c   : > { %v1102_v1 = vsel %vm827_vm3, %v2030_v0, 0.0 }
 0x30d   : > { %1103 = vadd.xlane.f32.xlu0 %v1102_v1 }
 0x313   : > { %v2032_v7 = vpop.eup %2031 }
 0x314   : > { %v1212_v8 = vsel %vm827_vm3, %v2032_v7, 0.0 }
 0x316   : > { %998 = vrot.lane.b32.xlu1 %v2311_v12, %s2096_s16 }
 0x323   : > { %886 = vrot.lane.b32.xlu0 %v2311_v12, %s2097_s21  ;;  %s2519_s21 = sld [smem:[#allocation15_spill]] }
 0x327   : > { %1218 = vrot.lane.b32.xlu0 %v2311_v12, %s2098_s1 }
 0x329   : > { %s2520_s1 = scalar_lea.vmem %s2519_s21, %s2222_s28 }
 0x33a   : > { %1213 = vadd.xlane.f32.xlu1 %v1212_v8 }
 0x34b   : > { %1108 = vrot.lane.b32.xlu1 %v2311_v12, %s2099_s2 }
 0x38a   : > { %v882_v9 = vpop.xlane.xlu0 %881 }
 0x38b   : > { %2033 = vrcp.f32 %v882_v9  ;;  %v2019_v9 = vld [vmem:[%s2262_s22] sm:$0xff]  }
 0x392   : > { %v994_v10 = vpop.xlane.xlu1 %993 }
 0x393   : > { %2035 = vrcp.f32 %v994_v10  ;;  %v2020_v10 = vld [vmem:[%s2262_s22 + $0x8] sm:$0xff]   ;;  %s2516_s22 = scalar_lea.vmem %s2470_s6, %s2222_s28 }
 0x395   : > { %v2034_v11 = vpop.eup %2033 }
 0x396   : > { %v884_v14 = vmul.f32 %v2034_v11, %v2026_v57  ;;  %v999_v17 = vpop.permute.xlu1 %998  ;;  %v2022_v11 = vld [vmem:[%s2272_s19 + $0x8] sm:$0xff]  }
 0x397   : > { %v1004_v20 = vsel %vm891_vm4, %v999_v17, 0  ;;  %v1822_v17 = vld [vmem:[%s2516_s22] ss:$0 sm:$0xff] }
 0x398   : > { %v885_v18 = vpack.c.bf16 %v884_v14, %v884_v14 }
 0x39a   : > { %v1104_v13 = vpop.xlane.xlu0 %1103 }
 0x39b   : > { %2037 = vrcp.f32 %v1104_v13 }
 0x39d   : > { %v2036_v19 = vpop.eup %2035 }
 0x39e   : > { %v887_v15 = vpop.permute.xlu0 %886  ;;  %v996_v12 = vmul.f32 %v2036_v19, %v2028_v62  ;;  %v1823_v19 = vld [vmem:[%s2518_s26] ss:$0 sm:$0xff] }
 0x39f   : > { %v893_v16 = vsel %vm891_vm4, %v887_v15, 0 }
 0x3a0   : > { %1890 = vmatpush3.bf16.msra.mxu0 %v893_v16  ;;  %v997_v21 = vpack.c.bf16 %v996_v12, %v996_v12 }
 0x3a1   : > { %1901 = vmatprep.subr.bf16.mxu0 %v2087_v2 }
 0x3a2   : > { %v1219_v27 = vpop.permute.xlu0 %1218 }
 0x3a3   : > { %1892 = vmatmul.mubr.msk.bf16.vlgmr.msra.gmra.mrb[4].mxu0 %vm827_vm3, %v885_v18  ;;  %v1224_v29 = vsel %vm891_vm4, %v1219_v27, 0 }
 0x3a4   : > { %1902 = vmatpush3.bf16.msra.mxu0 %v1004_v20  ;;  %1903 = vmatprep.mubr.msk.bf16.mxu0 %vm2088_vm1, %v2087_v2 }
 0x3a5   : > { %1913 = vmatprep.subr.bf16.mxu0 %v2087_v2  ;;  %v2038_v22 = vpop.eup %2037 }
 0x3a6   : > { %v1106_v24 = vmul.f32 %v2038_v22, %v2030_v0  ;;  %v2023_v22 = vld [vmem:[%s2272_s19 + $0x10] sm:$0xff]  }
 0x3a8   : > { %v1107_v28 = vpack.c.bf16 %v1106_v24, %v1106_v24  ;;  %v1824_v24 = vld [vmem:[%s2520_s1] ss:$0 sm:$0xff] }
 0x3ab   : > { %1904 = vmatmul.mubr.msk.bf16.vlgmr.msra.gmra.mrb[8].mxu0 %vm827_vm3, %v997_v21 }
 0x3ac   : > { %1915 = vmatprep.mubr.msk.bf16.mxu0 %vm2088_vm1, %v2087_v2 }
 0x3c7   : > { %v1214_v23 = vpop.xlane.xlu1 %1213 }
 0x3c8   : > { %2039 = vrcp.f32 %v1214_v23  ;;  %v2024_v23 = vld [vmem:[%s2272_s19 + $0x18] sm:$0xff]  }
 0x3cb   : > { %v1109_v25 = vpop.permute.xlu1 %1108 }
 0x3cc   : > { %v1114_v26 = vsel %vm891_vm4, %v1109_v25, 0 }
 0x3cd   : > { %1914 = vmatpush3.bf16.msra.mxu0 %v1114_v26 }
 0x3ce   : > { %1925 = vmatprep.subr.bf16.mxu0 %v2087_v2 }
 0x3d0   : > { %1916 = vmatmul.mubr.msk.bf16.vlgmr.msra.gmra.mrb[12].mxu0 %vm827_vm3, %v1107_v28 }
 0x3d1   : > { %1926 = vmatpush3.bf16.msra.mxu0 %v1224_v29  ;;  %1927 = vmatprep.mubr.msk.bf16.mxu0 %vm2088_vm1, %v2087_v2 }
 0x3d2   : > { %v2040_v30 = vpop.eup %2039  ;;  %1939 = vmatprep.subr.bf16.mxu0 %v2087_v2 }
 0x3d3   : > { %v1216_v31 = vmul.f32 %v2040_v30, %v2032_v7 }
 0x3d5   : > { %v1217_v32 = vpack.c.bf16 %v1216_v31, %v1216_v31 }
 0x3d8   : > { %1928 = vmatmul.mubr.msk.bf16.vlgmr.msra.gmra.mrb[16].mxu0 %vm827_vm3, %v1217_v32 }
 0x3d9   : > { %1943 = vmatprep.mubr.msk.bf16.mxu0 %vm2088_vm1, %v2087_v2  ;;  %1940 = vmatpush3.bf16.msra.mxu0 %v2019_v9 }
 0x3da   : > { %1941 = vmatprep.subr.bf16.mxu0 %v2087_v2 }
 0x3dd   : > { %1942 = vmatpush3.bf16.msra.mxu0 %v2020_v10 }
 0x476   : > { %v929_v33 = vpop.f32.mrb[4].mxu0 }
 0x477   : > { %v1893_v34 = vpop.f32.mrb[5].mxu0 }
 0x478   : > { %v932_v35 = vpop.f32.mrb[6].mxu0 }
 0x479   : > { %v1894_v36 = vpop.f32.mrb[7].mxu0 }
 0x47e   : > { %v1040_v37 = vpop.f32.mrb[8].mxu0 }
 0x47f   : > { %1267 = vrot.lane.b32.xlu1 %v1040_v37, %s2100_s4  ;;  %v1905_v38 = vpop.f32.mrb[9].mxu0 }
 0x480   : > { %v1043_v39 = vpop.f32.mrb[10].mxu0 }
 0x481   : > { %v1906_v40 = vpop.f32.mrb[11].mxu0 }
 0x4a3   : > { %v1150_v43 = vpop.f32.mrb[12].mxu0 }
 0x4a4   : > { %1271 = vrot.lane.b32.xlu0 %v1150_v43, %s2101_s7  ;;  %v1917_v44 = vpop.f32.mrb[13].mxu0 }
 0x4a5   : > { %v1153_v45 = vpop.f32.mrb[14].mxu0 }
 0x4a6   : > { %v1918_v46 = vpop.f32.mrb[15].mxu0 }
 0x4ab   : > { %v1260_v47 = vpop.f32.mrb[16].mxu0 }
 0x4ac   : > { %1275 = vrot.lane.b32.xlu1 %v1260_v47, %s2102_s14  ;;  %v1929_v48 = vpop.f32.mrb[17].mxu0 }
 0x4ad   : > { %v1263_v49 = vpop.f32.mrb[18].mxu0  ;;  %v1834_v48 = vld [vmem:[%s730_s25] ss:$0 sm:$0xff]  ;;  %s2523_s25 = sld [smem:[#allocation17_spill]] (!%p1836_p8) }
 0x4ae   : > { %v1930_v50 = vpop.f32.mrb[19].mxu0 }
 0x4af   : > { %v1835_v50 = vld [vmem:[%s733_s8] ss:$0 sm:$0xff] }
 0x4f1   : > { %v1268_v51 = vpop.permute.xlu1 %1267 }
 0x4f2   : > { %v1278_v53 = vsel %vm827_vm3, %v929_v33, %v1268_v51 }
 0x516   : > { %v1272_v52 = vpop.permute.xlu0 %1271 }
 0x517   : > { %v1280_v54 = vsel %vm1279_vm5, %v1278_v53, %v1272_v52 }
 0x51e   : > { %v1276_v55 = vpop.permute.xlu1 %1275 }
 0x51f   : > { %v1282_v56 = vsel %vm1281_vm6, %v1280_v54, %v1276_v55 }
 0x520   : > { %v1283_v57 = vpack.c.bf16 %v1282_v56, %v1282_v56 }
 0x522   : > { %1936 = vmatmul.mubr.msk.bf16.vlgmr.msra.gmra.mrb[16].mxu1 %vm772_vm2, %v1283_v57 }
 0x523   : > { %1955 = vmatprep.mubr.msk.bf16.mxu1 %vm2088_vm1, %v2087_v2 }
 0x5f5   : > { %v1339_v59 = vpop.f32.mrb[16].mxu1 }
 0x5f6   : > { %v1340_v60 = vadd.f32 %v1818_v58, %v1339_v59  ;;  %v1937_v61 = vpop.f32.mrb[17].mxu1 }
 0x5f7   : > { %v1342_v62 = vpop.f32.mrb[18].mxu1 }
 0x5f8   : > { %v1938_v63 = vpop.f32.mrb[19].mxu1  ;;  %v1345_v0 = vadd.f32 %v1340_v60, %v2295_v4  ;;  %v2021_v4 = vld [vmem:[%s2272_s19] sm:$0xff]  }
 0x5f9   : > { %1948 = vmatpush3.bf16.msra.mxu1 %v2021_v4  ;;  %v1837_v63 = vld [vmem:[%s2523_s25] ss:$0 sm:$0xff] (!%p1836_p8) }
 0x5fa   : > { %v1348_v1 = vsel %vm772_vm2, %v1345_v0, 0.0  ;;  %1949 = vmatprep.subr.bf16.mxu1 %v2087_v2 }
 0x5fb   : > { %1349 = vadd.xlane.f32.xlu0 %v1348_v1  ;;  %v1838_v1 = vld [vmem:[%s2524_s17] ss:$0 sm:$0xff] (!%p1836_p8) }
 0x5fd   : > { %1950 = vmatpush3.bf16.msra.mxu1 %v2022_v11 }
 0x5fe   : > { %1951 = vmatprep.subr.bf16.mxu1 %v2087_v2 }
 0x601   : > { %1952 = vmatpush3.bf16.msra.mxu1 %v2023_v22 }
 0x602   : > { %1953 = vmatprep.subr.bf16.mxu1 %v2087_v2  ;;  %v1828_v2 = vld [vmem:[%s727_s13] ss:$0 sm:$0xff] }
 0x605   : > { %1954 = vmatpush3.bf16.msra.mxu1 %v2024_v23 }
 0x688   : > { %v1350_v3 = vpop.xlane.xlu0 %1349 }
 0x689   : > { %v1352_v5 = vmul.f32 0.03125, %v1350_v3 }
 0x68b   : > { %v1353_v6 = vsub.f32 %v1345_v0, %v1352_v5 }
 0x68d   : > { %v1354_v7 = vmul.f32 %v1353_v6, %v1353_v6 }
 0x68f   : > { %v1355_v8 = vsel %vm772_vm2, %v1354_v7, 0.0 }
 0x690   : > { %1356 = vadd.xlane.f32.xlu1 %v1355_v8 }
 0x71d   : > { %v1357_v13 = vpop.xlane.xlu1 %1356 }
 0x71e   : > { %v1358_v14 = vmul.f32 0.03125, %v1357_v13 }
 0x720   : > { %v1359_v15 = vadd.f32 1e-05, %v1358_v14 }
 0x722   : > { %2041 = vrsqrt.f32 %v1359_v15 }
 0x72c   : > { %v2042_v16 = vpop.eup %2041 }
 0x72d   : > { %v1361_v18 = vmul.f32 %v2042_v16, %v1353_v6 }
 0x72f   : > { %v1368_v20 = vmul.f32 %v1822_v17, %v1361_v18 }
 0x731   : > { %v1375_v12 = vadd.f32 %v1823_v19, %v1368_v20 }
 0x733   : > { %v1390_v21 = vpack.c.bf16 %v1375_v12, %v1375_v12 }
 0x735   : > { %1944 = vmatmul.mubr.msk.bf16.vlgmr.msra.gmra.mrb[20].mxu0 %vm772_vm2, %v1390_v21 }
 0x808   : > { %v1446_v25 = vpop.f32.mrb[20].mxu0 }
 0x809   : > { %v1447_v26 = vadd.f32 %v1824_v24, %v1446_v25  ;;  %v1945_v27 = vpop.f32.mrb[21].mxu0 }
 0x80a   : > { %v1449_v28 = vpop.f32.mrb[22].mxu0 }
 0x80b   : > { %v1452_v29 = vmax.f32 %v1447_v26, 0.0  ;;  %v1946_v30 = vpop.f32.mrb[23].mxu0 }
 0x80d   : > { %v1453_v31 = vpack.c.bf16 %v1452_v29, %v1452_v29 }
 0x80f   : > { %1956 = vmatmul.mubr.msk.bf16.vlgmr.msra.gmra.mrb[20].mxu1 %vm1484_vm7, %v1453_v31 }
 0x8e2   : > { %v1522_v32 = vpop.f32.mrb[20].mxu1 }
 0x8e3   : > { %v1523_v33 = vadd.f32 %v1828_v2, %v1522_v32  ;;  %v1957_v34 = vpop.f32.mrb[21].mxu1 }
 0x8e4   : > { %v1525_v35 = vpop.f32.mrb[22].mxu1 }
 0x8e5   : > { %v1958_v36 = vpop.f32.mrb[23].mxu1  ;;  %v1528_v37 = vadd.f32 %v1523_v33, %v1375_v12 }
 0x8e7   : > { %v1531_v38 = vsel %vm772_vm2, %v1528_v37, 0.0 }
 0x8e8   : > { %1532 = vadd.xlane.f32.xlu0 %v1531_v38 }
 0x975   : > { %v1533_v39 = vpop.xlane.xlu0 %1532 }
 0x976   : > { %v1534_v40 = vmul.f32 0.03125, %v1533_v39 }
 0x978   : > { %v1535_v41 = vsub.f32 %v1528_v37, %v1534_v40 }
 0x97a   : > { %v1536_v42 = vmul.f32 %v1535_v41, %v1535_v41 }
 0x97c   : > { %v1537_v43 = vsel %vm772_vm2, %v1536_v42, 0.0 }
 0x97d   : > { %1538 = vadd.xlane.f32.xlu0 %v1537_v43 }
 0xa0a   : > { %v1539_v44 = vpop.xlane.xlu0 %1538 }
 0xa0b   : > { %v1540_v45 = vmul.f32 0.03125, %v1539_v44 }
 0xa0d   : > { %v1541_v46 = vadd.f32 1e-05, %v1540_v45 }
 0xa0f   : > { %2043 = vrsqrt.f32 %v1541_v46 }
 0xa19   : > { %v2044_v47 = vpop.eup %2043 }
 0xa1a   : > { %v1543_v49 = vmul.f32 %v2044_v47, %v1535_v41  ;;  %1562 = sbr.rel (%p1836_p8) target bundleno = 2906 (0xb5a), region = 92 }
 0xa1c   : > { %v1550_v51 = vmul.f32 %v1834_v48, %v1543_v49 }
 0xa1e   : > { %v1557_v52 = vadd.f32 %v1835_v50, %v1550_v51 }
 0xa20   : > { %1558 = vst.msk [vmem:[#allocation2] sm:$0xff] %vm772_vm2, %v1557_v52  ;;  %v1565_v53 = vsel (!%p1836_p8), %vm772_vm2, %v1557_v52, 0.0 }
 0xa21   : > { %1566 = vadd.xlane.f32.xlu0 %v1565_v53 }
 0xaae   : > { %v1567_v54 = vpop.xlane.xlu0 %1566 }
 0xaaf   : > { %v1568_v55 = vmul.f32 0.03125, %v1567_v54 }
 0xab1   : > { %v1569_v56 = vsub.f32 %v1557_v52, %v1568_v55 }
 0xab3   : > { %v1570_v57 = vmul.f32 %v1569_v56, %v1569_v56 }
 0xab5   : > { %v1571_v58 = vsel %vm772_vm2, %v1570_v57, 0.0 }
 0xab6   : > { %1572 = vadd.xlane.f32.xlu0 %v1571_v58 }
 0xb43   : > { %v1573_v59 = vpop.xlane.xlu0 %1572 }
 0xb44   : > { %v1574_v60 = vmul.f32 0.03125, %v1573_v59 }
 0xb46   : > { %v1575_v61 = vadd.f32 1e-05, %v1574_v60 }
 0xb48   : > { %2045 = vrsqrt.f32 %v1575_v61 }
 0xb52   : > { %v2046_v62 = vpop.eup %2045 }
 0xb53   : > { %v1577_v0 = vmul.f32 %v2046_v62, %v1569_v56 }
 0xb55   : > { %v1584_v3 = vmul.f32 %v1837_v63, %v1577_v0 }
 0xb57   : > { %v1591_v5 = vadd.f32 %v1838_v1, %v1584_v3 }
 0xb59   : > { %1592 = vst.msk [vmem:[%s737_s9] sm:$0xff] %vm772_vm2, %v1591_v5 }
 0xb5a PF: > { %s2526_s23 = sld [smem:[#allocation6_spill]]  ;;  %s2527_s21 = sld [smem:[#allocation4_spill]] }
 0xb5b   : > { %s2528_s22 = sld [smem:[#allocation5_spill]]  ;;  %s2530_s24 = sld [smem:[#allocation8_spill]] }
 0xb60   : > { %s26_s25 = sadd.s32 1, %s2526_s23   ;;  %s2529_s23 = sld [smem:[#allocation7_spill]] }
 0xb61   : > { %p23_p9 = scmp.ge.s32.totalorder %s26_s25, 6  }
 0xb63   :  { %25 = sbr.rel (!%p23_p9) target bundleno = 12 (0xc), region = 161 }

// kernel: seq2seq_transformer_forward.3
= control target key start
LH: loop header
LB: loop body
LE: loop exit
PB: predicated region body
PF: predicated region fallthrough
CT: control target
= control target key end

     0   :  { %s3778_s30 = smov 0   ;;  %s4253_s0 = inlined_call_operand.vmem [shape: f32[2,8,32], index: 0, kind: input, shape index: {}]   ;;  %s4254_s1 = inlined_call_operand.vmem [shape: f32[2,8,32], index: 1, kind: input, shape index: {}]   ;;  %s4255_s2 = inlined_call_operand.vmem [shape: f32[2,8,8], index: 2, kind: input, shape index: {}]   ;;  %s4256_s3 = inlined_call_operand.vmem [shape: f32[2,8,8], index: 3, kind: input, shape index: {}]   ;;  %s4257_s4 = inlined_call_operand.vmem [shape: bf16[2,32,96], index: 4, kind: input, shape index: {}]   ;;  %s4258_s5 = inlined_call_operand.vmem [shape: f32[2,1,96], index: 5, kind: input, shape index: {}]   ;;  %s4259_s6 = inlined_call_operand.vmem [shape: bf16[2,32,32], index: 6, kind: input, shape index: {}]   ;;  %s4260_s7 = inlined_call_operand.vmem [shape: f32[2,1,32], index: 7, kind: input, shape index: {}]   ;;  %s4261_s8 = inlined_call_operand.vmem [shape: f32[2,1,32], index: 8, kind: input, shape index: {}]   ;;  %s4262_s9 = inlined_call_operand.vmem [shape: f32[2,1,32], index: 9, kind: input, shape index: {}]   ;;  %s4263_s10 = inlined_call_operand.vmem [shape: bf16[2,32,32], index: 10, kind: input, shape index: {}]   ;;  %s4264_s11 = inlined_call_operand.vmem [shape: f32[2,1,32], index: 11, kind: input, shape index: {}]   ;;  %s4265_s12 = inlined_call_operand.vmem [shape: bf16[2,32,64], index: 12, kind: input, shape index: {}]   ;;  %s4266_s13 = inlined_call_operand.vmem [shape: f32[2,1,64], index: 13, kind: input, shape index: {}]   ;;  %s4267_s14 = inlined_call_operand.vmem [shape: bf16[2,32,32], index: 14, kind: input, shape index: {}]   ;;  %s4268_s15 = inlined_call_operand.vmem [shape: f32[2,1,32], index: 15, kind: input, shape index: {}]   ;;  %s4269_s16 = inlined_call_operand.vmem [shape: f32[2,1,32], index: 16, kind: input, shape index: {}]   ;;  %s4270_s17 = inlined_call_operand.vmem [shape: f32[2,1,32], index: 17, kind: input, shape index: {}]   ;;  %s4271_s18 = inlined_call_operand.vmem [shape: bf16[2,32,64], index: 18, kind: input, shape index: {}]   ;;  %s4272_s19 = inlined_call_operand.vmem [shape: f32[2,1,64], index: 19, kind: input, shape index: {}]   ;;  %s4273_s20 = inlined_call_operand.vmem [shape: bf16[2,64,32], index: 20, kind: input, shape index: {}]   ;;  %s4274_s21 = inlined_call_operand.vmem [shape: f32[2,1,32], index: 21, kind: input, shape index: {}]   ;;  %s4275_s22 = inlined_call_operand.vmem [shape: f32[2,1,32], index: 22, kind: input, shape index: {}]   ;;  %s4276_s23 = inlined_call_operand.vmem [shape: f32[2,1,32], index: 23, kind: input, shape index: {}]   ;;  %s4277_s24 = inlined_call_operand.vmem [shape: f32[1,32], index: 24, kind: input, shape index: {}]   ;;  %s4278_s25 = inlined_call_operand.vmem [shape: f32[1,32], index: 25, kind: input, shape index: {}]   ;;  %s4279_s26 = inlined_call_operand.vmem [shape: bf16[32,128], index: 26, kind: input, shape index: {}]   ;;  %s4280_s27 = inlined_call_operand.vmem [shape: f32[1,128], index: 27, kind: input, shape index: {}]   ;;  %s4281_s28 = inlined_call_operand.vmem [shape: f32[2,8,128], index: 28, kind: output, shape index: {}]  }
   0x1   :  { %4289 = sst [smem:[#allocation11_spill]] %s4253_s0 }
   0x2   :  { %4290 = sst [smem:[#allocation12_spill]] %s4254_s1 }
   0x3   :  { %4291 = sst [smem:[#allocation13_spill]] %s4255_s2 }
   0x4   :  { %4292 = sst [smem:[#allocation14_spill]] %s4256_s3  ;;  %s3780_s3 = smov 0  }
   0x5   :  { %4293 = sst [smem:[#allocation15_spill]] %s4257_s4 }
   0x6   :  { %4294 = sst [smem:[#allocation16_spill]] %s4258_s5  ;;  %s3774_s5 = smov 0  }
   0x7   :  { %4295 = sst [smem:[#allocation17_spill]] %s4259_s6 }
   0x8   :  { %4296 = sst [smem:[#allocation18_spill]] %s4260_s7 }
   0x9   :  { %4297 = sst [smem:[#allocation19_spill]] %s4261_s8  ;;  %s3772_s8 = smov 0  }
   0xa   :  { %4298 = sst [smem:[#allocation20_spill]] %s4262_s9  ;;  %s3776_s9 = smov 0  }
   0xb   :  { %4299 = sst [smem:[#allocation21_spill]] %s4263_s10 }
   0xc   :  { %4300 = sst [smem:[#allocation22_spill]] %s4264_s11 }
   0xd   :  { %4301 = sst [smem:[#allocation23_spill]] %s4265_s12 }
   0xe   :  { %4302 = sst [smem:[#allocation24_spill]] %s4267_s14 }
   0xf   :  { %4303 = sst [smem:[#allocation25_spill]] %s4269_s16 }
  0x10   :  { %4304 = sst [smem:[#allocation26_spill]] %s4270_s17 }
  0x11   :  { %4305 = sst [smem:[#allocation27_spill]] %s4271_s18 }
  0x12   :  { %4306 = sst [smem:[#allocation28_spill]] %s4272_s19 }
  0x13   :  { %4307 = sst [smem:[#allocation29_spill]] %s4275_s22 }
  0x14   :  { %4308 = sst [smem:[#allocation30_spill]] %s4276_s23 }
  0x15   :  { %4309 = sst [smem:[#allocation31_spill]] %s4277_s24 }
  0x16   :  { %4310 = sst [smem:[#allocation32_spill]] %s4278_s25 }
  0x17   :  { %4311 = sst [smem:[#allocation33_spill]] %s4279_s26 }
  0x18   :  { %4312 = sst [smem:[#allocation34_spill]] %s4280_s27 }
  0x19   :  { %4313 = sst [smem:[#allocation35_spill]] %s4281_s28 }
  0x1a LB: > { %4314 = sst [smem:[#allocation3_spill]] %s3591_s8  ;;  %s47_s6 = sadd.s32 1, %s3599_s9  ;;  %s3607_s3 = sphi %s3780_s3, %s38_s3   ;;  %s3603_s30 = sphi %s3778_s30, %s4383_s30   ;;  %s3599_s9 = sphi %s3776_s9, %s4382_s9   ;;  %s3595_s5 = sphi %s3774_s5, %s4381_s5   ;;  %s3591_s8 = sphi %s3772_s8, %s4380_s8  }
  0x1b   : > { %4315 = sst [smem:[#allocation4_spill]] %s3599_s9  ;;  %s50_s10 = sadd.s32 1, %s3603_s30 }
  0x1c   : > { %4316 = sst [smem:[#allocation5_spill]] %s3603_s30  ;;  %p48_p0 = scmp.ge.s32.totalorder %s47_s6, 2 }
  0x1d   : > { %4317 = sst [smem:[#allocation6_spill]] %s3607_s3  ;;  %p3142_p1 = scmp.ge.s32.totalorder %s3607_s3, 1 }
  0x1e   : > { %p974_p2 = scmp.lt.s32.totalorder %s3607_s3, 5  ;;  %s4385_s6 = smov (%p48_p0, %s47_s6), 0 }
  0x1f   : > { %4318 = sst [smem:[#allocation7_spill]] %s4385_s6  ;;  %s4387_s10 = smov (!%p48_p0, %s50_s10), %s3603_s30 }
  0x20   : > { %p975_p3 = pnand %p3142_p1, %p974_p2  ;;  %p52_p4 = scmp.ge.s32.totalorder %s4387_s10, 2 }
  0x22   : > { %s4389_s10 = smov (%p52_p4, %s4387_s10), 0  ;;  %978 = sbr.rel (%p975_p3) target bundleno = 4899 (0x1323), region = 132 }
  0x23   : > { %4319 = sst [smem:[#allocation8_spill]] %s4389_s10 }
  0x29   : > { %p1132_p5 = scmp.lt.s32.totalorder %s3595_s5, 1  ;;  %p1148_p6 = scmp.lt.s32.totalorder %s3591_s8, 1 }
  0x2a   : > { %s4320_s7 = sld [smem:[#allocation11_spill]]  ;;  %s4325_s4 = sld [smem:[#allocation15_spill]] }
  0x2b   : > { %s4391_s5 = smov (!%p1132_p5, %s3595_s5), 1  ;;  %s4327_s3 = sld [smem:[#allocation17_spill]] }
  0x2c   : > { %s3806_s0 = scalar_select %p1148_p6, %s3591_s8, 1 }
  0x2d   : > { %s3808_s11 = sshll.u32 %s4391_s5, 3  ;;  %s4332_s9 = sld [smem:[#allocation21_spill]] }
  0x2e   : > { %s3224_s29 = sshll.u32 %s3806_s0, 4  ;;  %s4334_s27 = sld [smem:[#allocation23_spill]] }
  0x2f   : > { %s4335_s14 = sld [smem:[#allocation24_spill]]  ;;  %s4338_s18 = sld [smem:[#allocation27_spill]] }
  0x30   : > { %s1135_s12 = scalar_lea.vmem %s4320_s7, %s3808_s11  ;;  %s3834_s10 = scalar_lea.vmem %s4325_s4, %s3224_s29 }
  0x31   : > { %4326 = sst [smem:[#allocation9_spill]] %s3834_s10  ;;  %s3839_s6 = scalar_lea.vmem %s4327_s3, %s3224_s29 }
  0x32   : > { %4328 = sst [smem:[#allocation10_spill]] %s3839_s6  ;;  %s1215_s26 = scalar_lea.vmem %s4274_s21, %s3806_s0 }
  0x33   : > { %s3856_s30 = scalar_lea.vmem %s4332_s9, %s3224_s29  ;;  %s4340_s5 = sld [smem:[#allocation29_spill]] }
  0x34   : > { %s3865_s8 = scalar_lea.vmem %s4334_s27, %s3224_s29  ;;  %s4343_s16 = sld [smem:[#allocation3_spill]] }
  0x35   : > { %s3874_s22 = scalar_lea.vmem %s4335_s14, %s3224_s29  ;;  %s3891_s2 = scalar_lea.vmem %s4338_s18, %s3224_s29 }
  0x36   : > { %s3230_s14 = sshll.u32 %s3806_s0, 5  ;;  %s4341_s18 = sld [smem:[#allocation30_spill]] }
  0x37   : > { %s3901_s4 = scalar_lea.vmem %s4273_s20, %s3230_s14 }
  0x39   : > { %s1218_s24 = scalar_lea.vmem %s4340_s5, %s3806_s0 }
  0x3a   : > { %p3162_p7 = scmp.ne.s32.totalorder %s4343_s16, 0 }
  0x3b   : > { %v1231_v0 = vld [vmem:[%s1135_s12] sm:$0xff] (!%p3162_p7)  ;;  %vm1232_vm0 = vcmask (!%p3162_p7), 261120  }
  0x3c   : > { %s1221_s17 = scalar_lea.vmem %s4341_s18, %s3806_s0  ;;  %1230 = sbr.rel (%p3162_p7) target bundleno = 67 (0x43), region = 136  ;;  %1233 = vst.msk [vmem:[#allocation2] sm:$0xff] (!%p3162_p7), %vm1232_vm0, %v1231_v0 }
  0x43 PF: > { %s4344_s14 = sld [smem:[#allocation9_spill]]  ;;  %v3609_v2 = vmov 0.0   ;;  %vm3610_vm1 = vmmov 0   ;;  %v3926_v4 = vld [vmem:[#allocation2] sm:$0xff]  ;;  %vm1260_vm2 = vcmask 261120   ;;  %s4345_s12 = sld [smem:[#allocation16_spill]] }
  0x44   : > { %3289 = vmatprep.subr.bf16.mxu1 %v3609_v2  ;;  %3303 = vmatprep.subr.bf16.mxu0 %v3609_v2  ;;  %v1236_v5 = vpack.c.bf16 %v3926_v4, %v3926_v4  ;;  %s3611_s5 = smov 96   ;;  %s3612_s27 = smov 120   ;;  %vm1316_vm3 = vcmask 64512   ;;  %vm1380_vm4 = vcmask 1043456   ;;  %vm1768_vm5 = vcmask 130048  }
  0x45   : > { %3293 = vmatprep.mubr.msk.bf16.mxu1 %vm3610_vm1, %v3609_v2  ;;  %3305 = vmatprep.mubr.msk.bf16.mxu0 %vm3610_vm1, %v3609_v2  ;;  %s3613_s10 = smov 88   ;;  %s3614_s9 = smov 80   ;;  %vm1770_vm6 = vcmask 195584   ;;  %vm2661_vm7 = vcmask 523264  }
  0x46   : > { %s3615_s3 = smov 112   ;;  %s3616_s25 = smov 72  }
  0x47   : > { %s3617_s6 = smov 104   ;;  %s4347_s23 = sld [smem:[#allocation13_spill]] }
  0x48   : > { %s3619_s16 = smov 64   ;;  %s3620_s18 = smov 40  }
  0x49   : > { %v3511_v1 = vld [vmem:[%s4344_s14] sm:$0xff]   ;;  %v3512_v3 = vld [vmem:[%s4344_s14 + $0x8] sm:$0xff]   ;;  %s4346_s7 = scalar_lea.vmem %s4345_s12, %s3806_s0  ;;  %s3618_s14 = smov 56  }
  0x4a   : > { %3290 = vmatpush3.bf16.msra.mxu1 %v3511_v1  ;;  %v3163_v6 = vld [vmem:[%s4346_s7] ss:$0 sm:$0xff]  ;;  %s3621_s12 = smov 48   ;;  %s4349_s7 = sld [smem:[#allocation10_spill]] }
  0x4b   : > { %3291 = vmatprep.subr.bf16.mxu1 %v3609_v2  ;;  %s3622_s29 = smov 8   ;;  %s3623_s28 = smov 16  }
  0x4d   : > { %s4348_s1 = scalar_lea.vmem %s4347_s23, %s3808_s11  ;;  %s3624_s23 = smov 24  }
  0x4e   : > { %3292 = vmatpush3.bf16.msra.mxu1 %v3512_v3  ;;  %v1304_v26 = vld [vmem:[%s4348_s1] sm:$0xff]  ;;  %s4352_s1 = sld [smem:[#allocation12_spill]] }
  0x4f   : > { %3297 = vmatprep.subr.bf16.mxu1 %v3609_v2 }
  0x51   : > { %3294 = vmatmul.mubr.msk.bf16.vlgmr.msra.gmra.mrb[0].mxu1 %vm1260_vm2, %v1236_v5 }
  0x52   : > { %3299 = vmatprep.mubr.msk.bf16.mxu1 %vm3610_vm1, %v3609_v2 }
 0x124   : > { %v1298_v7 = vpop.f32.mrb[0].mxu1 }
 0x125   : > { %v1299_v8 = vadd.f32 %v3163_v6, %v1298_v7  ;;  %v3295_v9 = vpop.f32.mrb[1].mxu1 }
 0x126   : > { %v1301_v10 = vpop.f32.mrb[2].mxu1 }
 0x127   : > { %v1310_v11 = vmul.f32 0.35355338, %v1299_v8  ;;  %v3942_v12 = vpack.c.bf16 %v1299_v8, %v1299_v8  ;;  %v3296_v13 = vpop.f32.mrb[3].mxu1 }
 0x129   : > { %v1311_v14 = vpack.c.bf16 %v1310_v11, %v1310_v11  ;;  %1314 = vrot.lane.b32.xlu0 %v3942_v12, %s3611_s5 }
 0x12b   : > { %1425 = vrot.lane.b32.xlu1 %v1311_v14, %s3612_s27 }
 0x12d   : > { %1427 = vrot.lane.b32.xlu0 %v3942_v12, %s3613_s10 }
 0x12f   : > { %1537 = vrot.lane.b32.xlu1 %v3942_v12, %s3614_s9 }
 0x131   : > { %1535 = vrot.lane.b32.xlu0 %v1311_v14, %s3615_s3 }
 0x133   : > { %1647 = vrot.lane.b32.xlu1 %v3942_v12, %s3616_s25 }
 0x135   : > { %1645 = vrot.lane.b32.xlu0 %v1311_v14, %s3617_s6 }
 0x19b   : > { %v1315_v15 = vpop.permute.xlu0 %1314 }
 0x19c   : > { %v1321_v16 = vsel %vm1316_vm3, %v1315_v15, 0 }
 0x19d   : > { %3298 = vmatpush3.bf16.xpose.msra.mxu1 %v1321_v16  ;;  %v1426_v18 = vpop.permute.xlu1 %1425 }
 0x19e   : > { %3309 = vmatprep.subr.bf16.mxu1 %v3609_v2 }
 0x19f   : > { %v1428_v17 = vpop.permute.xlu0 %1427 }
 0x1a0   : > { %v1433_v19 = vsel %vm1316_vm3, %v1428_v17, 0 }
 0x1a1   : > { %v1538_v20 = vpop.permute.xlu1 %1537 }
 0x1a2   : > { %v1543_v21 = vsel %vm1316_vm3, %v1538_v20, 0 }
 0x1a3   : > { %v1536_v23 = vpop.permute.xlu0 %1535 }
 0x1a4   : > { %3300 = vmatmul.mubr.msk.bf16.vlgmr.msra.gmra.mrb[4].mxu1 %vm1316_vm3, %v1311_v14 }
 0x1a5   : > { %3310 = vmatpush3.bf16.xpose.msra.mxu1 %v1433_v19  ;;  %3311 = vmatprep.mubr.msk.bf16.mxu1 %vm3610_vm1, %v3609_v2  ;;  %v1648_v22 = vpop.permute.xlu1 %1647 }
 0x1a6   : > { %3321 = vmatprep.subr.bf16.mxu1 %v3609_v2  ;;  %v1653_v24 = vsel %vm1316_vm3, %v1648_v22, 0 }
 0x1a7   : > { %v1646_v25 = vpop.permute.xlu0 %1645 }
 0x1ac   : > { %3312 = vmatmul.mubr.msk.bf16.vlgmr.msra.gmra.mrb[8].mxu1 %vm1316_vm3, %v1426_v18 }
 0x1ad   : > { %3322 = vmatpush3.bf16.xpose.msra.mxu1 %v1543_v21  ;;  %3323 = vmatprep.mubr.msk.bf16.mxu1 %vm3610_vm1, %v3609_v2 }
 0x1ae   : > { %3333 = vmatprep.subr.bf16.mxu1 %v3609_v2 }
 0x1b4   : > { %3324 = vmatmul.mubr.msk.bf16.vlgmr.msra.gmra.mrb[12].mxu1 %vm1316_vm3, %v1536_v23 }
 0x1b5   : > { %3334 = vmatpush3.bf16.xpose.msra.mxu1 %v1653_v24  ;;  %3335 = vmatprep.mubr.msk.bf16.mxu1 %vm3610_vm1, %v3609_v2 }
 0x1b6   : > { %3345 = vmatprep.subr.bf16.mxu1 %v3609_v2 }
 0x1bc   : > { %3336 = vmatmul.mubr.msk.bf16.vlgmr.msra.gmra.mrb[16].mxu1 %vm1316_vm3, %v1646_v25 }
 0x1bd   : > { %3349 = vmatprep.mubr.msk.bf16.mxu1 %vm3610_vm1, %v3609_v2 }
 0x277   : > { %v1357_v27 = vpop.f32.mrb[4].mxu1 }
 0x278   : > { %v1358_v28 = vadd.f32 %v1357_v27, %v1304_v26  ;;  %v3301_v29 = vpop.f32.mrb[5].mxu1 }
 0x279   : > { %v1360_v30 = vpop.f32.mrb[6].mxu1 }
 0x27a   : > { %v3302_v31 = vpop.f32.mrb[7].mxu1  ;;  %v1363_v32 = vsel %vm1316_vm3, %v1358_v28, -inf }
 0x27b   : > { %1364 = vmax.xlane.f32.xlu1 %v1363_v32 }
 0x27f   : > { %v1469_v33 = vpop.f32.mrb[8].mxu1 }
 0x280   : > { %v1470_v34 = vadd.f32 %v1469_v33, %v1304_v26  ;;  %v3313_v35 = vpop.f32.mrb[9].mxu1 }
 0x281   : > { %v1472_v36 = vpop.f32.mrb[10].mxu1 }
 0x282   : > { %v3314_v37 = vpop.f32.mrb[11].mxu1  ;;  %v1475_v38 = vsel %vm1316_vm3, %v1470_v34, -inf }
 0x283   : > { %1476 = vmax.xlane.f32.xlu0 %v1475_v38 }
 0x287   : > { %v1579_v39 = vpop.f32.mrb[12].mxu1 }
 0x288   : > { %v1580_v40 = vadd.f32 %v1579_v39, %v1304_v26  ;;  %v3325_v41 = vpop.f32.mrb[13].mxu1 }
 0x289   : > { %v1582_v42 = vpop.f32.mrb[14].mxu1  ;;  %v3513_v41 = vld [vmem:[%s4349_s7] sm:$0xff]  }
 0x28a   : > { %v3326_v43 = vpop.f32.mrb[15].mxu1  ;;  %v1585_v44 = vsel %vm1316_vm3, %v1580_v40, -inf  ;;  %3346 = vmatpush3.bf16.msra.mxu1 %v3513_v41  ;;  %v3514_v42 = vld [vmem:[%s4349_s7 + $0x8] sm:$0xff]  }
 0x28b   : > { %1586 = vmax.xlane.f32.xlu0 %v1585_v44  ;;  %3347 = vmatprep.subr.bf16.mxu1 %v3609_v2 }
 0x28e   : > { %3348 = vmatpush3.bf16.msra.mxu1 %v3514_v42 }
 0x28f   : > { %v1689_v45 = vpop.f32.mrb[16].mxu1  ;;  %3361 = vmatprep.subr.bf16.mxu1 %v3609_v2 }
 0x290   : > { %v1690_v46 = vadd.f32 %v1689_v45, %v1304_v26  ;;  %v3337_v47 = vpop.f32.mrb[17].mxu1 }
 0x291   : > { %v1692_v48 = vpop.f32.mrb[18].mxu1 }
 0x292   : > { %v3338_v49 = vpop.f32.mrb[19].mxu1  ;;  %v1695_v50 = vsel %vm1316_vm3, %v1690_v46, -inf }
 0x293   : > { %1696 = vmax.xlane.f32.xlu1 %v1695_v50 }
 0x308   : > { %v1365_v51 = vpop.xlane.xlu1 %1364 }
 0x309   : > { %v1366_v52 = vsub.f32 %v1358_v28, %v1365_v51 }
 0x30b   : > { %v1367_v53 = vmul.f32 1.442695, %v1366_v52 }
 0x30d   : > { %3527 = vpow2.f32 %v1367_v53 }
 0x310   : > { %v1477_v54 = vpop.xlane.xlu0 %1476 }
 0x311   : > { %v1478_v55 = vsub.f32 %v1470_v34, %v1477_v54 }
 0x313   : > { %v1479_v56 = vmul.f32 1.442695, %v1478_v55 }
 0x315   : > { %3529 = vpow2.f32 %v1479_v56 }
 0x317   : > { %v3528_v57 = vpop.eup %3527 }
 0x318   : > { %v1587_v58 = vpop.xlane.xlu0 %1586  ;;  %v1369_v59 = vsel %vm1316_vm3, %v3528_v57, 0.0 }
 0x319   : > { %v1588_v60 = vsub.f32 %v1580_v40, %v1587_v58  ;;  %1370 = vadd.xlane.f32.xlu0 %v1369_v59 }
 0x31b   : > { %v1589_v61 = vmul.f32 1.442695, %v1588_v60 }
 0x31d   : > { %3531 = vpow2.f32 %v1589_v61 }
 0x31f   : > { %v3530_v62 = vpop.eup %3529 }
 0x320   : > { %v1481_v63 = vsel %vm1316_vm3, %v3530_v62, 0.0  ;;  %v1697_v3 = vpop.xlane.xlu1 %1696 }
 0x321   : > { %1482 = vadd.xlane.f32.xlu1 %v1481_v63  ;;  %v1698_v5 = vsub.f32 %v1690_v46, %v1697_v3 }
 0x323   : > { %v1699_v6 = vmul.f32 1.442695, %v1698_v5 }
 0x325   : > { %3533 = vpow2.f32 %v1699_v6 }
 0x327   : > { %v3532_v0 = vpop.eup %3531 }
 0x328   : > { %v1591_v1 = vsel %vm1316_vm3, %v3532_v0, 0.0 }
 0x329   : > { %1592 = vadd.xlane.f32.xlu0 %v1591_v1 }
 0x32f   : > { %v3534_v7 = vpop.eup %3533 }
 0x330   : > { %v1701_v8 = vsel %vm1316_vm3, %v3534_v7, 0.0 }
 0x332   : > { %1487 = vrot.lane.b32.xlu1 %v3942_v12, %s3618_s14  ;;  %s4353_s14 = scalar_lea.vmem %s4352_s1, %s3808_s11 }
 0x33f   : > { %1375 = vrot.lane.b32.xlu0 %v3942_v12, %s3619_s16  ;;  %s4350_s16 = sld [smem:[#allocation18_spill]] }
 0x343   : > { %1707 = vrot.lane.b32.xlu0 %v3942_v12, %s3620_s18 }
 0x345   : > { %s4351_s18 = scalar_lea.vmem %s4350_s16, %s3806_s0  ;;  %s4358_s16 = scalar_lea.vmem %s4266_s13, %s3806_s0 }
 0x346   : > { %v3175_v58 = vld [vmem:[%s4351_s18] ss:$0 sm:$0xff]  ;;  %s4354_s18 = sld [smem:[#allocation19_spill]] }
 0x356   : > { %1702 = vadd.xlane.f32.xlu1 %v1701_v8 }
 0x367   : > { %1597 = vrot.lane.b32.xlu1 %v3942_v12, %s3621_s12  ;;  %s4355_s12 = scalar_lea.vmem %s4354_s18, %s3806_s0 }
 0x3a6   : > { %v1371_v9 = vpop.xlane.xlu0 %1370 }
 0x3a7   : > { %3535 = vrcp.f32 %v1371_v9  ;;  %v3515_v9 = vld [vmem:[%s3865_s8] sm:$0xff]  }
 0x3ae   : > { %v1483_v10 = vpop.xlane.xlu1 %1482 }
 0x3af   : > { %3537 = vrcp.f32 %v1483_v10  ;;  %v3516_v10 = vld [vmem:[%s3865_s8 + $0x8] sm:$0xff]  }
 0x3b1   : > { %v3536_v11 = vpop.eup %3535 }
 0x3b2   : > { %v1373_v14 = vmul.f32 %v3536_v11, %v3528_v57  ;;  %v1488_v17 = vpop.permute.xlu1 %1487 }
 0x3b3   : > { %v1493_v20 = vsel %vm1380_vm4, %v1488_v17, 0 }
 0x3b4   : > { %v1374_v18 = vpack.c.bf16 %v1373_v14, %v1373_v14  ;;  %v3518_v14 = vld [vmem:[%s3856_s30 + $0x8] sm:$0xff]  }
 0x3b6   : > { %v1593_v13 = vpop.xlane.xlu0 %1592 }
 0x3b7   : > { %3539 = vrcp.f32 %v1593_v13  ;;  %v3517_v13 = vld [vmem:[%s3856_s30] sm:$0xff]  }
 0x3b9   : > { %v3538_v19 = vpop.eup %3537 }
 0x3ba   : > { %v1376_v15 = vpop.permute.xlu0 %1375  ;;  %v1485_v12 = vmul.f32 %v3538_v19, %v3530_v62  ;;  %v3179_v19 = vld [vmem:[%s4355_s12] ss:$0 sm:$0xff]  ;;  %s4359_s12 = sld [smem:[#allocation22_spill]] }
 0x3bb   : > { %v1382_v16 = vsel %vm1380_vm4, %v1376_v15, 0 }
 0x3bc   : > { %3304 = vmatpush3.bf16.msra.mxu0 %v1382_v16  ;;  %v1486_v21 = vpack.c.bf16 %v1485_v12, %v1485_v12 }
 0x3bd   : > { %3315 = vmatprep.subr.bf16.mxu0 %v3609_v2 }
 0x3be   : > { %v1708_v27 = vpop.permute.xlu0 %1707 }
 0x3bf   : > { %3306 = vmatmul.mubr.msk.bf16.vlgmr.msra.gmra.mrb[0].mxu0 %vm1316_vm3, %v1374_v18  ;;  %v1713_v29 = vsel %vm1380_vm4, %v1708_v27, 0 }
 0x3c0   : > { %3316 = vmatpush3.bf16.msra.mxu0 %v1493_v20  ;;  %3317 = vmatprep.mubr.msk.bf16.mxu0 %vm3610_vm1, %v3609_v2  ;;  %s4360_s7 = scalar_lea.vmem %s4359_s12, %s3806_s0 }
 0x3c1   : > { %3327 = vmatprep.subr.bf16.mxu0 %v3609_v2  ;;  %v3540_v22 = vpop.eup %3539 }
 0x3c2   : > { %v1595_v24 = vmul.f32 %v3540_v22, %v3532_v0 }
 0x3c4   : > { %v1596_v28 = vpack.c.bf16 %v1595_v24, %v1595_v24  ;;  %v3185_v24 = vld [vmem:[%s4358_s16] ss:$0 sm:$0xff] }
 0x3c7   : > { %3318 = vmatmul.mubr.msk.bf16.vlgmr.msra.gmra.mrb[4].mxu0 %vm1316_vm3, %v1486_v21 }
 0x3c8   : > { %3329 = vmatprep.mubr.msk.bf16.mxu0 %vm3610_vm1, %v3609_v2 }
 0x3e3   : > { %v1703_v23 = vpop.xlane.xlu1 %1702 }
 0x3e4   : > { %3541 = vrcp.f32 %v1703_v23 }
 0x3e7   : > { %v1598_v25 = vpop.permute.xlu1 %1597 }
 0x3e8   : > { %v1603_v26 = vsel %vm1380_vm4, %v1598_v25, 0 }
 0x3e9   : > { %3328 = vmatpush3.bf16.msra.mxu0 %v1603_v26 }
 0x3ea   : > { %3339 = vmatprep.subr.bf16.mxu0 %v3609_v2 }
 0x3ec   : > { %3330 = vmatmul.mubr.msk.bf16.vlgmr.msra.gmra.mrb[8].mxu0 %vm1316_vm3, %v1596_v28 }
 0x3ed   : > { %3340 = vmatpush3.bf16.msra.mxu0 %v1713_v29  ;;  %3341 = vmatprep.mubr.msk.bf16.mxu0 %vm3610_vm1, %v3609_v2 }
 0x3ee   : > { %v3542_v30 = vpop.eup %3541  ;;  %3353 = vmatprep.subr.bf16.mxu0 %v3609_v2 }
 0x3ef   : > { %v1705_v31 = vmul.f32 %v3542_v30, %v3534_v7 }
 0x3f1   : > { %v1706_v32 = vpack.c.bf16 %v1705_v31, %v1705_v31 }
 0x3f4   : > { %3342 = vmatmul.mubr.msk.bf16.vlgmr.msra.gmra.mrb[12].mxu0 %vm1316_vm3, %v1706_v32  ;;  %v3181_v32 = vld [vmem:[%s4360_s7] ss:$0 sm:$0xff] }
 0x3f5   : > { %3357 = vmatprep.mubr.msk.bf16.mxu0 %vm3610_vm1, %v3609_v2  ;;  %3354 = vmatpush3.bf16.msra.mxu0 %v3517_v13 }
 0x3f6   : > { %3355 = vmatprep.subr.bf16.mxu0 %v3609_v2 }
 0x3f9   : > { %3356 = vmatpush3.bf16.msra.mxu0 %v3518_v14 }
 0x3fa   : > { %3369 = vmatprep.subr.bf16.mxu0 %v3609_v2 }
 0x492   : > { %v1418_v33 = vpop.f32.mrb[0].mxu0 }
 0x493   : > { %v3307_v34 = vpop.f32.mrb[1].mxu0 }
 0x494   : > { %v1421_v35 = vpop.f32.mrb[2].mxu0 }
 0x495   : > { %v3308_v36 = vpop.f32.mrb[3].mxu0 }
 0x49a   : > { %v1529_v37 = vpop.f32.mrb[4].mxu0 }
 0x49b   : > { %1756 = vrot.lane.b32.xlu1 %v1529_v37, %s3622_s29  ;;  %v3319_v38 = vpop.f32.mrb[5].mxu0 }
 0x49c   : > { %v1532_v39 = vpop.f32.mrb[6].mxu0 }
 0x49d   : > { %v3320_v40 = vpop.f32.mrb[7].mxu0 }
 0x4bf   : > { %v1639_v43 = vpop.f32.mrb[8].mxu0 }
 0x4c0   : > { %1760 = vrot.lane.b32.xlu0 %v1639_v43, %s3623_s28  ;;  %v3331_v44 = vpop.f32.mrb[9].mxu0 }
 0x4c1   : > { %v1642_v45 = vpop.f32.mrb[10].mxu0 }
 0x4c2   : > { %v3332_v46 = vpop.f32.mrb[11].mxu0 }
 0x4c7   : > { %v1749_v47 = vpop.f32.mrb[12].mxu0 }
 0x4c8   : > { %1764 = vrot.lane.b32.xlu1 %v1749_v47, %s3624_s23  ;;  %v3343_v48 = vpop.f32.mrb[13].mxu0 }
 0x4c9   : > { %v1752_v49 = vpop.f32.mrb[14].mxu0 }
 0x4ca   : > { %v3344_v50 = vpop.f32.mrb[15].mxu0 }
 0x50d   : > { %v1757_v51 = vpop.permute.xlu1 %1756 }
 0x50e   : > { %v1767_v53 = vsel %vm1316_vm3, %v1418_v33, %v1757_v51 }
 0x532   : > { %v1761_v52 = vpop.permute.xlu0 %1760 }
 0x533   : > { %v1769_v54 = vsel %vm1768_vm5, %v1767_v53, %v1761_v52 }
 0x53a   : > { %v1765_v55 = vpop.permute.xlu1 %1764 }
 0x53b   : > { %v1771_v56 = vsel %vm1770_vm6, %v1769_v54, %v1765_v55 }
 0x53c   : > { %v1772_v57 = vpack.c.bf16 %v1771_v56, %v1771_v56 }
 0x53e   : > { %3350 = vmatmul.mubr.msk.bf16.vlgmr.msra.gmra.mrb[20].mxu1 %vm1260_vm2, %v1772_v57 }
 0x53f   : > { %3365 = vmatprep.mubr.msk.bf16.mxu1 %vm3610_vm1, %v3609_v2  ;;  %3362 = vmatpush3.bf16.msra.mxu1 %v3515_v9 }
 0x540   : > { %3363 = vmatprep.subr.bf16.mxu1 %v3609_v2 }
 0x543   : > { %3364 = vmatpush3.bf16.msra.mxu1 %v3516_v10 }
 0x544   : > { %3375 = vmatprep.subr.bf16.mxu1 %v3609_v2 }
 0x611   : > { %v1828_v59 = vpop.f32.mrb[20].mxu1 }
 0x612   : > { %v1829_v60 = vadd.f32 %v3175_v58, %v1828_v59  ;;  %v3351_v61 = vpop.f32.mrb[21].mxu1 }
 0x613   : > { %v1831_v62 = vpop.f32.mrb[22].mxu1 }
 0x614   : > { %v3352_v63 = vpop.f32.mrb[23].mxu1  ;;  %v1834_v0 = vadd.f32 %v1829_v60, %v3926_v4  ;;  %v1235_v4 = vld [vmem:[%s4353_s14] sm:$0xff]  ;;  %s4356_s14 = sld [smem:[#allocation20_spill]] }
 0x615   : > { %v1932_v11 = vpack.c.bf16 %v1235_v4, %v1235_v4 }
 0x616   : > { %v1837_v1 = vsel %vm1260_vm2, %v1834_v0, 0.0 }
 0x617   : > { %1838 = vadd.xlane.f32.xlu0 %v1837_v1  ;;  %3366 = vmatmul.mubr.msk.bf16.vlgmr.msra.gmra.mrb[24].mxu1 %vm1260_vm2, %v1932_v11 }
 0x618   : > { %3377 = vmatprep.mubr.msk.bf16.mxu1 %vm3610_vm1, %v3609_v2 }
 0x61a   : > { %s4357_s19 = scalar_lea.vmem %s4356_s14, %s3806_s0  ;;  %s4366_s14 = sld [smem:[#allocation26_spill]] }
 0x61b   : > { %v3180_v12 = vld [vmem:[%s4357_s19] ss:$0 sm:$0xff]  ;;  %s4368_s19 = sld [smem:[#allocation28_spill]] }
 0x620   : > { %s4367_s30 = scalar_lea.vmem %s4366_s14, %s3806_s0 }
 0x621   : > { %s4369_s18 = scalar_lea.vmem %s4368_s19, %s3806_s0 }
 0x6a4   : > { %v1839_v3 = vpop.xlane.xlu0 %1838 }
 0x6a5   : > { %v1841_v5 = vmul.f32 0.03125, %v1839_v3 }
 0x6a7   : > { %v1842_v6 = vsub.f32 %v1834_v0, %v1841_v5 }
 0x6a9   : > { %v1843_v7 = vmul.f32 %v1842_v6, %v1842_v6 }
 0x6ab   : > { %v1844_v8 = vsel %vm1260_vm2, %v1843_v7, 0.0 }
 0x6ac   : > { %1845 = vadd.xlane.f32.xlu1 %v1844_v8 }
 0x6ea   : > { %v1993_v25 = vpop.f32.mrb[24].mxu1 }
 0x6eb   : > { %v1994_v26 = vadd.f32 %v3185_v24, %v1993_v25  ;;  %v3367_v27 = vpop.f32.mrb[25].mxu1 }
 0x6ec   : > { %v1996_v28 = vpop.f32.mrb[26].mxu1 }
 0x6ed   : > { %v4071_v29 = vpack.c.bf16 %v1994_v26, %v1994_v26  ;;  %v3368_v30 = vpop.f32.mrb[27].mxu1 }
 0x6ef   : > { %2118 = vrot.lane.b32.xlu0 %v4071_v29, %s3612_s27  ;;  %v2012_v31 = vsel %vm1316_vm3, %v4071_v29, 0 }
 0x6f3   : > { %2228 = vrot.lane.b32.xlu0 %v4071_v29, %s3615_s3 }
 0x6f7   : > { %2338 = vrot.lane.b32.xlu0 %v4071_v29, %s3617_s6 }
 0x739   : > { %v1846_v15 = vpop.xlane.xlu1 %1845 }
 0x73a   : > { %v1847_v16 = vmul.f32 0.03125, %v1846_v15 }
 0x73c   : > { %v1848_v17 = vadd.f32 1e-05, %v1847_v16 }
 0x73e   : > { %3543 = vrsqrt.f32 %v1848_v17 }
 0x748   : > { %v3544_v18 = vpop.eup %3543 }
 0x749   : > { %v1850_v20 = vmul.f32 %v3544_v18, %v1842_v6 }
 0x74b   : > { %v1857_v21 = vmul.f32 %v3179_v19, %v1850_v20 }
 0x74d   : > { %v4059_v22 = vadd.f32 %v3180_v12, %v1857_v21 }
 0x74f   : > { %v1865_v23 = vpack.c.bf16 %v4059_v22, %v4059_v22 }
 0x751   : > { %3358 = vmatmul.mubr.msk.bf16.vlgmr.msra.gmra.mrb[16].mxu0 %vm1260_vm2, %v1865_v23 }
 0x752   : > { %3371 = vmatprep.mubr.msk.bf16.mxu0 %vm3610_vm1, %v3609_v2  ;;  %3370 = vmatpush3.bf16.xpose.msra.mxu0 %v2012_v31 }
 0x753   : > { %3381 = vmatprep.subr.bf16.mxu0 %v3609_v2 }
 0x761   : > { %v2119_v39 = vpop.permute.xlu0 %2118 }
 0x762   : > { %v2124_v41 = vsel %vm1316_vm3, %v2119_v39, 0 }
 0x765   : > { %v2229_v42 = vpop.permute.xlu0 %2228 }
 0x766   : > { %v2234_v44 = vsel %vm1316_vm3, %v2229_v42, 0 }
 0x769   : > { %v2339_v45 = vpop.permute.xlu0 %2338 }
 0x76a   : > { %v2344_v47 = vsel %vm1316_vm3, %v2339_v45, 0 }
 0x824   : > { %v1926_v33 = vpop.f32.mrb[16].mxu0 }
 0x825   : > { %v1927_v34 = vadd.f32 %v3181_v32, %v1926_v33  ;;  %v3359_v35 = vpop.f32.mrb[17].mxu0 }
 0x826   : > { %v1929_v36 = vpop.f32.mrb[18].mxu0 }
 0x827   : > { %v2005_v37 = vmul.f32 0.35355338, %v1927_v34  ;;  %v3360_v38 = vpop.f32.mrb[19].mxu0 }
 0x829   : > { %v2006_v40 = vpack.c.bf16 %v2005_v37, %v2005_v37 }
 0x82b   : > { %2116 = vrot.lane.b32.xlu1 %v2006_v40, %s3612_s27  ;;  %3372 = vmatmul.mubr.msk.bf16.vlgmr.msra.gmra.mrb[20].mxu0 %vm1316_vm3, %v2006_v40 }
 0x82c   : > { %3382 = vmatpush3.bf16.xpose.msra.mxu0 %v2124_v41  ;;  %3383 = vmatprep.mubr.msk.bf16.mxu0 %vm3610_vm1, %v3609_v2 }
 0x82d   : > { %3393 = vmatprep.subr.bf16.mxu0 %v3609_v2 }
 0x82f   : > { %2226 = vrot.lane.b32.xlu1 %v2006_v40, %s3615_s3 }
 0x833   : > { %2336 = vrot.lane.b32.xlu1 %v2006_v40, %s3617_s6  ;;  %s4361_s6 = sld [smem:[#allocation14_spill]] }
 0x839   : > { %s4362_s1 = scalar_lea.vmem %s4361_s6, %s3808_s11 }
 0x83a   : > { %v1999_v49 = vld [vmem:[%s4362_s1] sm:$0xff] }
 0x89d   : > { %v2117_v43 = vpop.permute.xlu1 %2116 }
 0x89e   : > { %3384 = vmatmul.mubr.msk.bf16.vlgmr.msra.gmra.mrb[24].mxu0 %vm1316_vm3, %v2117_v43 }
 0x89f   : > { %3394 = vmatpush3.bf16.xpose.msra.mxu0 %v2234_v44  ;;  %3395 = vmatprep.mubr.msk.bf16.mxu0 %vm3610_vm1, %v3609_v2 }
 0x8a0   : > { %3405 = vmatprep.subr.bf16.mxu0 %v3609_v2 }
 0x8a1   : > { %v2227_v46 = vpop.permute.xlu1 %2226 }
 0x8a5   : > { %v2337_v48 = vpop.permute.xlu1 %2336 }
 0x8a6   : > { %3396 = vmatmul.mubr.msk.bf16.vlgmr.msra.gmra.mrb[28].mxu0 %vm1316_vm3, %v2227_v46 }
 0x8a7   : > { %3406 = vmatpush3.bf16.xpose.msra.mxu0 %v2344_v47  ;;  %3407 = vmatprep.mubr.msk.bf16.mxu0 %vm3610_vm1, %v3609_v2 }
 0x8a8   : > { %3417 = vmatprep.subr.bf16.mxu0 %v3609_v2 }
 0x8ae   : > { %3408 = vmatmul.mubr.msk.bf16.vlgmr.msra.gmra.mrb[32].mxu0 %vm1316_vm3, %v2337_v48 }
 0x8af   : > { %3421 = vmatprep.mubr.msk.bf16.mxu0 %vm3610_vm1, %v3609_v2 }
 0x8fe   : > { %v2048_v50 = vpop.f32.mrb[20].mxu0 }
 0x8ff   : > { %v2049_v51 = vadd.f32 %v2048_v50, %v1999_v49  ;;  %v3373_v52 = vpop.f32.mrb[21].mxu0 }
 0x900   : > { %v2051_v53 = vpop.f32.mrb[22].mxu0 }
 0x901   : > { %v3374_v54 = vpop.f32.mrb[23].mxu0  ;;  %v2054_v55 = vsel %vm1316_vm3, %v2049_v51, -inf }
 0x902   : > { %2055 = vmax.xlane.f32.xlu0 %v2054_v55 }
 0x971   : > { %v2160_v56 = vpop.f32.mrb[24].mxu0 }
 0x972   : > { %v2161_v57 = vadd.f32 %v2160_v56, %v1999_v49  ;;  %v3385_v58 = vpop.f32.mrb[25].mxu0 }
 0x973   : > { %v2163_v59 = vpop.f32.mrb[26].mxu0 }
 0x974   : > { %v3386_v60 = vpop.f32.mrb[27].mxu0  ;;  %v2166_v61 = vsel %vm1316_vm3, %v2161_v57, -inf }
 0x975   : > { %2167 = vmax.xlane.f32.xlu1 %v2166_v61  ;;  %v3519_v60 = vld [vmem:[%s3874_s22] sm:$0xff]  }
 0x976   : > { %3418 = vmatpush3.bf16.msra.mxu0 %v3519_v60 }
 0x977   : > { %3419 = vmatprep.subr.bf16.mxu0 %v3609_v2 }
 0x979   : > { %v2270_v62 = vpop.f32.mrb[28].mxu0 }
 0x97a   : > { %v2271_v63 = vadd.f32 %v2270_v62, %v1999_v49  ;;  %v3397_v0 = vpop.f32.mrb[29].mxu0 }
 0x97b   : > { %v2273_v1 = vpop.f32.mrb[30].mxu0 }
 0x97c   : > { %v3398_v3 = vpop.f32.mrb[31].mxu0  ;;  %v2276_v5 = vsel %vm1316_vm3, %v2271_v63, -inf  ;;  %v3520_v1 = vld [vmem:[%s3874_s22 + $0x8] sm:$0xff]   ;;  %s4372_s22 = sld [smem:[#allocation3_spill]] }
 0x97d   : > { %2277 = vmax.xlane.f32.xlu0 %v2276_v5  ;;  %3420 = vmatpush3.bf16.msra.mxu0 %v3520_v1 }
 0x97e   : > { %3433 = vmatprep.subr.bf16.mxu0 %v3609_v2 }
 0x981   : > { %v2380_v6 = vpop.f32.mrb[32].mxu0 }
 0x982   : > { %v2381_v7 = vadd.f32 %v2380_v6, %v1999_v49  ;;  %v3409_v8 = vpop.f32.mrb[33].mxu0  ;;  %p3215_p8 = scmp.ne.s32.totalorder %s4372_s22, 1 }
 0x983   : > { %v2383_v9 = vpop.f32.mrb[34].mxu0  ;;  %vm3626_vm8 = vmmov (!%p3215_p8), 0   ;;  %s4376_s8 = sld [smem:[#allocation34_spill]] (!%p3215_p8) }
 0x984   : > { %v3410_v10 = vpop.f32.mrb[35].mxu0  ;;  %v2386_v4 = vsel %vm1316_vm3, %v2381_v7, -inf }
 0x985   : > { %2387 = vmax.xlane.f32.xlu0 %v2386_v4 }
 0x98f   : > { %v2056_v11 = vpop.xlane.xlu0 %2055 }
 0x990   : > { %v2057_v13 = vsub.f32 %v2049_v51, %v2056_v11 }
 0x992   : > { %v2058_v14 = vmul.f32 1.442695, %v2057_v13 }
 0x994   : > { %3545 = vpow2.f32 %v2058_v14 }
 0x99e   : > { %v3546_v15 = vpop.eup %3545 }
 0x99f   : > { %v2060_v16 = vsel %vm1316_vm3, %v3546_v15, 0.0 }
 0x9a0   : > { %2061 = vadd.xlane.f32.xlu1 %v2060_v16 }
 0x9b1   : > { %2067 = vrot.lane.b32.xlu1 %v4071_v29, %s3611_s5 }
 0xa02   : > { %v2168_v17 = vpop.xlane.xlu1 %2167 }
 0xa03   : > { %v2169_v18 = vsub.f32 %v2161_v57, %v2168_v17 }
 0xa05   : > { %v2170_v19 = vmul.f32 1.442695, %v2169_v18 }
 0xa07   : > { %3547 = vpow2.f32 %v2170_v19 }
 0xa0a   : > { %v2278_v20 = vpop.xlane.xlu0 %2277 }
 0xa0b   : > { %v2279_v12 = vsub.f32 %v2271_v63, %v2278_v20 }
 0xa0d   : > { %v2280_v21 = vmul.f32 1.442695, %v2279_v12 }
 0xa0f   : > { %3549 = vpow2.f32 %v2280_v21 }
 0xa11   : > { %v3548_v23 = vpop.eup %3547 }
 0xa12   : > { %v2388_v24 = vpop.xlane.xlu0 %2387  ;;  %v2172_v25 = vsel %vm1316_vm3, %v3548_v23, 0.0 }
 0xa13   : > { %v2389_v26 = vsub.f32 %v2381_v7, %v2388_v24  ;;  %2173 = vadd.xlane.f32.xlu0 %v2172_v25 }
 0xa15   : > { %v2390_v27 = vmul.f32 1.442695, %v2389_v26 }
 0xa17   : > { %3551 = vpow2.f32 %v2390_v27 }
 0xa19   : > { %v3550_v28 = vpop.eup %3549 }
 0xa1a   : > { %v2282_v30 = vsel %vm1316_vm3, %v3550_v28, 0.0 }
 0xa1b   : > { %2283 = vadd.xlane.f32.xlu1 %v2282_v30 }
 0xa21   : > { %v3552_v31 = vpop.eup %3551 }
 0xa22   : > { %v2392_v32 = vsel %vm1316_vm3, %v3552_v31, 0.0 }
 0xa23   : > { %2393 = vadd.xlane.f32.xlu0 %v2392_v32 }
 0xa2c   : > { %2288 = vrot.lane.b32.xlu1 %v4071_v29, %s3614_s9 }
 0xa2d   : > { %v2062_v33 = vpop.xlane.xlu1 %2061 }
 0xa2e   : > { %3553 = vrcp.f32 %v2062_v33  ;;  %v3521_v33 = vld [vmem:[%s3891_s2] sm:$0xff]  }
 0xa30   : > { %2398 = vrot.lane.b32.xlu1 %v4071_v29, %s3616_s25  ;;  %s4364_s25 = sld [smem:[#allocation25_spill]] }
 0xa31   : > { %v2068_v34 = vpop.permute.xlu1 %2067 }
 0xa32   : > { %v2073_v35 = vsel %vm1380_vm4, %v2068_v34, 0  ;;  %v3522_v34 = vld [vmem:[%s3891_s2 + $0x8] sm:$0xff]  }
 0xa33   : > { %3376 = vmatpush3.bf16.msra.mxu1 %v2073_v35  ;;  %v3524_v35 = vld [vmem:[%s3901_s4 + $0x8] sm:$0xff]  }
 0xa34   : > { %3387 = vmatprep.subr.bf16.mxu1 %v3609_v2 }
 0xa38   : > { %v3554_v36 = vpop.eup %3553 }
 0xa39   : > { %v2064_v37 = vmul.f32 %v3554_v36, %v3546_v15  ;;  %2178 = vrot.lane.b32.xlu0 %v4071_v29, %s3613_s10  ;;  %s4363_s10 = scalar_lea.vmem %s4268_s15, %s3806_s0 }
 0xa3a   : > { %v3197_v19 = vld [vmem:[%s4363_s10] ss:$0 sm:$0xff] }
 0xa3b   : > { %v2065_v38 = vpack.c.bf16 %v2064_v37, %v2064_v37 }
 0xa3d   : > { %3378 = vmatmul.mubr.msk.bf16.vlgmr.msra.gmra.mrb[28].mxu1 %vm1316_vm3, %v2065_v38 }
 0xa3e   : > { %3389 = vmatprep.mubr.msk.bf16.mxu1 %vm3610_vm1, %v3609_v2 }
 0xaa0   : > { %v2174_v39 = vpop.xlane.xlu0 %2173 }
 0xaa1   : > { %3555 = vrcp.f32 %v2174_v39 }
 0xaa8   : > { %v2284_v40 = vpop.xlane.xlu1 %2283 }
 0xaa9   : > { %3557 = vrcp.f32 %v2284_v40 }
 0xaab   : > { %v3556_v41 = vpop.eup %3555 }
 0xaac   : > { %v2176_v43 = vmul.f32 %v3556_v41, %v3548_v23  ;;  %v2289_v46 = vpop.permute.xlu1 %2288 }
 0xaad   : > { %v2294_v48 = vsel %vm1380_vm4, %v2289_v46, 0  ;;  %v3525_v46 = vld [vmem:[%s3901_s4 + $0x10] sm:$0xff]  }
 0xaae   : > { %v2177_v29 = vpack.c.bf16 %v2176_v43, %v2176_v43 }
 0xab0   : > { %v2394_v42 = vpop.xlane.xlu0 %2393  ;;  %v2399_v50 = vpop.permute.xlu1 %2398 }
 0xab1   : > { %3559 = vrcp.f32 %v2394_v42  ;;  %v2404_v53 = vsel %vm1380_vm4, %v2399_v50, 0  ;;  %v3202_v42 = vld [vmem:[%s4367_s30] ss:$0 sm:$0xff] }
 0xab3   : > { %v3558_v47 = vpop.eup %3557 }
 0xab4   : > { %v2179_v44 = vpop.permute.xlu0 %2178  ;;  %v2286_v49 = vmul.f32 %v3558_v47, %v3550_v28  ;;  %v3203_v47 = vld [vmem:[%s4369_s18] ss:$0 sm:$0xff]  ;;  %s4377_s18 = sld [smem:[#allocation35_spill]] (!%p3215_p8) }
 0xab5   : > { %v2184_v45 = vsel %vm1380_vm4, %v2179_v44, 0 }
 0xab6   : > { %3388 = vmatpush3.bf16.msra.mxu1 %v2184_v45  ;;  %v2287_v51 = vpack.c.bf16 %v2286_v49, %v2286_v49 }
 0xab7   : > { %3399 = vmatprep.subr.bf16.mxu1 %v3609_v2 }
 0xab9   : > { %3390 = vmatmul.mubr.msk.bf16.vlgmr.msra.gmra.mrb[32].mxu1 %vm1316_vm3, %v2177_v29  ;;  %v3526_v29 = vld [vmem:[%s3901_s4 + $0x18] sm:$0xff]  }
 0xaba   : > { %3400 = vmatpush3.bf16.msra.mxu1 %v2294_v48  ;;  %3401 = vmatprep.mubr.msk.bf16.mxu1 %vm3610_vm1, %v3609_v2  ;;  %s4378_s12 = scalar_lea.vmem (!%p3215_p8), %s4377_s18, %s3808_s11 }
 0xabb   : > { %3411 = vmatprep.subr.bf16.mxu1 %v3609_v2  ;;  %v3560_v52 = vpop.eup %3559 }
 0xabc   : > { %v2396_v54 = vmul.f32 %v3560_v52, %v3552_v31 }
 0xabe   : > { %v2397_v55 = vpack.c.bf16 %v2396_v54, %v2396_v54 }
 0xac1   : > { %3402 = vmatmul.mubr.msk.bf16.vlgmr.msra.gmra.mrb[36].mxu1 %vm1316_vm3, %v2287_v51 }
 0xac2   : > { %3412 = vmatpush3.bf16.msra.mxu1 %v2404_v53  ;;  %3413 = vmatprep.mubr.msk.bf16.mxu1 %vm3610_vm1, %v3609_v2 }
 0xac3   : > { %3425 = vmatprep.subr.bf16.mxu1 %v3609_v2 }
 0xac9   : > { %3414 = vmatmul.mubr.msk.bf16.vlgmr.msra.gmra.mrb[40].mxu1 %vm1316_vm3, %v2397_v55 }
 0xaca   : > { %3429 = vmatprep.mubr.msk.bf16.mxu1 %vm3610_vm1, %v3609_v2  ;;  %3426 = vmatpush3.bf16.msra.mxu1 %v3521_v33 }
 0xacb   : > { %3427 = vmatprep.subr.bf16.mxu1 %v3609_v2 }
 0xace   : > { %3428 = vmatpush3.bf16.msra.mxu1 %v3522_v34  ;;  %v3218_v34 = vld [vmem:[%s4376_s8] ss:$0 sm:$0xff] (!%p3215_p8) }
 0xb10   : > { %v2109_v56 = vpop.f32.mrb[28].mxu1 }
 0xb11   : > { %v3379_v57 = vpop.f32.mrb[29].mxu1 }
 0xb12   : > { %v2112_v58 = vpop.f32.mrb[30].mxu1 }
 0xb13   : > { %v3380_v59 = vpop.f32.mrb[31].mxu1 }
 0xb8c   : > { %v2220_v61 = vpop.f32.mrb[32].mxu1 }
 0xb8d   : > { %2447 = vrot.lane.b32.xlu0 %v2220_v61, %s3622_s29  ;;  %v3391_v62 = vpop.f32.mrb[33].mxu1  ;;  %s4365_s29 = scalar_lea.vmem %s4364_s25, %s3806_s0  ;;  %s4374_s25 = sld [smem:[#allocation31_spill]] (!%p3215_p8) }
 0xb8e   : > { %v2223_v63 = vpop.f32.mrb[34].mxu1  ;;  %v3201_v40 = vld [vmem:[%s4365_s29] ss:$0 sm:$0xff] }
 0xb8f   : > { %v3392_v0 = vpop.f32.mrb[35].mxu1 }
 0xb94   : > { %v2330_v3 = vpop.f32.mrb[36].mxu1 }
 0xb95   : > { %2451 = vrot.lane.b32.xlu1 %v2330_v3, %s3623_s28  ;;  %v3403_v5 = vpop.f32.mrb[37].mxu1 }
 0xb96   : > { %v2333_v6 = vpop.f32.mrb[38].mxu1 }
 0xb97   : > { %v3404_v7 = vpop.f32.mrb[39].mxu1 }
 0xb9c   : > { %v2440_v8 = vpop.f32.mrb[40].mxu1 }
 0xb9d   : > { %2455 = vrot.lane.b32.xlu0 %v2440_v8, %s3624_s23  ;;  %v3415_v9 = vpop.f32.mrb[41].mxu1  ;;  %s4375_s23 = sld [smem:[#allocation32_spill]] (!%p3215_p8) }
 0xb9e   : > { %v2443_v10 = vpop.f32.mrb[42].mxu1  ;;  %v3213_v9 = vld [vmem:[%s1218_s24] ss:$0 sm:$0xff] }
 0xb9f   : > { %v3416_v4 = vpop.f32.mrb[43].mxu1 }
 0xba0   : > { %v3214_v4 = vld [vmem:[%s1221_s17] ss:$0 sm:$0xff]  ;;  %s4373_s17 = sld [smem:[#allocation33_spill]] (!%p3215_p8) }
 0xbff   : > { %v2448_v11 = vpop.permute.xlu0 %2447 }
 0xc00   : > { %v2458_v14 = vsel %vm1316_vm3, %v2109_v56, %v2448_v11 }
 0xc07   : > { %v2452_v13 = vpop.permute.xlu1 %2451 }
 0xc08   : > { %v2459_v15 = vsel %vm1768_vm5, %v2458_v14, %v2452_v13 }
 0xc0f   : > { %v2456_v16 = vpop.permute.xlu0 %2455 }
 0xc10   : > { %v2460_v17 = vsel %vm1770_vm6, %v2459_v15, %v2456_v16 }
 0xc11   : > { %v2461_v18 = vpack.c.bf16 %v2460_v17, %v2460_v17 }
 0xc13   : > { %3422 = vmatmul.mubr.msk.bf16.vlgmr.msra.gmra.mrb[36].mxu0 %vm1260_vm2, %v2461_v18 }
 0xc14   : > { %3441 = vmatprep.mubr.msk.bf16.mxu0 %vm3610_vm1, %v3609_v2 }
 0xce6   : > { %v2517_v20 = vpop.f32.mrb[36].mxu0 }
 0xce7   : > { %v2518_v12 = vadd.f32 %v3197_v19, %v2517_v20  ;;  %v3423_v21 = vpop.f32.mrb[37].mxu0  ;;  %v3565_v20 = vld [vmem:[%s4373_s17] sm:$0xff] (!%p3215_p8)  }
 0xce8   : > { %v2520_v23 = vpop.f32.mrb[38].mxu0  ;;  %v3566_v21 = vld [vmem:[%s4373_s17 + $0x8] sm:$0xff] (!%p3215_p8)  }
 0xce9   : > { %v3424_v24 = vpop.f32.mrb[39].mxu0  ;;  %v2523_v25 = vadd.f32 %v2518_v12, %v4059_v22  ;;  %v3523_v22 = vld [vmem:[%s3901_s4] sm:$0xff]   ;;  %v3625_v12 = vmov (!%p3215_p8), 0.0  }
 0xcea   : > { %3434 = vmatpush3.bf16.msra.mxu0 %v3523_v22 }
 0xceb   : > { %v2526_v26 = vsel %vm1260_vm2, %v2523_v25, 0.0  ;;  %3435 = vmatprep.subr.bf16.mxu0 %v3609_v2 }
 0xcec   : > { %2527 = vadd.xlane.f32.xlu1 %v2526_v26 }
 0xcee   : > { %3436 = vmatpush3.bf16.msra.mxu0 %v3524_v35 }
 0xcef   : > { %3437 = vmatprep.subr.bf16.mxu0 %v3609_v2 }
 0xcf2   : > { %3438 = vmatpush3.bf16.msra.mxu0 %v3525_v46 }
 0xcf3   : > { %3439 = vmatprep.subr.bf16.mxu0 %v3609_v2  ;;  %v3207_v2 = vld [vmem:[%s1215_s26] ss:$0 sm:$0xff] }
 0xcf6   : > { %3440 = vmatpush3.bf16.msra.mxu0 %v3526_v29 }
 0xcf7   : > { %3445 = vmatprep.subr.bf16.mxu0 (!%p3215_p8), %v3625_v12 }
 0xd79   : > { %v2528_v27 = vpop.xlane.xlu1 %2527 }
 0xd7a   : > { %v2529_v28 = vmul.f32 0.03125, %v2528_v27  ;;  %v3216_v27 = vld [vmem:[%s4374_s25] ss:$0 sm:$0xff] (!%p3215_p8) }
 0xd7c   : > { %v2530_v30 = vsub.f32 %v2523_v25, %v2529_v28 }
 0xd7e   : > { %v2531_v31 = vmul.f32 %v2530_v30, %v2530_v30 }
 0xd80   : > { %v2532_v32 = vsel %vm1260_vm2, %v2531_v31, 0.0 }
 0xd81   : > { %2533 = vadd.xlane.f32.xlu0 %v2532_v32 }
 0xe0e   : > { %v2534_v36 = vpop.xlane.xlu0 %2533 }
 0xe0f   : > { %v2535_v37 = vmul.f32 0.03125, %v2534_v36 }
 0xe11   : > { %v2536_v38 = vadd.f32 1e-05, %v2535_v37 }
 0xe13   : > { %3561 = vrsqrt.f32 %v2536_v38 }
 0xe1d   : > { %v3562_v39 = vpop.eup %3561 }
 0xe1e   : > { %v2538_v41 = vmul.f32 %v3562_v39, %v2530_v30  ;;  %v3217_v30 = vld [vmem:[%s4375_s23] ss:$0 sm:$0xff] (!%p3215_p8) }
 0xe20   : > { %v2545_v43 = vmul.f32 %v3201_v40, %v2538_v41 }
 0xe22   : > { %v2552_v44 = vadd.f32 %v3202_v42, %v2545_v43 }
 0xe24   : > { %v2567_v45 = vpack.c.bf16 %v2552_v44, %v2552_v44 }
 0xe26   : > { %3430 = vmatmul.mubr.msk.bf16.vlgmr.msra.gmra.mrb[44].mxu1 %vm1260_vm2, %v2567_v45 }
 0xef9   : > { %v2623_v48 = vpop.f32.mrb[44].mxu1 }
 0xefa   : > { %v2624_v49 = vadd.f32 %v3203_v47, %v2623_v48  ;;  %v3431_v50 = vpop.f32.mrb[45].mxu1 }
 0xefb   : > { %v2626_v51 = vpop.f32.mrb[46].mxu1 }
 0xefc   : > { %v2629_v52 = vmax.f32 %v2624_v49, 0.0  ;;  %v3432_v53 = vpop.f32.mrb[47].mxu1 }
 0xefe   : > { %v2630_v54 = vpack.c.bf16 %v2629_v52, %v2629_v52 }
 0xf00   : > { %3442 = vmatmul.mubr.msk.bf16.vlgmr.msra.gmra.mrb[40].mxu0 %vm2661_vm7, %v2630_v54 }
 0xf01   : > { %3449 = vmatprep.mubr.msk.bf16.mxu0 (!%p3215_p8), %vm3626_vm8, %v3625_v12  ;;  %3446 = vmatpush3.bf16.msra.mxu0 (!%p3215_p8), %v3565_v20 }
 0xf02   : > { %3447 = vmatprep.subr.bf16.mxu0 (!%p3215_p8), %v3625_v12 }
 0xf05   : > { %3448 = vmatpush3.bf16.msra.mxu0 (!%p3215_p8), %v3566_v21 }
 0xfd3   : > { %v2699_v55 = vpop.f32.mrb[40].mxu0 }
 0xfd4   : > { %v2700_v56 = vadd.f32 %v3207_v2, %v2699_v55  ;;  %v3443_v57 = vpop.f32.mrb[41].mxu0 }
 0xfd5   : > { %v2702_v58 = vpop.f32.mrb[42].mxu0 }
 0xfd6   : > { %v3444_v59 = vpop.f32.mrb[43].mxu0  ;;  %v2705_v60 = vadd.f32 %v2700_v56, %v2552_v44 }
 0xfd8   : > { %v2708_v61 = vsel %vm1260_vm2, %v2705_v60, 0.0 }
 0xfd9   : > { %2709 = vadd.xlane.f32.xlu0 %v2708_v61 }
0x1066   : > { %v2710_v62 = vpop.xlane.xlu0 %2709 }
0x1067   : > { %v2711_v63 = vmul.f32 0.03125, %v2710_v62 }
0x1069   : > { %v2712_v0 = vsub.f32 %v2705_v60, %v2711_v63 }
0x106b   : > { %v2713_v1 = vmul.f32 %v2712_v0, %v2712_v0 }
0x106d   : > { %v2714_v3 = vsel %vm1260_vm2, %v2713_v1, 0.0 }
0x106e   : > { %2715 = vadd.xlane.f32.xlu1 %v2714_v3 }
0x10fb   : > { %v2716_v5 = vpop.xlane.xlu1 %2715 }
0x10fc   : > { %v2717_v6 = vmul.f32 0.03125, %v2716_v5 }
0x10fe   : > { %v2718_v7 = vadd.f32 1e-05, %v2717_v6 }
0x1100   : > { %3563 = vrsqrt.f32 %v2718_v7 }
0x110a   : > { %v3564_v8 = vpop.eup %3563 }
0x110b   : > { %v2720_v10 = vmul.f32 %v3564_v8, %v2712_v0  ;;  %2739 = sbr.rel (%p3215_p8) target bundleno = 4899 (0x1323), region = 140 }
0x110d   : > { %v2727_v11 = vmul.f32 %v3213_v9, %v2720_v10 }
0x110f   : > { %v2734_v13 = vadd.f32 %v3214_v4, %v2727_v11 }
0x1111   : > { %2735 = vst.msk [vmem:[#allocation2] sm:$0xff] %vm1260_vm2, %v2734_v13  ;;  %v2742_v14 = vsel (!%p3215_p8), %vm1260_vm2, %v2734_v13, 0.0 }
0x1112   : > { %2743 = vadd.xlane.f32.xlu0 %v2742_v14 }
0x119f   : > { %v2744_v15 = vpop.xlane.xlu0 %2743 }
0x11a0   : > { %v2745_v16 = vmul.f32 0.03125, %v2744_v15 }
0x11a2   : > { %v2746_v17 = vsub.f32 %v2734_v13, %v2745_v16 }
0x11a4   : > { %v2747_v18 = vmul.f32 %v2746_v17, %v2746_v17 }
0x11a6   : > { %v2748_v19 = vsel %vm1260_vm2, %v2747_v18, 0.0 }
0x11a7   : > { %2749 = vadd.xlane.f32.xlu0 %v2748_v19 }
0x1234   : > { %v2750_v23 = vpop.xlane.xlu0 %2749 }
0x1235   : > { %v2751_v24 = vmul.f32 0.03125, %v2750_v23 }
0x1237   : > { %v2752_v25 = vadd.f32 1e-05, %v2751_v24 }
0x1239   : > { %3567 = vrsqrt.f32 %v2752_v25 }
0x1243   : > { %v3568_v26 = vpop.eup %3567 }
0x1244   : > { %v2754_v28 = vmul.f32 %v3568_v26, %v2746_v17 }
0x1246   : > { %v2761_v31 = vmul.f32 %v3216_v27, %v2754_v28 }
0x1248   : > { %v2768_v32 = vadd.f32 %v3217_v30, %v2761_v31 }
0x124a   : > { %v2769_v33 = vpack.c.bf16 %v2768_v32, %v2768_v32 }
0x124c   : > { %3450 = vmatmul.mubr.msk.bf16.vlgmr.msra.gmra.mrb[0].mxu0 %vm1260_vm2, %v2769_v33 }
0x131f   : > { %v2830_v22 = vpop.f32.mrb[0].mxu0 }
0x1320   : > { %v2831_v35 = vadd.f32 %v3218_v34, %v2830_v22  ;;  %v3451_v36 = vpop.f32.mrb[1].mxu0 }
0x1321   : > { %v2833_v37 = vpop.f32.mrb[2].mxu0 }
0x1322   : > { %2836 = vst [vmem:[%s4378_s12] sm:$0xff] %v2831_v35  ;;  %v3452_v38 = vpop.f32.mrb[3].mxu0 }
0x1323 PF: > { %s4379_s7 = sld [smem:[#allocation6_spill]]  ;;  %s4380_s8 = sld [smem:[#allocation4_spill]] }
0x1324   : > { %s4381_s5 = sld [smem:[#allocation5_spill]]  ;;  %s4382_s9 = sld [smem:[#allocation7_spill]] }
0x1325   : > { %s4383_s30 = sld [smem:[#allocation8_spill]] }
0x1329   : > { %s38_s3 = sadd.s32 1, %s4379_s7  }
0x132a   : > { %p35_p9 = scmp.ge.s32.totalorder %s38_s3, 6  }
0x132c   :  { %37 = sbr.rel (!%p35_p9) target bundleno = 26 (0x1a), region = 239 }

</bundles_post_ra>
